<compile_context>
chip_gen: v7x
topology: tpu7x:2x2x1
jax: 0.10.0
libtpu: 0.0.40
codegen_flags: <defaults>
</compile_context>

<pallas_src>
import functools

import jax
import jax.numpy as jnp
from jax import lax
from jax.experimental import pallas as pl
from jax.experimental.pallas import tpu as pltpu


K_PAD = 64    # im2col contraction dim: C*9 + 1 (bias column) = 37, padded to 64
F_PAD = 128   # conv feature dim (32) zero-padded to 128 (extra cols exact zeros)


# ----------------------------------------------------------------------------
# Fused episode kernel:
#   Y = ReLU(X @ W)                      -- backbone conv-as-matmul (bias folded
#                                           into W; bf16 MXU, f32 accumulate)
#   M built in-kernel from SMEM labels   -- 1/HW baked in, bf16
#   Z = M @ Y ; Z[:n_way] /= counts      -- pooling + class-prototype means
#   scores = -||z_query - z_proto||_2    -- per-class VPU/XLU, no transpose
# ----------------------------------------------------------------------------
def episode_kernel(labels_ref, x_ref, w_ref, out_ref, *,
                   n_way, n_support, n_query, hw):
    nhw = x_ref.shape[0]
    r = n_way + n_query

    # --- backbone: one lane-dense bf16 matmul, (N*HW, 64) x (64, 128) --------
    y = jnp.dot(x_ref[...], w_ref[...],
                preferred_element_type=jnp.float32)          # (nhw, F_PAD) f32
    y = jnp.maximum(y, 0.0).astype(jnp.bfloat16)             # ReLU, cast for MXU

    # --- build pooling/prototype coefficients M (r, nhw) from SMEM labels ----
    # row < n_way        : 1/HW on columns belonging to support images of class=row
    # row >= n_way       : 1/HW on columns of query image (row - n_way)
    col = lax.broadcasted_iota(jnp.int32, (r, nhw), 1)
    row = lax.broadcasted_iota(jnp.int32, (r, nhw), 0)
    if hw & (hw - 1) == 0:                                   # power-of-two HW
        img = col >> (hw.bit_length() - 1)                   # image index per column
    else:
        img = lax.div(col, hw)                               # (non-neg, trunc == floor)

    col_label = jnp.full((r, nhw), -1, dtype=jnp.int32)
    for s in range(n_support):                               # static, tiny loop
        col_label = jnp.where(img == s, labels_ref[s], col_label)

    sup_mask = jnp.logical_and(row < n_way, col_label == row)
    qry_mask = jnp.logical_and(row >= n_way, img == row + (n_support - n_way))
    m = jnp.where(jnp.logical_or(sup_mask, qry_mask),
                  1.0 / hw, 0.0).astype(jnp.bfloat16)        # (r, nhw) bf16

    # --- pooling + prototype sums: single bf16 MXU pass -----------------------
    z = jnp.dot(m, y, preferred_element_type=jnp.float32)    # (r, F_PAD) f32

    # per-class 1/count scale applied post-hoc on the VPU (zero-count guarded)
    row1 = lax.broadcasted_iota(jnp.int32, (r, 1), 0)
    counts = jnp.zeros((r, 1), jnp.float32)
    for s in range(n_support):
        counts = counts + jnp.where(row1 == labels_ref[s], 1.0, 0.0)
    counts = jnp.where(row1 < n_way, jnp.maximum(counts, 1.0), 1.0)
    z = z * (1.0 / counts)

    # --- euclidean distances, per class on the VPU/XLU (no transpose) ---------
    # NOTE: (n_query, n_way) output is tiny -> masked column stores are
    # negligible here; compute into an (n_query, 128) slab before scaling n_way.
    zq = z[n_way:, :]                                        # (n_query, F_PAD)
    for c in range(n_way):
        diff = zq - z[c:c + 1, :]                            # broadcast (1, F_PAD)
        d2 = jnp.sum(diff * diff, axis=1, keepdims=True)     # (n_query, 1)
        out_ref[:, c:c + 1] = -jnp.sqrt(d2)


def run_episode(support_labels, patches, w_pad, *, n_way, n_support, n_query, hw):
    NHW, Kp = patches.shape
    Fp = w_pad.shape[1]
    kernel = functools.partial(episode_kernel, n_way=n_way, n_support=n_support,
                               n_query=n_query, hw=hw)
    # grid=(1,): the fused episode is single-tile-scale work.  Scaling plan: see
    # header comment -- NHW becomes the LAST ("arbitrary") reduction axis with a
    # Z accumulator scratch; tiles sized for v7x 32 MiB scoped VMEM.
    return pl.pallas_call(
        kernel,
        out_shape=jax.ShapeDtypeStruct((n_query, n_way), jnp.float32),
        grid_spec=pltpu.PrefetchScalarGridSpec(
            num_scalar_prefetch=1,                 # support_labels -> SMEM
            grid=(1,),
            in_specs=[
                pl.BlockSpec((NHW, Kp), lambda i, labels: (0, 0)),
                pl.BlockSpec((Kp, Fp), lambda i, labels: (0, 0)),
            ],
            out_specs=pl.BlockSpec((n_query, n_way), lambda i, labels: (0, 0)),
        ),
        compiler_params=pltpu.CompilerParams(
            dimension_semantics=("arbitrary",)),
    )(support_labels, patches, w_pad)


# ----------------------------------------------------------------------------
# Plain-JAX glue (fused into the same jit region)
# ----------------------------------------------------------------------------
def im2col_3x3_same_bias(x):
    """x: (N, C, H, W) f32 -> bf16 patches (N*H*W, K_PAD) with a ones column at
    index C*9 (for the folded bias) and zero padding up to K_PAD."""
    N, C, H, W = x.shape
    x = jnp.transpose(x, (0, 2, 3, 1)).astype(jnp.bfloat16)          # NHWC, bf16
    xp = jnp.pad(x, ((0, 0), (1, 1), (1, 1), (0, 0)))
    cols = [xp[:, dh:dh + H, dw:dw + W, :] for dh in range(3) for dw in range(3)]
    patches = jnp.stack(cols, axis=-1)                               # (N, H, W, C, 9)
    patches = patches.reshape(N * H * W, C * 9)
    ones = jnp.ones((N * H * W, 1), jnp.bfloat16)                    # bias column
    patches = jnp.concatenate([patches, ones], axis=1)               # (NHW, C*9+1)
    patches = jnp.pad(patches, ((0, 0), (0, K_PAD - (C * 9 + 1))))
    return patches


@functools.partial(jax.jit, static_argnames=("n_way",))
def prototypical_forward(support_images, support_labels, query_images,
                         conv_w, conv_b, n_way):
    """Mirrors PrototypicalNetworks.forward (scores = -cdist(z_query, z_proto)).
    n_way is static (PyTorch derives it from torch.unique at runtime)."""
    Ns = support_images.shape[0]
    Nq = query_images.shape[0]
    H, W = support_images.shape[2], support_images.shape[3]
    hw = H * W

    images = jnp.concatenate([support_images, query_images], axis=0)  # (Ns+Nq, C, H, W)
    patches = im2col_3x3_same_bias(images)                            # ((Ns+Nq)*HW, 64) bf16

    K, F = conv_w.shape                                               # (C*9, 32)
    w_pad = jnp.zeros((K_PAD, F_PAD), jnp.bfloat16)
    w_pad = w_pad.at[:K, :F].set(conv_w.astype(jnp.bfloat16))
    w_pad = w_pad.at[K, :F].set(conv_b.astype(jnp.bfloat16))          # folded bias row

    labels = support_labels.astype(jnp.int32)
    return run_episode(labels, patches, w_pad, n_way=n_way,
                       n_support=Ns, n_query=Nq, hw=hw)               # (Nq, n_way)


if __name__ == "__main__":
    key = jax.random.PRNGKey(0)
    k_w, k_b, k_s, k_q = jax.random.split(key, 4)

    # small few-shot episode: 2-way, 5-shot support, 3 queries per class
    n_way, n_shot, n_query_per = 2, 5, 3
    C, H, W, F = 4, 16, 16, 32
    Ns = n_way * n_shot
    Nq = n_way * n_query_per

    # deterministic backbone parameters (Conv2d(4,32,3) reshaped for the im2col matmul)
    conv_w = jax.random.normal(k_w, (C * 9, F), dtype=jnp.float32) * 0.1
    conv_b = jax.random.normal(k_b, (F,), dtype=jnp.float32) * 0.01

    support_images = jax.random.normal(k_s, (Ns, C, H, W), dtype=jnp.float32)
    query_images = jax.random.normal(k_q, (Nq, C, H, W), dtype=jnp.float32)
    support_labels = jnp.repeat(jnp.arange(n_way, dtype=jnp.int32), n_shot)

    scores = prototypical_forward(support_images, support_labels, query_images,
                                  conv_w, conv_b, n_way)
    scores = jax.block_until_ready(scores)
    assert scores.shape == (Nq, n_way)
    assert bool(jnp.all(scores <= 0.0))   # scores are negative distances
    print("KERNEL_OK")
</pallas_src>

<mosaic_0001>
module attributes {stable_mosaic.version = 11 : i64} {
  func.func @episode_kernel(%arg0: i32, %arg1: memref<10xi32, #tpu.memory_space<smem>>, %arg2: memref<4096x64xbf16, #tpu.memory_space<vmem>>, %arg3: memref<64x128xbf16, #tpu.memory_space<vmem>>, %arg4: memref<6x2xf32, #tpu.memory_space<vmem>>) attributes {dimension_semantics = [#tpu.dimension_semantics<arbitrary>], iteration_bounds = array<i64: 1>, scalar_prefetch = 1 : i64, scratch_operands = 0 : i64, tpu.core_type = #tpu.core_type<tc>, window_params = [{pipeline_mode = #tpu.pipeline_mode<synchronous>, transform_indices = @transform_0, window_bounds = array<i64: 4096, 64>}, {pipeline_mode = #tpu.pipeline_mode<synchronous>, transform_indices = @transform_1, window_bounds = array<i64: 64, 128>}, {pipeline_mode = #tpu.pipeline_mode<synchronous>, transform_indices = @transform_2, window_bounds = array<i64: 6, 2>}]} {
    %c0 = arith.constant 0 : index
    %c0_0 = arith.constant 0 : index
    %0 = vector.load %arg2[%c0, %c0_0] : memref<4096x64xbf16, #tpu.memory_space<vmem>>, vector<4096x64xbf16>
    %c0_1 = arith.constant 0 : index
    %c0_2 = arith.constant 0 : index
    %1 = vector.load %arg3[%c0_1, %c0_2] : memref<64x128xbf16, #tpu.memory_space<vmem>>, vector<64x128xbf16>
    %cst = arith.constant dense<0.000000e+00> : vector<4096x128xf32>
    %2 = tpu.matmul %0, %1, %cst {dimension_numbers = #tpu.dot_dimension_numbers<[1], [0], [0], [1], [0, 0, 1, 1], [], []>} : vector<4096x64xbf16>, vector<64x128xbf16>, vector<4096x128xf32> -> vector<4096x128xf32>
    %cst_3 = arith.constant 0.000000e+00 : f32
    %3 = vector.broadcast %cst_3 : f32 to vector<4096x128xf32>
    %4 = arith.maximumf %2, %3 : vector<4096x128xf32>
    %5 = arith.truncf %4 : vector<4096x128xf32> to vector<4096x128xbf16>
    %6 = tpu.iota {dimensions = array<i32: 1>} : vector<8x4096xi32>
    %7 = tpu.iota {dimensions = array<i32: 0>} : vector<8x4096xi32>
    %c8_i32 = arith.constant 8 : i32
    %8 = vector.broadcast %c8_i32 : i32 to vector<8x4096xi32>
    %9 = arith.shrsi %6, %8 : vector<8x4096xi32>
    %c-1_i32 = arith.constant -1 : i32
    %10 = vector.broadcast %c-1_i32 : i32 to vector<8x4096xi32>
    %c0_i32 = arith.constant 0 : i32
    %11 = vector.broadcast %c0_i32 : i32 to vector<8x4096xi32>
    %12 = arith.cmpi eq, %9, %11 : vector<8x4096xi32>
    %c0_4 = arith.constant 0 : index
    %13 = memref.load %arg1[%c0_4] : memref<10xi32, #tpu.memory_space<smem>>
    %14 = vector.broadcast %13 : i32 to vector<8x4096xi32>
    %15 = arith.select %12, %14, %10 : vector<8x4096xi1>, vector<8x4096xi32>
    %c1_i32 = arith.constant 1 : i32
    %16 = vector.broadcast %c1_i32 : i32 to vector<8x4096xi32>
    %17 = arith.cmpi eq, %9, %16 : vector<8x4096xi32>
    %c1 = arith.constant 1 : index
    %18 = memref.load %arg1[%c1] : memref<10xi32, #tpu.memory_space<smem>>
    %19 = vector.broadcast %18 : i32 to vector<8x4096xi32>
    %20 = arith.select %17, %19, %15 : vector<8x4096xi1>, vector<8x4096xi32>
    %c2_i32 = arith.constant 2 : i32
    %21 = vector.broadcast %c2_i32 : i32 to vector<8x4096xi32>
    %22 = arith.cmpi eq, %9, %21 : vector<8x4096xi32>
    %c2 = arith.constant 2 : index
    %23 = memref.load %arg1[%c2] : memref<10xi32, #tpu.memory_space<smem>>
    %24 = vector.broadcast %23 : i32 to vector<8x4096xi32>
    %25 = arith.select %22, %24, %20 : vector<8x4096xi1>, vector<8x4096xi32>
    %c3_i32 = arith.constant 3 : i32
    %26 = vector.broadcast %c3_i32 : i32 to vector<8x4096xi32>
    %27 = arith.cmpi eq, %9, %26 : vector<8x4096xi32>
    %c3 = arith.constant 3 : index
    %28 = memref.load %arg1[%c3] : memref<10xi32, #tpu.memory_space<smem>>
    %29 = vector.broadcast %28 : i32 to vector<8x4096xi32>
    %30 = arith.select %27, %29, %25 : vector<8x4096xi1>, vector<8x4096xi32>
    %c4_i32 = arith.constant 4 : i32
    %31 = vector.broadcast %c4_i32 : i32 to vector<8x4096xi32>
    %32 = arith.cmpi eq, %9, %31 : vector<8x4096xi32>
    %c4 = arith.constant 4 : index
    %33 = memref.load %arg1[%c4] : memref<10xi32, #tpu.memory_space<smem>>
    %34 = vector.broadcast %33 : i32 to vector<8x4096xi32>
    %35 = arith.select %32, %34, %30 : vector<8x4096xi1>, vector<8x4096xi32>
    %c5_i32 = arith.constant 5 : i32
    %36 = vector.broadcast %c5_i32 : i32 to vector<8x4096xi32>
    %37 = arith.cmpi eq, %9, %36 : vector<8x4096xi32>
    %c5 = arith.constant 5 : index
    %38 = memref.load %arg1[%c5] : memref<10xi32, #tpu.memory_space<smem>>
    %39 = vector.broadcast %38 : i32 to vector<8x4096xi32>
    %40 = arith.select %37, %39, %35 : vector<8x4096xi1>, vector<8x4096xi32>
    %c6_i32 = arith.constant 6 : i32
    %41 = vector.broadcast %c6_i32 : i32 to vector<8x4096xi32>
    %42 = arith.cmpi eq, %9, %41 : vector<8x4096xi32>
    %c6 = arith.constant 6 : index
    %43 = memref.load %arg1[%c6] : memref<10xi32, #tpu.memory_space<smem>>
    %44 = vector.broadcast %43 : i32 to vector<8x4096xi32>
    %45 = arith.select %42, %44, %40 : vector<8x4096xi1>, vector<8x4096xi32>
    %c7_i32 = arith.constant 7 : i32
    %46 = vector.broadcast %c7_i32 : i32 to vector<8x4096xi32>
    %47 = arith.cmpi eq, %9, %46 : vector<8x4096xi32>
    %c7 = arith.constant 7 : index
    %48 = memref.load %arg1[%c7] : memref<10xi32, #tpu.memory_space<smem>>
    %49 = vector.broadcast %48 : i32 to vector<8x4096xi32>
    %50 = arith.select %47, %49, %45 : vector<8x4096xi1>, vector<8x4096xi32>
    %c8_i32_5 = arith.constant 8 : i32
    %51 = vector.broadcast %c8_i32_5 : i32 to vector<8x4096xi32>
    %52 = arith.cmpi eq, %9, %51 : vector<8x4096xi32>
    %c8 = arith.constant 8 : index
    %53 = memref.load %arg1[%c8] : memref<10xi32, #tpu.memory_space<smem>>
    %54 = vector.broadcast %53 : i32 to vector<8x4096xi32>
    %55 = arith.select %52, %54, %50 : vector<8x4096xi1>, vector<8x4096xi32>
    %c9_i32 = arith.constant 9 : i32
    %56 = vector.broadcast %c9_i32 : i32 to vector<8x4096xi32>
    %57 = arith.cmpi eq, %9, %56 : vector<8x4096xi32>
    %c9 = arith.constant 9 : index
    %58 = memref.load %arg1[%c9] : memref<10xi32, #tpu.memory_space<smem>>
    %59 = vector.broadcast %58 : i32 to vector<8x4096xi32>
    %60 = arith.select %57, %59, %55 : vector<8x4096xi1>, vector<8x4096xi32>
    %c2_i32_6 = arith.constant 2 : i32
    %61 = vector.broadcast %c2_i32_6 : i32 to vector<8x4096xi32>
    %62 = arith.cmpi slt, %7, %61 : vector<8x4096xi32>
    %63 = arith.cmpi eq, %60, %7 : vector<8x4096xi32>
    %64 = arith.andi %62, %63 : vector<8x4096xi1>
    %c2_i32_7 = arith.constant 2 : i32
    %65 = vector.broadcast %c2_i32_7 : i32 to vector<8x4096xi32>
    %66 = arith.cmpi sge, %7, %65 : vector<8x4096xi32>
    %c8_i32_8 = arith.constant 8 : i32
    %67 = vector.broadcast %c8_i32_8 : i32 to vector<8x4096xi32>
    %68 = arith.addi %7, %67 : vector<8x4096xi32>
    %69 = arith.cmpi eq, %9, %68 : vector<8x4096xi32>
    %70 = arith.andi %66, %69 : vector<8x4096xi1>
    %71 = arith.ori %64, %70 : vector<8x4096xi1>
    %cst_9 = arith.constant 3.906250e-03 : f32
    %cst_10 = arith.constant 0.000000e+00 : f32
    %72 = vector.broadcast %cst_9 : f32 to vector<8x4096xf32>
    %73 = vector.broadcast %cst_10 : f32 to vector<8x4096xf32>
    %74 = arith.select %71, %72, %73 : vector<8x4096xi1>, vector<8x4096xf32>
    %75 = arith.truncf %74 : vector<8x4096xf32> to vector<8x4096xbf16>
    %cst_11 = arith.constant dense<0.000000e+00> : vector<8x128xf32>
    %76 = tpu.matmul %75, %5, %cst_11 {dimension_numbers = #tpu.dot_dimension_numbers<[1], [0], [0], [1], [0, 0, 1, 1], [], []>} : vector<8x4096xbf16>, vector<4096x128xbf16>, vector<8x128xf32> -> vector<8x128xf32>
    %77 = tpu.iota {dimensions = array<i32: 0>} : vector<8x1xi32>
    %cst_12 = arith.constant 0.000000e+00 : f32
    %78 = vector.broadcast %cst_12 : f32 to vector<8x1xf32>
    %c0_13 = arith.constant 0 : index
    %79 = memref.load %arg1[%c0_13] : memref<10xi32, #tpu.memory_space<smem>>
    %80 = vector.broadcast %79 : i32 to vector<8x1xi32>
    %81 = arith.cmpi eq, %77, %80 : vector<8x1xi32>
    %cst_14 = arith.constant 1.000000e+00 : f32
    %cst_15 = arith.constant 0.000000e+00 : f32
    %82 = vector.broadcast %cst_14 : f32 to vector<8x1xf32>
    %83 = vector.broadcast %cst_15 : f32 to vector<8x1xf32>
    %84 = arith.select %81, %82, %83 : vector<8x1xi1>, vector<8x1xf32>
    %85 = arith.addf %78, %84 : vector<8x1xf32>
    %c1_16 = arith.constant 1 : index
    %86 = memref.load %arg1[%c1_16] : memref<10xi32, #tpu.memory_space<smem>>
    %87 = vector.broadcast %86 : i32 to vector<8x1xi32>
    %88 = arith.cmpi eq, %77, %87 : vector<8x1xi32>
    %cst_17 = arith.constant 1.000000e+00 : f32
    %cst_18 = arith.constant 0.000000e+00 : f32
    %89 = vector.broadcast %cst_17 : f32 to vector<8x1xf32>
    %90 = vector.broadcast %cst_18 : f32 to vector<8x1xf32>
    %91 = arith.select %88, %89, %90 : vector<8x1xi1>, vector<8x1xf32>
    %92 = arith.addf %85, %91 : vector<8x1xf32>
    %c2_19 = arith.constant 2 : index
    %93 = memref.load %arg1[%c2_19] : memref<10xi32, #tpu.memory_space<smem>>
    %94 = vector.broadcast %93 : i32 to vector<8x1xi32>
    %95 = arith.cmpi eq, %77, %94 : vector<8x1xi32>
    %cst_20 = arith.constant 1.000000e+00 : f32
    %cst_21 = arith.constant 0.000000e+00 : f32
    %96 = vector.broadcast %cst_20 : f32 to vector<8x1xf32>
    %97 = vector.broadcast %cst_21 : f32 to vector<8x1xf32>
    %98 = arith.select %95, %96, %97 : vector<8x1xi1>, vector<8x1xf32>
    %99 = arith.addf %92, %98 : vector<8x1xf32>
    %c3_22 = arith.constant 3 : index
    %100 = memref.load %arg1[%c3_22] : memref<10xi32, #tpu.memory_space<smem>>
    %101 = vector.broadcast %100 : i32 to vector<8x1xi32>
    %102 = arith.cmpi eq, %77, %101 : vector<8x1xi32>
    %cst_23 = arith.constant 1.000000e+00 : f32
    %cst_24 = arith.constant 0.000000e+00 : f32
    %103 = vector.broadcast %cst_23 : f32 to vector<8x1xf32>
    %104 = vector.broadcast %cst_24 : f32 to vector<8x1xf32>
    %105 = arith.select %102, %103, %104 : vector<8x1xi1>, vector<8x1xf32>
    %106 = arith.addf %99, %105 : vector<8x1xf32>
    %c4_25 = arith.constant 4 : index
    %107 = memref.load %arg1[%c4_25] : memref<10xi32, #tpu.memory_space<smem>>
    %108 = vector.broadcast %107 : i32 to vector<8x1xi32>
    %109 = arith.cmpi eq, %77, %108 : vector<8x1xi32>
    %cst_26 = arith.constant 1.000000e+00 : f32
    %cst_27 = arith.constant 0.000000e+00 : f32
    %110 = vector.broadcast %cst_26 : f32 to vector<8x1xf32>
    %111 = vector.broadcast %cst_27 : f32 to vector<8x1xf32>
    %112 = arith.select %109, %110, %111 : vector<8x1xi1>, vector<8x1xf32>
    %113 = arith.addf %106, %112 : vector<8x1xf32>
    %c5_28 = arith.constant 5 : index
    %114 = memref.load %arg1[%c5_28] : memref<10xi32, #tpu.memory_space<smem>>
    %115 = vector.broadcast %114 : i32 to vector<8x1xi32>
    %116 = arith.cmpi eq, %77, %115 : vector<8x1xi32>
    %cst_29 = arith.constant 1.000000e+00 : f32
    %cst_30 = arith.constant 0.000000e+00 : f32
    %117 = vector.broadcast %cst_29 : f32 to vector<8x1xf32>
    %118 = vector.broadcast %cst_30 : f32 to vector<8x1xf32>
    %119 = arith.select %116, %117, %118 : vector<8x1xi1>, vector<8x1xf32>
    %120 = arith.addf %113, %119 : vector<8x1xf32>
    %c6_31 = arith.constant 6 : index
    %121 = memref.load %arg1[%c6_31] : memref<10xi32, #tpu.memory_space<smem>>
    %122 = vector.broadcast %121 : i32 to vector<8x1xi32>
    %123 = arith.cmpi eq, %77, %122 : vector<8x1xi32>
    %cst_32 = arith.constant 1.000000e+00 : f32
    %cst_33 = arith.constant 0.000000e+00 : f32
    %124 = vector.broadcast %cst_32 : f32 to vector<8x1xf32>
    %125 = vector.broadcast %cst_33 : f32 to vector<8x1xf32>
    %126 = arith.select %123, %124, %125 : vector<8x1xi1>, vector<8x1xf32>
    %127 = arith.addf %120, %126 : vector<8x1xf32>
    %c7_34 = arith.constant 7 : index
    %128 = memref.load %arg1[%c7_34] : memref<10xi32, #tpu.memory_space<smem>>
    %129 = vector.broadcast %128 : i32 to vector<8x1xi32>
    %130 = arith.cmpi eq, %77, %129 : vector<8x1xi32>
    %cst_35 = arith.constant 1.000000e+00 : f32
    %cst_36 = arith.constant 0.000000e+00 : f32
    %131 = vector.broadcast %cst_35 : f32 to vector<8x1xf32>
    %132 = vector.broadcast %cst_36 : f32 to vector<8x1xf32>
    %133 = arith.select %130, %131, %132 : vector<8x1xi1>, vector<8x1xf32>
    %134 = arith.addf %127, %133 : vector<8x1xf32>
    %c8_37 = arith.constant 8 : index
    %135 = memref.load %arg1[%c8_37] : memref<10xi32, #tpu.memory_space<smem>>
    %136 = vector.broadcast %135 : i32 to vector<8x1xi32>
    %137 = arith.cmpi eq, %77, %136 : vector<8x1xi32>
    %cst_38 = arith.constant 1.000000e+00 : f32
    %cst_39 = arith.constant 0.000000e+00 : f32
    %138 = vector.broadcast %cst_38 : f32 to vector<8x1xf32>
    %139 = vector.broadcast %cst_39 : f32 to vector<8x1xf32>
    %140 = arith.select %137, %138, %139 : vector<8x1xi1>, vector<8x1xf32>
    %141 = arith.addf %134, %140 : vector<8x1xf32>
    %c9_40 = arith.constant 9 : index
    %142 = memref.load %arg1[%c9_40] : memref<10xi32, #tpu.memory_space<smem>>
    %143 = vector.broadcast %142 : i32 to vector<8x1xi32>
    %144 = arith.cmpi eq, %77, %143 : vector<8x1xi32>
    %cst_41 = arith.constant 1.000000e+00 : f32
    %cst_42 = arith.constant 0.000000e+00 : f32
    %145 = vector.broadcast %cst_41 : f32 to vector<8x1xf32>
    %146 = vector.broadcast %cst_42 : f32 to vector<8x1xf32>
    %147 = arith.select %144, %145, %146 : vector<8x1xi1>, vector<8x1xf32>
    %148 = arith.addf %141, %147 : vector<8x1xf32>
    %c2_i32_43 = arith.constant 2 : i32
    %149 = vector.broadcast %c2_i32_43 : i32 to vector<8x1xi32>
    %150 = arith.cmpi slt, %77, %149 : vector<8x1xi32>
    %cst_44 = arith.constant 1.000000e+00 : f32
    %151 = vector.broadcast %cst_44 : f32 to vector<8x1xf32>
    %152 = arith.maximumf %148, %151 : vector<8x1xf32>
    %cst_45 = arith.constant 1.000000e+00 : f32
    %153 = vector.broadcast %cst_45 : f32 to vector<8x1xf32>
    %154 = arith.select %150, %152, %153 : vector<8x1xi1>, vector<8x1xf32>
    %cst_46 = arith.constant 1.000000e+00 : f32
    %155 = vector.broadcast %cst_46 : f32 to vector<8x1xf32>
    %156 = arith.divf %155, %154 : vector<8x1xf32>
    %157 = vector.broadcast %156 : vector<8x1xf32> to vector<8x128xf32>
    %158 = arith.mulf %76, %157 : vector<8x128xf32>
    %159 = vector.extract_strided_slice %158 {offsets = [2, 0], sizes = [6, 128], strides = [1, 1]} : vector<8x128xf32> to vector<6x128xf32>
    %160 = vector.extract_strided_slice %158 {offsets = [0, 0], sizes = [1, 128], strides = [1, 1]} : vector<8x128xf32> to vector<1x128xf32>
    %161 = vector.broadcast %160 : vector<1x128xf32> to vector<6x128xf32>
    %162 = arith.subf %159, %161 : vector<6x128xf32>
    %163 = arith.mulf %162, %162 : vector<6x128xf32>
    %cst_47 = arith.constant dense<0.000000e+00> : vector<6xf32>
    %164 = vector.multi_reduction <add>, %163, %cst_47 [1] : vector<6x128xf32> to vector<6xf32>
    %165 = vector.shape_cast %164 : vector<6xf32> to vector<6x1xf32>
    %166 = math.sqrt %165 : vector<6x1xf32>
    %cst_48 = arith.constant 0.000000e+00 : f32
    %167 = vector.broadcast %cst_48 : f32 to vector<6x1xf32>
    %168 = arith.subf %167, %166 : vector<6x1xf32>
    %c0_49 = arith.constant 0 : index
    %c0_50 = arith.constant 0 : index
    %169 = vector.load %arg4[%c0_49, %c0_50] : memref<6x2xf32, #tpu.memory_space<vmem>>, vector<6x1xf32>
    tpu.vector_store %arg4[%c0_49, %c0_50], %168 {strides = array<i32>} : memref<6x2xf32, #tpu.memory_space<vmem>>, vector<6x1xf32>,
    %170 = vector.extract_strided_slice %158 {offsets = [1, 0], sizes = [1, 128], strides = [1, 1]} : vector<8x128xf32> to vector<1x128xf32>
    %171 = vector.broadcast %170 : vector<1x128xf32> to vector<6x128xf32>
    %172 = arith.subf %159, %171 : vector<6x128xf32>
    %173 = arith.mulf %172, %172 : vector<6x128xf32>
    %cst_51 = arith.constant dense<0.000000e+00> : vector<6xf32>
    %174 = vector.multi_reduction <add>, %173, %cst_51 [1] : vector<6x128xf32> to vector<6xf32>
    %175 = vector.shape_cast %174 : vector<6xf32> to vector<6x1xf32>
    %176 = math.sqrt %175 : vector<6x1xf32>
    %cst_52 = arith.constant 0.000000e+00 : f32
    %177 = vector.broadcast %cst_52 : f32 to vector<6x1xf32>
    %178 = arith.subf %177, %176 : vector<6x1xf32>
    %c0_53 = arith.constant 0 : index
    %c1_54 = arith.constant 1 : index
    %179 = vector.load %arg4[%c0_53, %c1_54] : memref<6x2xf32, #tpu.memory_space<vmem>>, vector<6x1xf32>
    tpu.vector_store %arg4[%c0_53, %c1_54], %178 {strides = array<i32>} : memref<6x2xf32, #tpu.memory_space<vmem>>, vector<6x1xf32>,
    return
  }
  func.func @transform_0(%arg0: i32, %arg1: memref<10xi32, #tpu.memory_space<smem>>) -> (i32, i32) {
    %c0_i32 = arith.constant 0 : i32
    %c0_i32_0 = arith.constant 0 : i32
    %c0_i32_1 = arith.constant 0 : i32
    return %c0_i32, %c0_i32_0 : i32, i32
  }
  func.func @transform_1(%arg0: i32, %arg1: memref<10xi32, #tpu.memory_space<smem>>) -> (i32, i32) {
    %c0_i32 = arith.constant 0 : i32
    %c0_i32_0 = arith.constant 0 : i32
    %c0_i32_1 = arith.constant 0 : i32
    return %c0_i32, %c0_i32_0 : i32, i32
  }
  func.func @transform_2(%arg0: i32, %arg1: memref<10xi32, #tpu.memory_space<smem>>) -> (i32, i32) {
    %c0_i32 = arith.constant 0 : i32
    %c0_i32_0 = arith.constant 0 : i32
    %c0_i32_1 = arith.constant 0 : i32
    return %c0_i32, %c0_i32_0 : i32, i32
  }
}

</mosaic_0001>

<bundles_post_ra>
// kernel: prototypical_forward.1
= control target key start
LH: loop header
LB: loop body
LE: loop exit
PB: predicated region body
PF: predicated region fallthrough
CT: control target
= control target key end

     0   :  { %s12234_s0 = inlined_call_operand.vmem [shape: s32[10], index: 0, kind: input, shape index: {}]   ;;  %s12235_s1 = inlined_call_operand.vmem [shape: bf16[4096,64], index: 1, kind: input, shape index: {}]   ;;  %s12236_s2 = inlined_call_operand.vmem [shape: bf16[64,128], index: 2, kind: input, shape index: {}]   ;;  %s12237_s3 = inlined_call_operand.vmem [shape: f32[6,2], index: 3, kind: output, shape index: {}]  }
   0x1   :  { %s8_s14 = sshll.u32 %s12234_s0, 4  ;;  %s9_s14 = int_to_ptr.vmem [resolvable:$true] %s8_s14 }
   0x2   :  { %s9131_s15 = scalar_lea.vmem %s9_s14, 16  ;;  %p9136_p1 = scmp.lt.s32.totalorder %s9_s14, %s9_s14 }
   0x3   :  { %p9132_p0 = scmp.ne.s32.totalorder %s9_s14, %s9131_s15  ;;  %p9137_p2 = scmp.lt.s32.totalorder %s9131_s15, %s9131_s15 }
   0x5   :  { %p9138_p3 = por %p9137_p2, %p9136_p1 }
   0x7   :  { %p9139_p4 = pnand %p9138_p3, %p9132_p0 }
   0x9   :  { %9142 = shalt.err (!%p9139_p4)  }
   0xa   :  { %s9145_s16 = smov [#allocation3]  }
   0xb   :  { %11 = dma.vmem_to_smem %s9_s14, 16, %s9145_s16, [#allocation2] }
   0xc   :  { %9143 = dma.done.wait [#allocation2], 16 }
   0xd   :  { %9144 = vsyncadd [#allocation2], 4294967280 }
   0xe   :  { %13 = sfence }
   0xf   :  { %v8865_v0 = vld [vmem:[%s12236_s2] sm:$0xff]   ;;  %v8866_v1 = vld [vmem:[%s12236_s2 + $0x8] sm:$0xff]   ;;  %v8867_v2 = vld [vmem:[%s12236_s2 + $0x10] sm:$0xff]   ;;  %vm1843_vm0 = vcmask 523264   ;;  %s5560_s23 = sld [smem:[#allocation3]]  ;;  %s9587_s24 = sld [smem:[#allocation3 + $0x1]] }
  0x10   :  { %8334 = vmatprep.subr.bf16.mxu0 %v8865_v0  ;;  %8854 = vmatprep.subr.bf16.mxu1 %v8865_v0  ;;  %v8869_v3 = vld [vmem:[%s12235_s1] sm:$0xff]   ;;  %v8868_v4 = vld [vmem:[%s12236_s2 + $0x18] sm:$0xff]   ;;  %v8870_v5 = vld [vmem:[%s12235_s1 + $0x8] sm:$0xff]   ;;  %s9594_s27 = sld [smem:[#allocation3 + $0x2]]  ;;  %s9597_s28 = sld [smem:[#allocation3 + $0x3]] }
  0x11   :  { %8335 = vmatpush3.bf16.msra.mxu0 %v8865_v0  ;;  %8858 = vmatpush3.bf16.msra.mxu1 %v8865_v0  ;;  %v8871_v6 = vld [vmem:[%s12235_s1 + $0x10] sm:$0xff]   ;;  %v8884_v8 = vld [vmem:[%s12235_s1 + $0x5f8] sm:$0xff]   ;;  %v8887_v10 = vld [vmem:[%s12235_s1 + $0x600] sm:$0xff]   ;;  %s9615_s9 = sld [smem:[#allocation3 + $0x4]]  ;;  %s9630_s16 = sld [smem:[#allocation3 + $0x5]] }
  0x12   :  { %8336 = vmatprep.subr.bf16.mxu0 %v8866_v1  ;;  %8855 = vmatprep.subr.bf16.mxu1 %v8866_v1  ;;  %v8883_v7 = vld [vmem:[%s12235_s1 + $0x5f0] sm:$0xff]   ;;  %v8872_v9 = vld [vmem:[%s12235_s1 + $0x18] sm:$0xff]   ;;  %v8873_v11 = vld [vmem:[%s12235_s1 + $0x20] sm:$0xff]   ;;  %s7654_s5 = sld [smem:[#allocation3 + $0x6]]  ;;  %s9717_s12 = sld [smem:[#allocation3 + $0x8]] }
  0x13   :  { %8342 = vmatprep.mubr.msk.bf16.mxu0 %vm1843_vm0, %v8869_v3  ;;  %8722 = vmatprep.mubr.msk.bf16.mxu1 %vm1843_vm0, %v8883_v7  ;;  %v8888_v12 = vld [vmem:[%s12235_s1 + $0x608] sm:$0xff]   ;;  %v8891_v13 = vld [vmem:[%s12235_s1 + $0x610] sm:$0xff]   ;;  %v8892_v16 = vld [vmem:[%s12235_s1 + $0x618] sm:$0xff]   ;;  %s9735_s17 = sld [smem:[#allocation3 + $0x9]] }
  0x14   :  { %v8874_v14 = vld [vmem:[%s12235_s1 + $0x28] sm:$0xff]   ;;  %v8875_v15 = vld [vmem:[%s12235_s1 + $0x30] sm:$0xff]   ;;  %v8895_v17 = vld [vmem:[%s12235_s1 + $0x620] sm:$0xff]  }
  0x15   :  { %8337 = vmatpush3.bf16.msra.mxu0 %v8866_v1  ;;  %8859 = vmatpush3.bf16.msra.mxu1 %v8866_v1  ;;  %v8876_v18 = vld [vmem:[%s12235_s1 + $0x38] sm:$0xff]   ;;  %v8877_v19 = vld [vmem:[%s12235_s1 + $0x40] sm:$0xff]   ;;  %v8896_v20 = vld [vmem:[%s12235_s1 + $0x628] sm:$0xff]  }
  0x16   :  { %8338 = vmatprep.subr.bf16.mxu0 %v8867_v2  ;;  %8856 = vmatprep.subr.bf16.mxu1 %v8867_v2  ;;  %v8899_v21 = vld [vmem:[%s12235_s1 + $0x630] sm:$0xff]   ;;  %v8878_v22 = vld [vmem:[%s12235_s1 + $0x48] sm:$0xff]   ;;  %v8900_v24 = vld [vmem:[%s12235_s1 + $0x638] sm:$0xff]  }
  0x17   :  { %v8879_v23 = vld [vmem:[%s12235_s1 + $0x50] sm:$0xff]   ;;  %v8903_v25 = vld [vmem:[%s12235_s1 + $0x640] sm:$0xff]   ;;  %v8880_v26 = vld [vmem:[%s12235_s1 + $0x58] sm:$0xff]  }
  0x18   :  { %v8881_v27 = vld [vmem:[%s12235_s1 + $0x60] sm:$0xff]   ;;  %v8904_v28 = vld [vmem:[%s12235_s1 + $0x648] sm:$0xff]   ;;  %v8907_v29 = vld [vmem:[%s12235_s1 + $0x650] sm:$0xff]  }
  0x19   :  { %8339 = vmatpush3.bf16.msra.mxu0 %v8867_v2  ;;  %8860 = vmatpush3.bf16.msra.mxu1 %v8867_v2  ;;  %v8882_v30 = vld [vmem:[%s12235_s1 + $0x68] sm:$0xff]   ;;  %v8885_v31 = vld [vmem:[%s12235_s1 + $0x70] sm:$0xff]   ;;  %v8908_v32 = vld [vmem:[%s12235_s1 + $0x658] sm:$0xff]  }
  0x1a   :  { %8340 = vmatprep.subr.bf16.mxu0 %v8868_v4  ;;  %8857 = vmatprep.subr.bf16.mxu1 %v8868_v4  ;;  %v8911_v33 = vld [vmem:[%s12235_s1 + $0x660] sm:$0xff]   ;;  %v8886_v34 = vld [vmem:[%s12235_s1 + $0x78] sm:$0xff]   ;;  %v8912_v36 = vld [vmem:[%s12235_s1 + $0x668] sm:$0xff]  }
  0x1b   :  { %v8889_v35 = vld [vmem:[%s12235_s1 + $0x80] sm:$0xff]   ;;  %v8915_v37 = vld [vmem:[%s12235_s1 + $0x670] sm:$0xff]   ;;  %v8890_v38 = vld [vmem:[%s12235_s1 + $0x88] sm:$0xff]  }
  0x1c   :  { %v8893_v39 = vld [vmem:[%s12235_s1 + $0x90] sm:$0xff]   ;;  %v8916_v40 = vld [vmem:[%s12235_s1 + $0x678] sm:$0xff]   ;;  %v8919_v41 = vld [vmem:[%s12235_s1 + $0x680] sm:$0xff]  }
  0x1d   :  { %8341 = vmatpush3.bf16.msra.mxu0 %v8868_v4  ;;  %8861 = vmatpush3.bf16.msra.mxu1 %v8868_v4  ;;  %v8894_v42 = vld [vmem:[%s12235_s1 + $0x98] sm:$0xff]   ;;  %v8897_v43 = vld [vmem:[%s12235_s1 + $0xa0] sm:$0xff]   ;;  %v8920_v44 = vld [vmem:[%s12235_s1 + $0x688] sm:$0xff]  }
  0x1e   :  { %v8923_v45 = vld [vmem:[%s12235_s1 + $0x690] sm:$0xff]   ;;  %v8898_v46 = vld [vmem:[%s12235_s1 + $0xa8] sm:$0xff]   ;;  %v8924_v48 = vld [vmem:[%s12235_s1 + $0x698] sm:$0xff]  }
  0x1f   :  { %v8901_v47 = vld [vmem:[%s12235_s1 + $0xb0] sm:$0xff]   ;;  %v8927_v49 = vld [vmem:[%s12235_s1 + $0x6a0] sm:$0xff]   ;;  %v8902_v50 = vld [vmem:[%s12235_s1 + $0xb8] sm:$0xff]  }
  0x20   :  { %8343 = vmatmul.mubr.msk.bf16.vlgmr.msra.gmra.mrb[0].mxu0 %vm1843_vm0, %v8870_v5  ;;  %8723 = vmatmul.mubr.msk.bf16.vlgmr.msra.gmra.mrb[0].mxu1 %vm1843_vm0, %v8884_v8  ;;  %v8905_v51 = vld [vmem:[%s12235_s1 + $0xc0] sm:$0xff]   ;;  %v8928_v52 = vld [vmem:[%s12235_s1 + $0x6a8] sm:$0xff]   ;;  %v8931_v53 = vld [vmem:[%s12235_s1 + $0x6b0] sm:$0xff]  }
  0x21   :  { %8346 = vmatprep.mubr.msk.bf16.mxu0 %vm1843_vm0, %v8871_v6  ;;  %8726 = vmatprep.mubr.msk.bf16.mxu1 %vm1843_vm0, %v8887_v10  ;;  %v8906_v54 = vld [vmem:[%s12235_s1 + $0xc8] sm:$0xff]   ;;  %v8909_v55 = vld [vmem:[%s12235_s1 + $0xd0] sm:$0xff]   ;;  %v8932_v56 = vld [vmem:[%s12235_s1 + $0x6b8] sm:$0xff]  }
  0x22   :  { %v8935_v57 = vld [vmem:[%s12235_s1 + $0x6c0] sm:$0xff]   ;;  %v8910_v58 = vld [vmem:[%s12235_s1 + $0xd8] sm:$0xff]   ;;  %v8936_v60 = vld [vmem:[%s12235_s1 + $0x6c8] sm:$0xff]  }
  0x23   :  { %v8913_v59 = vld [vmem:[%s12235_s1 + $0xe0] sm:$0xff]   ;;  %v8939_v61 = vld [vmem:[%s12235_s1 + $0x6d0] sm:$0xff]   ;;  %v8914_v62 = vld [vmem:[%s12235_s1 + $0xe8] sm:$0xff]  }
  0x24   :  { %v8917_v63 = vld [vmem:[%s12235_s1 + $0xf0] sm:$0xff]   ;;  %v8940_v0 = vld [vmem:[%s12235_s1 + $0x6d8] sm:$0xff]   ;;  %v8943_v1 = vld [vmem:[%s12235_s1 + $0x6e0] sm:$0xff]  }
  0x25   :  { %v8918_v2 = vld [vmem:[%s12235_s1 + $0xf8] sm:$0xff]   ;;  %v8921_v3 = vld [vmem:[%s12235_s1 + $0x100] sm:$0xff]   ;;  %v8944_v4 = vld [vmem:[%s12235_s1 + $0x6e8] sm:$0xff]  }
  0x26   :  { %v8947_v5 = vld [vmem:[%s12235_s1 + $0x6f0] sm:$0xff]   ;;  %v8922_v6 = vld [vmem:[%s12235_s1 + $0x108] sm:$0xff]   ;;  %v8948_v8 = vld [vmem:[%s12235_s1 + $0x6f8] sm:$0xff]  }
  0x27   :  { %v8925_v7 = vld [vmem:[%s12235_s1 + $0x110] sm:$0xff]   ;;  %v8926_v10 = vld [vmem:[%s12235_s1 + $0x118] sm:$0xff]  }
  0x28   :  { %8347 = vmatmul.mubr.msk.bf16.gmra.mrb[4].mxu0 %vm1843_vm0, %v8872_v9  ;;  %8727 = vmatmul.mubr.msk.bf16.gmra.mrb[4].mxu1 %vm1843_vm0, %v8888_v12  ;;  %v8951_v9 = vld [vmem:[%s12235_s1 + $0x700] sm:$0xff]   ;;  %v8952_v12 = vld [vmem:[%s12235_s1 + $0x708] sm:$0xff]  }
  0x29   :  { %8350 = vmatprep.mubr.msk.bf16.mxu0 %vm1843_vm0, %v8873_v11  ;;  %8730 = vmatprep.mubr.msk.bf16.mxu1 %vm1843_vm0, %v8891_v13  ;;  %v8929_v11 = vld [vmem:[%s12235_s1 + $0x120] sm:$0xff]   ;;  %v8955_v13 = vld [vmem:[%s12235_s1 + $0x710] sm:$0xff]  }
  0x30   :  { %8351 = vmatmul.mubr.msk.bf16.gmra.mrb[8].mxu0 %vm1843_vm0, %v8874_v14  ;;  %8731 = vmatmul.mubr.msk.bf16.gmra.mrb[8].mxu1 %vm1843_vm0, %v8892_v16  ;;  %v8930_v14 = vld [vmem:[%s12235_s1 + $0x128] sm:$0xff]   ;;  %v8956_v16 = vld [vmem:[%s12235_s1 + $0x718] sm:$0xff]  }
  0x31   :  { %8354 = vmatprep.mubr.msk.bf16.mxu0 %vm1843_vm0, %v8875_v15  ;;  %8734 = vmatprep.mubr.msk.bf16.mxu1 %vm1843_vm0, %v8895_v17  ;;  %v8933_v15 = vld [vmem:[%s12235_s1 + $0x130] sm:$0xff]   ;;  %v8959_v17 = vld [vmem:[%s12235_s1 + $0x720] sm:$0xff]  }
  0x38   :  { %8355 = vmatmul.mubr.msk.bf16.gmra.mrb[12].mxu0 %vm1843_vm0, %v8876_v18  ;;  %8735 = vmatmul.mubr.msk.bf16.gmra.mrb[12].mxu1 %vm1843_vm0, %v8896_v20  ;;  %v8934_v18 = vld [vmem:[%s12235_s1 + $0x138] sm:$0xff]   ;;  %v8960_v20 = vld [vmem:[%s12235_s1 + $0x728] sm:$0xff]  }
  0x39   :  { %8358 = vmatprep.mubr.msk.bf16.mxu0 %vm1843_vm0, %v8877_v19  ;;  %8738 = vmatprep.mubr.msk.bf16.mxu1 %vm1843_vm0, %v8899_v21  ;;  %v8937_v19 = vld [vmem:[%s12235_s1 + $0x140] sm:$0xff]   ;;  %v8963_v21 = vld [vmem:[%s12235_s1 + $0x730] sm:$0xff]  }
  0x40   :  { %8359 = vmatmul.mubr.msk.bf16.gmra.mrb[16].mxu0 %vm1843_vm0, %v8878_v22  ;;  %8739 = vmatmul.mubr.msk.bf16.gmra.mrb[16].mxu1 %vm1843_vm0, %v8900_v24  ;;  %v8938_v22 = vld [vmem:[%s12235_s1 + $0x148] sm:$0xff]   ;;  %v8964_v24 = vld [vmem:[%s12235_s1 + $0x738] sm:$0xff]  }
  0x41   :  { %8362 = vmatprep.mubr.msk.bf16.mxu0 %vm1843_vm0, %v8879_v23  ;;  %8742 = vmatprep.mubr.msk.bf16.mxu1 %vm1843_vm0, %v8903_v25  ;;  %v8941_v23 = vld [vmem:[%s12235_s1 + $0x150] sm:$0xff]   ;;  %v8967_v25 = vld [vmem:[%s12235_s1 + $0x740] sm:$0xff]  }
  0x48   :  { %8363 = vmatmul.mubr.msk.bf16.gmra.mrb[20].mxu0 %vm1843_vm0, %v8880_v26  ;;  %8743 = vmatmul.mubr.msk.bf16.gmra.mrb[20].mxu1 %vm1843_vm0, %v8904_v28  ;;  %v8942_v26 = vld [vmem:[%s12235_s1 + $0x158] sm:$0xff]   ;;  %v8968_v28 = vld [vmem:[%s12235_s1 + $0x748] sm:$0xff]  }
  0x49   :  { %8366 = vmatprep.mubr.msk.bf16.mxu0 %vm1843_vm0, %v8881_v27  ;;  %8746 = vmatprep.mubr.msk.bf16.mxu1 %vm1843_vm0, %v8907_v29  ;;  %v8945_v27 = vld [vmem:[%s12235_s1 + $0x160] sm:$0xff]   ;;  %v8971_v29 = vld [vmem:[%s12235_s1 + $0x750] sm:$0xff]  }
  0x50   :  { %8367 = vmatmul.mubr.msk.bf16.gmra.mrb[24].mxu0 %vm1843_vm0, %v8882_v30  ;;  %8747 = vmatmul.mubr.msk.bf16.gmra.mrb[24].mxu1 %vm1843_vm0, %v8908_v32  ;;  %v8946_v30 = vld [vmem:[%s12235_s1 + $0x168] sm:$0xff]   ;;  %v8972_v32 = vld [vmem:[%s12235_s1 + $0x758] sm:$0xff]  }
  0x51   :  { %8370 = vmatprep.mubr.msk.bf16.mxu0 %vm1843_vm0, %v8885_v31  ;;  %8750 = vmatprep.mubr.msk.bf16.mxu1 %vm1843_vm0, %v8911_v33  ;;  %v8949_v31 = vld [vmem:[%s12235_s1 + $0x170] sm:$0xff]   ;;  %v8975_v33 = vld [vmem:[%s12235_s1 + $0x760] sm:$0xff]  }
  0x58   :  { %8371 = vmatmul.mubr.msk.bf16.gmra.mrb[28].mxu0 %vm1843_vm0, %v8886_v34  ;;  %8751 = vmatmul.mubr.msk.bf16.gmra.mrb[28].mxu1 %vm1843_vm0, %v8912_v36  ;;  %v8950_v34 = vld [vmem:[%s12235_s1 + $0x178] sm:$0xff]   ;;  %v8976_v36 = vld [vmem:[%s12235_s1 + $0x768] sm:$0xff]  }
  0x59   :  { %8374 = vmatprep.mubr.msk.bf16.mxu0 %vm1843_vm0, %v8889_v35  ;;  %8754 = vmatprep.mubr.msk.bf16.mxu1 %vm1843_vm0, %v8915_v37  ;;  %v8953_v35 = vld [vmem:[%s12235_s1 + $0x180] sm:$0xff]   ;;  %v5461_v37 = vlaneseq }
  0x60   :  { %8375 = vmatmul.mubr.msk.bf16.gmra.mrb[32].mxu0 %vm1843_vm0, %v8890_v38  ;;  %8755 = vmatmul.mubr.msk.bf16.gmra.mrb[32].mxu1 %vm1843_vm0, %v8916_v40  ;;  %v8979_v38 = vld [vmem:[%s12235_s1 + $0x770] sm:$0xff]   ;;  %v9578_v40 = vand.u32 127, %v5461_v37 }
  0x61   :  { %8378 = vmatprep.mubr.msk.bf16.mxu0 %vm1843_vm0, %v8893_v39  ;;  %8758 = vmatprep.mubr.msk.bf16.mxu1 %vm1843_vm0, %v8919_v41  ;;  %v8954_v39 = vld [vmem:[%s12235_s1 + $0x188] sm:$0xff]   ;;  %v8957_v41 = vld [vmem:[%s12235_s1 + $0x190] sm:$0xff]  }
  0x68   :  { %8379 = vmatmul.mubr.msk.bf16.gmra.mrb[36].mxu0 %vm1843_vm0, %v8894_v42  ;;  %8759 = vmatmul.mubr.msk.bf16.gmra.mrb[36].mxu1 %vm1843_vm0, %v8920_v44  ;;  %v8980_v42 = vld [vmem:[%s12235_s1 + $0x778] sm:$0xff]   ;;  %v5463_v44 = vadd.s32 128, %v9578_v40 }
  0x69   :  { %8382 = vmatprep.mubr.msk.bf16.mxu0 %vm1843_vm0, %v8897_v43  ;;  %8762 = vmatprep.mubr.msk.bf16.mxu1 %vm1843_vm0, %v8923_v45  ;;  %v8983_v43 = vld [vmem:[%s12235_s1 + $0x780] sm:$0xff]   ;;  %v8958_v45 = vld [vmem:[%s12235_s1 + $0x198] sm:$0xff]  }
  0x70   :  { %8383 = vmatmul.mubr.msk.bf16.gmra.mrb[40].mxu0 %vm1843_vm0, %v8898_v46  ;;  %8763 = vmatmul.mubr.msk.bf16.gmra.mrb[40].mxu1 %vm1843_vm0, %v8924_v48  ;;  %v8961_v46 = vld [vmem:[%s12235_s1 + $0x1a0] sm:$0xff]   ;;  %v9610_v48 = vshra.s32 %v5463_v44, 8  ;;  %v9727_v44 = vstv %s7654_s5 }
  0x71   :  { %8386 = vmatprep.mubr.msk.bf16.mxu0 %vm1843_vm0, %v8901_v47  ;;  %8766 = vmatprep.mubr.msk.bf16.mxu1 %vm1843_vm0, %v8927_v49  ;;  %v8984_v47 = vld [vmem:[%s12235_s1 + $0x788] sm:$0xff]   ;;  %v8987_v49 = vld [vmem:[%s12235_s1 + $0x790] sm:$0xff]  }
  0x72   :  { %vm5529_vm1 = vcmp.eq.s32.totalorder %v9610_v48, 0  ;;  %vm5595_vm2 = vcmp.eq.s32.totalorder %v9610_v48, 1  ;;  %vm5661_vm3 = vcmp.eq.s32.totalorder %v9610_v48, 2  ;;  %vm5727_vm4 = vcmp.eq.s32.totalorder %v9610_v48, 3 }
  0x73   :  { %vm5793_vm5 = vcmp.eq.s32.totalorder %v9610_v48, 4  ;;  %vm5859_vm6 = vcmp.eq.s32.totalorder %v9610_v48, 5  ;;  %vm5925_vm7 = vcmp.eq.s32.totalorder %v9610_v48, 6  ;;  %vm5991_vm8 = vcmp.eq.s32.totalorder %v9610_v48, 7 }
  0x74   :  { %vm6057_vm10 = vcmp.eq.s32.totalorder %v9610_v48, 8  ;;  %vm6123_vm13 = vcmp.eq.s32.totalorder %v9610_v48, 9 }
  0x78   :  { %8387 = vmatmul.mubr.msk.bf16.gmra.mrb[44].mxu0 %vm1843_vm0, %v8902_v50  ;;  %8767 = vmatmul.mubr.msk.bf16.gmra.mrb[44].mxu1 %vm1843_vm0, %v8928_v52  ;;  %v8962_v50 = vld [vmem:[%s12235_s1 + $0x1a8] sm:$0xff]   ;;  %v8988_v52 = vld [vmem:[%s12235_s1 + $0x798] sm:$0xff]  }
  0x79   :  { %8390 = vmatprep.mubr.msk.bf16.mxu0 %vm1843_vm0, %v8905_v51  ;;  %8770 = vmatprep.mubr.msk.bf16.mxu1 %vm1843_vm0, %v8931_v53  ;;  %v8965_v51 = vld [vmem:[%s12235_s1 + $0x1b0] sm:$0xff]   ;;  %v8991_v53 = vld [vmem:[%s12235_s1 + $0x7a0] sm:$0xff]  }
  0x80   :  { %8391 = vmatmul.mubr.msk.bf16.gmra.mrb[48].mxu0 %vm1843_vm0, %v8906_v54  ;;  %8771 = vmatmul.mubr.msk.bf16.gmra.mrb[48].mxu1 %vm1843_vm0, %v8932_v56  ;;  %v9638_v54 = vstv %s5560_s23  ;;  %v8966_v56 = vld [vmem:[%s12235_s1 + $0x1b8] sm:$0xff]  }
  0x81   :  { %8394 = vmatprep.mubr.msk.bf16.mxu0 %vm1843_vm0, %v8909_v55  ;;  %8774 = vmatprep.mubr.msk.bf16.mxu1 %vm1843_vm0, %v8935_v57 }
  0x88   :  { %8395 = vmatmul.mubr.msk.bf16.gmra.mrb[52].mxu0 %vm1843_vm0, %v8910_v58  ;;  %8775 = vmatmul.mubr.msk.bf16.gmra.mrb[52].mxu1 %vm1843_vm0, %v8936_v60  ;;  %v8969_v58 = vld [vmem:[%s12235_s1 + $0x1c0] sm:$0xff]   ;;  %v8992_v60 = vld [vmem:[%s12235_s1 + $0x7a8] sm:$0xff]  }
  0x89   :  { %8398 = vmatprep.mubr.msk.bf16.mxu0 %vm1843_vm0, %v8913_v59  ;;  %8778 = vmatprep.mubr.msk.bf16.mxu1 %vm1843_vm0, %v8939_v61  ;;  %v5563_v61 = vsel %vm5529_vm1, %v9638_v54, 4294967295 }
  0x90   :  { %8399 = vmatmul.mubr.msk.bf16.gmra.mrb[56].mxu0 %vm1843_vm0, %v8914_v62  ;;  %8779 = vmatmul.mubr.msk.bf16.gmra.mrb[56].mxu1 %vm1843_vm0, %v8940_v0 }
  0x91   :  { %8402 = vmatprep.mubr.msk.bf16.mxu0 %vm1843_vm0, %v8917_v63  ;;  %8782 = vmatprep.mubr.msk.bf16.mxu1 %vm1843_vm0, %v8943_v1  ;;  %v8995_v1 = vld [vmem:[%s12235_s1 + $0x7b0] sm:$0xff]  }
  0x98   :  { %8403 = vmatmul.mubr.msk.bf16.gmra.mrb[60].mxu0 %vm1843_vm0, %v8918_v2  ;;  %8783 = vmatmul.mubr.msk.bf16.gmra.mrb[60].mxu1 %vm1843_vm0, %v8944_v4  ;;  %v9658_v4 = vstv %s9587_s24 }
  0x99   :  { %8406 = vmatprep.mubr.msk.bf16.mxu0 %vm1843_vm0, %v8921_v3  ;;  %8786 = vmatprep.mubr.msk.bf16.mxu1 %vm1843_vm0, %v8947_v5 }
  0xa0   :  { %8407 = vmatmul.mubr.msk.bf16.gmra.mrb[64].mxu0 %vm1843_vm0, %v8922_v6  ;;  %8787 = vmatmul.mubr.msk.bf16.gmra.mrb[64].mxu1 %vm1843_vm0, %v8948_v8  ;;  %v9668_v8 = vstv %s9594_s27 }
  0xa1   :  { %8410 = vmatprep.mubr.msk.bf16.mxu0 %vm1843_vm0, %v8925_v7  ;;  %8790 = vmatprep.mubr.msk.bf16.mxu1 %vm1843_vm0, %v8951_v9  ;;  %v5629_v7 = vsel %vm5595_vm2, %v9658_v4, %v5563_v61 }
  0xa8   :  { %8411 = vmatmul.mubr.msk.bf16.gmra.mrb[68].mxu0 %vm1843_vm0, %v8926_v10  ;;  %8791 = vmatmul.mubr.msk.bf16.gmra.mrb[68].mxu1 %vm1843_vm0, %v8952_v12 }
  0xa9   :  { %8414 = vmatprep.mubr.msk.bf16.mxu0 %vm1843_vm0, %v8929_v11  ;;  %8794 = vmatprep.mubr.msk.bf16.mxu1 %vm1843_vm0, %v8955_v13  ;;  %v8970_v11 = vld [vmem:[%s12235_s1 + $0x1c8] sm:$0xff]   ;;  %v8973_v13 = vld [vmem:[%s12235_s1 + $0x1d0] sm:$0xff]  }
  0xb0   :  { %8415 = vmatmul.mubr.msk.bf16.gmra.mrb[72].mxu0 %vm1843_vm0, %v8930_v14  ;;  %8795 = vmatmul.mubr.msk.bf16.gmra.mrb[72].mxu1 %vm1843_vm0, %v8956_v16  ;;  %v5695_v14 = vsel %vm5661_vm3, %v9668_v8, %v5629_v7  ;;  %v9768_v7 = vshrl.u32 %v5461_v37, 7 }
  0xb1   :  { %8418 = vmatprep.mubr.msk.bf16.mxu0 %vm1843_vm0, %v8933_v15  ;;  %8798 = vmatprep.mubr.msk.bf16.mxu1 %vm1843_vm0, %v8959_v17  ;;  %v9683_v15 = vstv %s9597_s28  ;;  %s9702_s28 = sld [smem:[#allocation3 + $0x7]] }
  0xb2   :  { %vm6188_vm3 = vcmp.lt.s32.totalorder %v9768_v7, 2 }
  0xb8   :  { %8419 = vmatmul.mubr.msk.bf16.gmra.mrb[76].mxu0 %vm1843_vm0, %v8934_v18  ;;  %8799 = vmatmul.mubr.msk.bf16.gmra.mrb[76].mxu1 %vm1843_vm0, %v8960_v20 }
  0xb9   :  { %8422 = vmatprep.mubr.msk.bf16.mxu0 %vm1843_vm0, %v8937_v19  ;;  %8802 = vmatprep.mubr.msk.bf16.mxu1 %vm1843_vm0, %v8963_v21  ;;  %v8996_v21 = vld [vmem:[%s12235_s1 + $0x7b8] sm:$0xff]  }
  0xc0   :  { %8423 = vmatmul.mubr.msk.bf16.gmra.mrb[80].mxu0 %vm1843_vm0, %v8938_v22  ;;  %8803 = vmatmul.mubr.msk.bf16.gmra.mrb[80].mxu1 %vm1843_vm0, %v8964_v24  ;;  %v5761_v24 = vsel %vm5727_vm4, %v9683_v15, %v5695_v14 }
  0xc1   :  { %8426 = vmatprep.mubr.msk.bf16.mxu0 %vm1843_vm0, %v8941_v23  ;;  %8806 = vmatprep.mubr.msk.bf16.mxu1 %vm1843_vm0, %v8967_v25  ;;  %v8999_v23 = vld [vmem:[%s12235_s1 + $0x7c0] sm:$0xff]   ;;  %v9697_v25 = vstv %s9615_s9 }
  0xc8   :  { %8427 = vmatmul.mubr.msk.bf16.gmra.mrb[84].mxu0 %vm1843_vm0, %v8942_v26  ;;  %8807 = vmatmul.mubr.msk.bf16.gmra.mrb[84].mxu1 %vm1843_vm0, %v8968_v28  ;;  %v5827_v28 = vsel %vm5793_vm5, %v9697_v25, %v5761_v24  ;;  %v8985_v24 = vld [vmem:[%s12235_s1 + $0x200] sm:$0xff]  }
  0xc9   :  { %8430 = vmatprep.mubr.msk.bf16.mxu0 %vm1843_vm0, %v8945_v27  ;;  %8810 = vmatprep.mubr.msk.bf16.mxu1 %vm1843_vm0, %v8971_v29  ;;  %v9708_v29 = vstv %s9630_s16 }
  0xd0   :  { %8431 = vmatmul.mubr.msk.bf16.gmra.mrb[88].mxu0 %vm1843_vm0, %v8946_v30  ;;  %8811 = vmatmul.mubr.msk.bf16.gmra.mrb[88].mxu1 %vm1843_vm0, %v8972_v32 }
  0xd1   :  { %8434 = vmatprep.mubr.msk.bf16.mxu0 %vm1843_vm0, %v8949_v31  ;;  %8814 = vmatprep.mubr.msk.bf16.mxu1 %vm1843_vm0, %v8975_v33  ;;  %v8974_v31 = vld [vmem:[%s12235_s1 + $0x1d8] sm:$0xff]   ;;  %v8977_v33 = vld [vmem:[%s12235_s1 + $0x1e0] sm:$0xff]  }
  0xd8   :  { %8435 = vmatmul.mubr.msk.bf16.gmra.mrb[92].mxu0 %vm1843_vm0, %v8950_v34  ;;  %8815 = vmatmul.mubr.msk.bf16.gmra.mrb[92].mxu1 %vm1843_vm0, %v8976_v36 }
  0xd9   :  { %8438 = vmatprep.mubr.msk.bf16.mxu0 %vm1843_vm0, %v8953_v35  ;;  %8818 = vmatprep.mubr.msk.bf16.mxu1 %vm1843_vm0, %v8979_v38  ;;  %v5893_v38 = vsel %vm5859_vm6, %v9708_v29, %v5827_v28  ;;  %vm6253_vm6 = vcmp.ge.s32.totalorder %v9768_v7, 2 }
  0xe0   :  { %8439 = vmatmul.mubr.msk.bf16.gmra.mrb[96].mxu0 %vm1843_vm0, %v8954_v39  ;;  %8819 = vmatmul.mubr.msk.bf16.gmra.mrb[96].mxu1 %vm1843_vm0, %v8980_v42  ;;  %v9721_v39 = vshra.s32 %v9578_v40, 8 }
  0xe1   :  { %8442 = vmatprep.mubr.msk.bf16.mxu0 %vm1843_vm0, %v8957_v41  ;;  %8822 = vmatprep.mubr.msk.bf16.mxu1 %vm1843_vm0, %v8983_v43  ;;  %v9000_v43 = vld [vmem:[%s12235_s1 + $0x7c8] sm:$0xff]  }
  0xe2   :  { %vm5528_vm9 = vcmp.eq.s32.totalorder %v9721_v39, 0  ;;  %vm5594_vm12 = vcmp.eq.s32.totalorder %v9721_v39, 1  ;;  %vm5660_vm15 = vcmp.eq.s32.totalorder %v9721_v39, 2  ;;  %vm5726_vm2 = vcmp.eq.s32.totalorder %v9721_v39, 3 }
  0xe8   :  { %8443 = vmatmul.mubr.msk.bf16.gmra.mrb[100].mxu0 %vm1843_vm0, %v8958_v45  ;;  %8823 = vmatmul.mubr.msk.bf16.gmra.mrb[100].mxu1 %vm1843_vm0, %v8984_v47  ;;  %v5465_v47 = vadd.s32 384, %v9578_v40 }
  0xe9   :  { %8446 = vmatprep.mubr.msk.bf16.mxu0 %vm1843_vm0, %v8961_v46  ;;  %8826 = vmatprep.mubr.msk.bf16.mxu1 %vm1843_vm0, %v8987_v49  ;;  %v9003_v46 = vld [vmem:[%s12235_s1 + $0x7d0] sm:$0xff]  }
  0xf0   :  { %8447 = vmatmul.mubr.msk.bf16.gmra.mrb[104].mxu0 %vm1843_vm0, %v8962_v50  ;;  %8827 = vmatmul.mubr.msk.bf16.gmra.mrb[104].mxu1 %vm1843_vm0, %v8988_v52  ;;  %v5959_v50 = vsel %vm5925_vm7, %v9727_v44, %v5893_v38  ;;  %v9746_v52 = vshra.s32 %v5465_v47, 8  ;;  %v9011_v38 = vld [vmem:[%s12235_s1 + $0x7f0] sm:$0xff]  }
  0xf1   :  { %8450 = vmatprep.mubr.msk.bf16.mxu0 %vm1843_vm0, %v8965_v51  ;;  %8830 = vmatprep.mubr.msk.bf16.mxu1 %vm1843_vm0, %v8991_v53  ;;  %v9744_v51 = vstv %s9702_s28 }
  0xf2   :  { %vm5531_vm11 = vcmp.eq.s32.totalorder %v9746_v52, 0  ;;  %vm5597_vm14 = vcmp.eq.s32.totalorder %v9746_v52, 1  ;;  %vm5663_vm1 = vcmp.eq.s32.totalorder %v9746_v52, 2  ;;  %vm5729_vm5 = vcmp.eq.s32.totalorder %v9746_v52, 3 }
  0xf3   :  { %v8344_v55 = vpop.f32.mrb[0].mxu0  ;;  %v5565_v37 = vsel %vm5531_vm11, %v9638_v54, 4294967295 }
  0xf4   :  { %v2646_v57 = vpop.f32.mrb[1].mxu0  ;;  %v4695_v62 = vmax.f32 %v8344_v55, 0.0 }
  0xf5   :  { %v8345_v59 = vpop.f32.mrb[2].mxu0  ;;  %v4693_v2 = vmax.f32 %v2646_v57, 0.0 }
  0xf6   :  { %v4696_v63 = vmax.f32 %v8345_v59, 0.0  ;;  %v2649_v0 = vpop.f32.mrb[3].mxu0  ;;  %v6025_v59 = vsel %vm5991_vm8, %v9744_v51, %v5959_v50  ;;  %vm5792_vm8 = vcmp.eq.s32.totalorder %v9721_v39, 4 }
  0xf7   :  { %v4694_v3 = vmax.f32 %v2649_v0, 0.0  ;;  %v5562_v0 = vsel %vm5528_vm9, %v9638_v54, 4294967295 }
  0xf8   :  { %v9660_v5 = vpack.c.bf16 %v4696_v63, %v4695_v62  ;;  %8451 = vmatmul.mubr.msk.bf16.gmra.mrb[108].mxu0 %vm1843_vm0, %v8966_v56  ;;  %8831 = vmatmul.mubr.msk.bf16.gmra.mrb[108].mxu1 %vm1843_vm0, %v8992_v60  ;;  %v8978_v56 = vld [vmem:[%s12235_s1 + $0x1e8] sm:$0xff]   ;;  %v9760_v60 = vstv %s9717_s12  ;;  %v5628_v14 = vsel %vm5594_vm12, %v9658_v4, %v5562_v0  ;;  %vm5858_vm12 = vcmp.eq.s32.totalorder %v9721_v39, 5  ;;  %v9012_v0 = vld [vmem:[%s12235_s1 + $0x7f8] sm:$0xff]  }
  0xf9   :  { %v9663_v6 = vpack.c.bf16 %v4694_v3, %v4693_v2  ;;  %8454 = vmatprep.mubr.msk.bf16.mxu0 %vm1843_vm0, %v8969_v58  ;;  %8834 = vmatprep.mubr.msk.bf16.mxu1 %vm1843_vm0, %v8995_v1  ;;  %v8981_v58 = vld [vmem:[%s12235_s1 + $0x1f0] sm:$0xff]   ;;  %v9004_v3 = vld [vmem:[%s12235_s1 + $0x7d8] sm:$0xff]  }
  0xfb   :  { %v8348_v9 = vpop.f32.mrb[4].mxu0 }
  0xfc   :  { %v2662_v10 = vpop.f32.mrb[5].mxu0  ;;  %v4699_v16 = vmax.f32 %v8348_v9, 0.0 }
  0xfd   :  { %v8349_v12 = vpop.f32.mrb[6].mxu0  ;;  %v4697_v19 = vmax.f32 %v2662_v10, 0.0  ;;  %v9007_v10 = vld [vmem:[%s12235_s1 + $0x7e0] sm:$0xff]  }
  0xfe   :  { %v4700_v17 = vmax.f32 %v8349_v12, 0.0  ;;  %v2665_v18 = vpop.f32.mrb[7].mxu0  ;;  %v9780_v12 = vstv %s9735_s17 }
  0xff   :  { %v4698_v20 = vmax.f32 %v2665_v18, 0.0 }
 0x100   :  { %v9688_v22 = vpack.c.bf16 %v4700_v17, %v4699_v16  ;;  %8455 = vmatmul.mubr.msk.bf16.gmra.mrb[112].mxu0 %vm1843_vm0, %v8970_v11  ;;  %8835 = vmatmul.mubr.msk.bf16.gmra.mrb[112].mxu1 %vm1843_vm0, %v8996_v21  ;;  %v6091_v11 = vsel %vm6057_vm10, %v9760_v60, %v6025_v59  ;;  %v5631_v21 = vsel %vm5597_vm14, %v9658_v4, %v5565_v37  ;;  %vm5795_vm10 = vcmp.eq.s32.totalorder %v9746_v52, 4 }
 0x101   :  { %v9699_v26 = vpack.c.bf16 %v4698_v20, %v4697_v19  ;;  %8458 = vmatprep.mubr.msk.bf16.mxu0 %vm1843_vm0, %v8973_v13  ;;  %8838 = vmatprep.mubr.msk.bf16.mxu1 %vm1843_vm0, %v8999_v23  ;;  %v6157_v17 = vsel %vm6123_vm13, %v9780_v12, %v6091_v11  ;;  %v8982_v19 = vld [vmem:[%s12235_s1 + $0x1f8] sm:$0xff]   ;;  %v9796_v20 = vadd.s32 8, %v9768_v7  ;;  %vm5861_vm13 = vcmp.eq.s32.totalorder %v9746_v52, 5 }
 0x102   :  { %vm6190_vm4 = vcmp.eq.s32.totalorder %v6157_v17, %v9768_v7  ;;  %v12238_v17 = vmov 0.00390625|0.00390625  }
 0x103   :  { %v8352_v27 = vpop.f32.mrb[8].mxu0  ;;  %vm6256_vm7 = vcmp.eq.s32.totalorder %v9610_v48, %v9796_v20  ;;  %vm9828_vm9 = vmand %vm6188_vm3, %vm6190_vm4  ;;  %vm5990_vm4 = vcmp.eq.s32.totalorder %v9721_v39, 7 }
 0x104   :  { %v2678_v30 = vpop.f32.mrb[9].mxu0  ;;  %v4703_v34 = vmax.f32 %v8352_v27, 0.0  ;;  %v5694_v27 = vsel %vm5660_vm15, %v9668_v8, %v5628_v14  ;;  %vm9837_vm11 = vmand %vm6253_vm6, %vm6256_vm7  ;;  %vm5924_vm15 = vcmp.eq.s32.totalorder %v9721_v39, 6  ;;  %vm6056_vm7 = vcmp.eq.s32.totalorder %v9721_v39, 8 }
 0x105   :  { %v8353_v32 = vpop.f32.mrb[10].mxu0  ;;  %v4701_v41 = vmax.f32 %v2678_v30, 0.0  ;;  %vm6320_vm14 = vmor %vm9828_vm9, %vm9837_vm11  ;;  %vm6122_vm9 = vcmp.eq.s32.totalorder %v9721_v39, 9  ;;  %vm6255_vm11 = vcmp.eq.s32.totalorder %v9721_v39, %v9796_v20 }
 0x106   :  { %v4704_v35 = vmax.f32 %v8353_v32, 0.0  ;;  %v2681_v36 = vpop.f32.mrb[11].mxu0 }
 0x107   :  { %v4702_v42 = vmax.f32 %v2681_v36, 0.0 }
 0x108   :  { %v9729_v45 = vpack.c.bf16 %v4704_v35, %v4703_v34  ;;  %8459 = vmatmul.mubr.msk.bf16.gmra.mrb[116].mxu0 %vm1843_vm0, %v8974_v31  ;;  %8839 = vmatmul.mubr.msk.bf16.gmra.mrb[116].mxu1 %vm1843_vm0, %v9000_v43  ;;  %v9008_v34 = vld [vmem:[%s12235_s1 + $0x7e8] sm:$0xff]   ;;  %v5697_v35 = vsel %vm5663_vm1, %v9668_v8, %v5631_v21  ;;  %vm5927_vm1 = vcmp.eq.s32.totalorder %v9746_v52, 6  ;;  %v8997_v43 = vld [vmem:[%s12235_s1 + $0x230] sm:$0xff]  }
 0x109   :  { %v9738_v49 = vpack.c.bf16 %v4702_v42, %v4701_v41  ;;  %8462 = vmatprep.mubr.msk.bf16.mxu0 %vm1843_vm0, %v8977_v33  ;;  %8842 = vmatprep.mubr.msk.bf16.mxu1 %vm1843_vm0, %v9003_v46  ;;  %v5760_v42 = vsel %vm5726_vm2, %v9683_v15, %v5694_v27  ;;  %v5763_v46 = vsel %vm5729_vm5, %v9683_v15, %v5697_v35  ;;  %vm7658_vm2 = vmpackc.low %vm6320_vm14, %vm6320_vm14  ;;  %vm5993_vm5 = vcmp.eq.s32.totalorder %v9746_v52, 7 }
 0x10a   :  { %vm9908_vm14 = vmand %vm6253_vm6, %vm6255_vm11 }
 0x10b   :  { %v8356_v53 = vpop.f32.mrb[12].mxu0 }
 0x10c   :  { %v2694_v55 = vpop.f32.mrb[13].mxu0  ;;  %v4707_v61 = vmax.f32 %v8356_v53, 0.0  ;;  %v8986_v53 = vld [vmem:[%s12235_s1 + $0x208] sm:$0xff]  }
 0x10d   :  { %v8357_v57 = vpop.f32.mrb[14].mxu0  ;;  %v4705_v1 = vmax.f32 %v2694_v55, 0.0  ;;  %v5826_v55 = vsel %vm5792_vm8, %v9697_v25, %v5760_v42  ;;  %vm6059_vm8 = vcmp.eq.s32.totalorder %v9746_v52, 8 }
 0x10e   :  { %v4708_v62 = vmax.f32 %v8357_v57, 0.0  ;;  %v2697_v63 = vpop.f32.mrb[15].mxu0  ;;  %v8989_v57 = vld [vmem:[%s12235_s1 + $0x210] sm:$0xff]  }
 0x10f   :  { %v4706_v2 = vmax.f32 %v2697_v63, 0.0 }
 0x110   :  { %v9771_v9 = vpack.c.bf16 %v4708_v62, %v4707_v61  ;;  %8463 = vmatmul.mubr.msk.bf16.gmra.mrb[120].mxu0 %vm1843_vm0, %v8978_v56  ;;  %8843 = vmatmul.mubr.msk.bf16.gmra.mrb[120].mxu1 %vm1843_vm0, %v9004_v3 }
 0x111   :  { %v9782_v13 = vpack.c.bf16 %v4706_v2, %v4705_v1  ;;  %8466 = vmatprep.mubr.msk.bf16.mxu0 %vm1843_vm0, %v8981_v58  ;;  %8846 = vmatprep.mubr.msk.bf16.mxu1 %vm1843_vm0, %v9007_v10  ;;  %v5829_v58 = vsel %vm5795_vm10, %v9697_v25, %v5763_v46  ;;  %v5892_v1 = vsel %vm5858_vm12, %v9708_v29, %v5826_v55  ;;  %vm6125_vm10 = vcmp.eq.s32.totalorder %v9746_v52, 9 }
 0x112   :  { %v5895_v3 = vsel %vm5861_vm13, %v9708_v29, %v5829_v58  ;;  %v5958_v11 = vsel %vm5924_vm15, %v9727_v44, %v5892_v1  ;;  %vm6258_vm15 = vcmp.eq.s32.totalorder %v9746_v52, %v9796_v20 }
 0x113   :  { %v8360_v16 = vpop.f32.mrb[16].mxu0  ;;  %v5961_v14 = vsel %vm5927_vm1, %v9727_v44, %v5895_v3  ;;  %v6024_v21 = vsel %vm5990_vm4, %v9744_v51, %v5958_v11  ;;  %vm9929_vm4 = vmand %vm6253_vm6, %vm6258_vm15 }
 0x114   :  { %v2710_v18 = vpop.f32.mrb[17].mxu0  ;;  %v4711_v28 = vmax.f32 %v8360_v16, 0.0  ;;  %v8990_v16 = vld [vmem:[%s12235_s1 + $0x218] sm:$0xff]   ;;  %v6027_v27 = vsel %vm5993_vm5, %v9744_v51, %v5961_v14 }
 0x115   :  { %v8361_v23 = vpop.f32.mrb[18].mxu0  ;;  %v4709_v32 = vmax.f32 %v2710_v18, 0.0 }
 0x116   :  { %v4712_v30 = vmax.f32 %v8361_v23, 0.0  ;;  %v2713_v31 = vpop.f32.mrb[19].mxu0 }
 0x117   :  { %v4710_v33 = vmax.f32 %v2713_v31, 0.0 }
 0x118   :  { %8467 = vmatmul.mubr.msk.bf16.gmra.mrb[124].mxu0 %vm1843_vm0, %v8982_v19  ;;  %v5214_v36 = vpack.c.bf16 %v4712_v30, %v4711_v28  ;;  %8847 = vmatmul.mubr.msk.bf16.gmra.mrb[124].mxu1 %vm1843_vm0, %v9008_v34  ;;  %v8993_v19 = vld [vmem:[%s12235_s1 + $0x220] sm:$0xff]   ;;  %v6093_v34 = vsel %vm6059_vm8, %v9760_v60, %v6027_v27 }
 0x119   :  { %v5213_v41 = vpack.c.bf16 %v4710_v33, %v4709_v32  ;;  %8470 = vmatprep.mubr.msk.bf16.mxu0 %vm1843_vm0, %v8985_v24  ;;  %8850 = vmatprep.mubr.msk.bf16.mxu1 %vm1843_vm0, %v9011_v38  ;;  %v6090_v32 = vsel %vm6056_vm7, %v9760_v60, %v6024_v21 }
 0x11b   :  { %v8364_v48 = vpop.f32.mrb[20].mxu0  ;;  %7982 = vmatprep.subr.bf16.mxu1 %v5213_v41  ;;  %v6159_v41 = vsel %vm6125_vm10, %v9780_v12, %v6093_v34 }
 0x11c   :  { %v2726_v50 = vpop.f32.mrb[21].mxu0  ;;  %7983 = vmatpush3.bf16.msra.mxu1 %v9663_v6  ;;  %v4715_v6 = vmax.f32 %v8364_v48, 0.0  ;;  %vm6192_vm13 = vcmp.eq.s32.totalorder %v6159_v41, %v9768_v7  ;;  %v5467_v41 = vadd.s32 640, %v9578_v40 }
 0x11d   :  { %v8365_v56 = vpop.f32.mrb[22].mxu0  ;;  %7984 = vmatprep.subr.bf16.mxu1 %v5214_v36  ;;  %v4713_v62 = vmax.f32 %v2726_v50, 0.0  ;;  %v6156_v36 = vsel %vm6122_vm9, %v9780_v12, %v6090_v32  ;;  %v5464_v32 = vadd.s32 256, %v9578_v40 }
 0x11e   :  { %v4716_v59 = vmax.f32 %v8365_v56, 0.0  ;;  %v2729_v61 = vpop.f32.mrb[23].mxu0  ;;  %vm6189_vm12 = vcmp.eq.s32.totalorder %v6156_v36, %v9768_v7 }
 0x11f   :  { %v4714_v63 = vmax.f32 %v2729_v61, 0.0  ;;  %vm9917_vm1 = vmand %vm6188_vm3, %vm6189_vm12  ;;  %v9001_v61 = vld [vmem:[%s12235_s1 + $0x240] sm:$0xff]  }
 0x120   :  { %8471 = vmatmul.mubr.msk.bf16.gmra.mrb[128].mxu0 %vm1843_vm0, %v8986_v53  ;;  %7985 = vmatpush3.bf16.msra.mxu1 %v9660_v5  ;;  %v5216_v2 = vpack.c.bf16 %v4716_v59, %v4715_v6  ;;  %v8998_v6 = vld [vmem:[%s12235_s1 + $0x238] sm:$0xff]   ;;  %vm6319_vm5 = vmor %vm9917_vm1, %vm9908_vm14 }
 0x121   :  { %v5215_v10 = vpack.c.bf16 %v4714_v63, %v4713_v62  ;;  %8474 = vmatprep.mubr.msk.bf16.mxu0 %vm1843_vm0, %v8989_v57  ;;  %8851 = vmatmul.mubr.msk.bf16.gmra.mrb[128].mxu1 %vm1843_vm0, %v9012_v0  ;;  %vm7660_vm8 = vmpackc.low %vm6319_vm5, %vm6319_vm5 }
 0x122   :  { %7659 = vmatprep.mubr.msk.bf16.mxu1 %vm7658_vm2, %v12238_v17  ;;  %vm9923_vm2 = vmand %vm6188_vm3, %vm6192_vm13 }
 0x123   :  { %v8368_v37 = vpop.f32.mrb[24].mxu0  ;;  %7986 = vmatprep.subr.bf16.mxu1 %v5215_v10  ;;  %vm6322_vm7 = vmor %vm9923_vm2, %vm9929_vm4 }
 0x124   :  { %v2742_v5 = vpop.f32.mrb[25].mxu0  ;;  %7987 = vmatpush3.bf16.msra.mxu1 %v9699_v26  ;;  %v4719_v23 = vmax.f32 %v8368_v37, 0.0  ;;  %vm7662_vm9 = vmpackc.low %vm6322_vm7, %vm6322_vm7  ;;  %v9002_v37 = vld [vmem:[%s12235_s1 + $0x248] sm:$0xff]  }
 0x125   :  { %v8369_v18 = vpop.f32.mrb[26].mxu0  ;;  %7988 = vmatprep.subr.bf16.mxu1 %v5216_v2  ;;  %v4717_v28 = vmax.f32 %v2742_v5, 0.0 }
 0x126   :  { %v4720_v24 = vmax.f32 %v8369_v18, 0.0  ;;  %v2745_v26 = vpop.f32.mrb[27].mxu0 }
 0x127   :  { %v4718_v30 = vmax.f32 %v2745_v26, 0.0 }
 0x128   :  { %8475 = vmatmul.mubr.msk.bf16.gmra.mrb[132].mxu0 %vm1843_vm0, %v8990_v16  ;;  %7989 = vmatpush3.bf16.msra.mxu1 %v9688_v22  ;;  %v5218_v31 = vpack.c.bf16 %v4720_v24, %v4719_v23  ;;  %v8994_v22 = vld [vmem:[%s12235_s1 + $0x228] sm:$0xff]  }
 0x129   :  { %v5217_v33 = vpack.c.bf16 %v4718_v30, %v4717_v28  ;;  %8478 = vmatprep.mubr.msk.bf16.mxu0 %vm1843_vm0, %v8993_v19  ;;  %v9006_v28 = vld [vmem:[%s12235_s1 + $0x258] sm:$0xff]  }
 0x12b   :  { %v8372_v35 = vpop.f32.mrb[28].mxu0  ;;  %7990 = vmatprep.subr.bf16.mxu1 %v5217_v33 }
 0x12c   :  { %v2758_v38 = vpop.f32.mrb[29].mxu0  ;;  %7991 = vmatpush3.bf16.msra.mxu1 %v9738_v49  ;;  %v4723_v46 = vmax.f32 %v8372_v35, 0.0 }
 0x12d   :  { %v8373_v42 = vpop.f32.mrb[30].mxu0  ;;  %7992 = vmatprep.subr.bf16.mxu1 %v5218_v31  ;;  %v4721_v49 = vmax.f32 %v2758_v38, 0.0  ;;  %v9009_v31 = vld [vmem:[%s12235_s1 + $0x260] sm:$0xff]  }
 0x12e   :  { %v4724_v48 = vmax.f32 %v8373_v42, 0.0  ;;  %v2761_v47 = vpop.f32.mrb[31].mxu0 }
 0x12f   :  { %v4722_v50 = vmax.f32 %v2761_v47, 0.0 }
 0x130   :  { %8479 = vmatmul.mubr.msk.bf16.gmra.mrb[136].mxu0 %vm1843_vm0, %v8994_v22  ;;  %7993 = vmatpush3.bf16.msra.mxu1 %v9729_v45  ;;  %v5220_v53 = vpack.c.bf16 %v4724_v48, %v4723_v46  ;;  %v9985_v46 = vshra.s32 %v5467_v41, 8 }
 0x131   :  { %v5219_v39 = vpack.c.bf16 %v4722_v50, %v4721_v49  ;;  %8482 = vmatprep.mubr.msk.bf16.mxu0 %vm1843_vm0, %v8997_v43  ;;  %v9983_v43 = vshra.s32 %v5464_v32, 8  ;;  %v9010_v49 = vld [vmem:[%s12235_s1 + $0x268] sm:$0xff]  }
 0x132   :  { %vm5533_vm11 = vcmp.eq.s32.totalorder %v9985_v46, 0  ;;  %vm5599_vm13 = vcmp.eq.s32.totalorder %v9985_v46, 1  ;;  %vm5665_vm15 = vcmp.eq.s32.totalorder %v9985_v46, 2  ;;  %vm5731_vm2 = vcmp.eq.s32.totalorder %v9985_v46, 3 }
 0x133   :  { %v8376_v57 = vpop.f32.mrb[32].mxu0  ;;  %7994 = vmatprep.subr.bf16.mxu1 %v5219_v39  ;;  %vm5530_vm10 = vcmp.eq.s32.totalorder %v9983_v43, 0  ;;  %vm5596_vm12 = vcmp.eq.s32.totalorder %v9983_v43, 1  ;;  %vm5662_vm14 = vcmp.eq.s32.totalorder %v9983_v43, 2  ;;  %vm5728_vm1 = vcmp.eq.s32.totalorder %v9983_v43, 3 }
 0x134   :  { %v2774_v58 = vpop.f32.mrb[33].mxu0  ;;  %7995 = vmatpush3.bf16.msra.mxu1 %v9782_v13  ;;  %v4727_v62 = vmax.f32 %v8376_v57, 0.0  ;;  %vm5794_vm4 = vcmp.eq.s32.totalorder %v9983_v43, 4  ;;  %vm5797_vm5 = vcmp.eq.s32.totalorder %v9985_v46, 4  ;;  %vm5860_vm7 = vcmp.eq.s32.totalorder %v9983_v43, 5 }
 0x135   :  { %v8377_v59 = vpop.f32.mrb[34].mxu0  ;;  %7996 = vmatprep.subr.bf16.mxu1 %v5220_v53  ;;  %v4725_v13 = vmax.f32 %v2774_v58, 0.0  ;;  %v9013_v53 = vld [vmem:[%s12235_s1 + $0x270] sm:$0xff]   ;;  %v5564_v58 = vsel %vm5530_vm10, %v9638_v54, 4294967295  ;;  %vm5929_vm10 = vcmp.eq.s32.totalorder %v9985_v46, 6 }
 0x136   :  { %v4728_v63 = vmax.f32 %v8377_v59, 0.0  ;;  %v2777_v0 = vpop.f32.mrb[35].mxu0  ;;  %v5567_v59 = vsel %vm5533_vm11, %v9638_v54, 4294967295  ;;  %vm5992_vm11 = vcmp.eq.s32.totalorder %v9983_v43, 7 }
 0x137   :  { %v4726_v1 = vmax.f32 %v2777_v0, 0.0  ;;  %v9014_v0 = vld [vmem:[%s12235_s1 + $0x278] sm:$0xff]  }
 0x138   :  { %v9948_v2 = vpack.c.bf16 %v4728_v63, %v4727_v62  ;;  %8483 = vmatmul.mubr.msk.bf16.gmra.mrb[140].mxu0 %vm1843_vm0, %v8998_v6  ;;  %7997 = vmatpush3.bf16.msra.mxu1 %v9771_v9  ;;  %v9005_v9 = vld [vmem:[%s12235_s1 + $0x250] sm:$0xff]   ;;  %v5630_v62 = vsel %vm5596_vm12, %v9658_v4, %v5564_v58  ;;  %vm5995_vm12 = vcmp.eq.s32.totalorder %v9985_v46, 7  ;;  %v9019_v58 = vld [vmem:[%s12235_s1 + $0x2a0] sm:$0xff]  }
 0x139   :  { %v9952_v3 = vpack.c.bf16 %v4726_v1, %v4725_v13  ;;  %8486 = vmatprep.mubr.msk.bf16.mxu0 %vm1843_vm0, %v9001_v61  ;;  %v5633_v13 = vsel %vm5599_vm13, %v9658_v4, %v5567_v59  ;;  %vm6058_vm13 = vcmp.eq.s32.totalorder %v9983_v43, 8 }
 0x13b   :  { %v8380_v10 = vpop.f32.mrb[36].mxu0  ;;  %7661 = vmatmul.mubr.msk.bf16.vlgmr.msra.gmra.mrb[132].mxu1 %vm7660_vm8, %v12238_v17  ;;  %vm5863_vm8 = vcmp.eq.s32.totalorder %v9985_v46, 5 }
 0x13c   :  { %v2790_v11 = vpop.f32.mrb[37].mxu0  ;;  %7663 = vmatprep.mubr.msk.bf16.mxu1 %vm7662_vm9, %v12238_v17  ;;  %v4731_v5 = vmax.f32 %v8380_v10, 0.0  ;;  %v9015_v10 = vld [vmem:[%s12235_s1 + $0x280] sm:$0xff]   ;;  %vm5926_vm9 = vcmp.eq.s32.totalorder %v9983_v43, 6 }
 0x13d   :  { %v8381_v14 = vpop.f32.mrb[38].mxu0  ;;  %v4729_v19 = vmax.f32 %v2790_v11, 0.0 }
 0x13e   :  { %v4732_v16 = vmax.f32 %v8381_v14, 0.0  ;;  %v2793_v18 = vpop.f32.mrb[39].mxu0 }
 0x13f   :  { %v4730_v21 = vmax.f32 %v2793_v18, 0.0  ;;  %v5699_v18 = vsel %vm5665_vm15, %v9668_v8, %v5633_v13  ;;  %vm6124_vm15 = vcmp.eq.s32.totalorder %v9983_v43, 9 }
 0x140   :  { %v9963_v23 = vpack.c.bf16 %v4732_v16, %v4731_v5  ;;  %8487 = vmatmul.mubr.msk.bf16.gmra.mrb[144].mxu0 %vm1843_vm0, %v9002_v37 }
 0x141   :  { %v9966_v24 = vpack.c.bf16 %v4730_v21, %v4729_v19  ;;  %8490 = vmatprep.mubr.msk.bf16.mxu0 %vm1843_vm0, %v9005_v9  ;;  %v5696_v9 = vsel %vm5662_vm14, %v9668_v8, %v5630_v62  ;;  %vm6061_vm14 = vcmp.eq.s32.totalorder %v9985_v46, 8 }
 0x143   :  { %v8384_v26 = vpop.f32.mrb[40].mxu0 }
 0x144   :  { %v2806_v27 = vpop.f32.mrb[41].mxu0  ;;  %v4735_v33 = vmax.f32 %v8384_v26, 0.0  ;;  %v5762_v26 = vsel %vm5728_vm1, %v9683_v15, %v5696_v9  ;;  %vm6127_vm1 = vcmp.eq.s32.totalorder %v9985_v46, 9 }
 0x145   :  { %v8385_v30 = vpop.f32.mrb[42].mxu0  ;;  %v4733_v36 = vmax.f32 %v2806_v27, 0.0  ;;  %v5765_v27 = vsel %vm5731_vm2, %v9683_v15, %v5699_v18  ;;  %v5828_v32 = vsel %vm5794_vm4, %v9697_v25, %v5762_v26  ;;  %vm6257_vm2 = vcmp.eq.s32.totalorder %v9983_v43, %v9796_v20 }
 0x146   :  { %v4736_v34 = vmax.f32 %v8385_v30, 0.0  ;;  %v2809_v35 = vpop.f32.mrb[43].mxu0 }
 0x147   :  { %v4734_v38 = vmax.f32 %v2809_v35, 0.0  ;;  %v5831_v35 = vsel %vm5797_vm5, %v9697_v25, %v5765_v27 }
 0x148   :  { %v9976_v22 = vpack.c.bf16 %v4736_v34, %v4735_v33  ;;  %8491 = vmatmul.mubr.msk.bf16.gmra.mrb[148].mxu0 %vm1843_vm0, %v9006_v28  ;;  %v9017_v34 = vld [vmem:[%s12235_s1 + $0x290] sm:$0xff]  }
 0x149   :  { %v9980_v42 = vpack.c.bf16 %v4734_v38, %v4733_v36  ;;  %8494 = vmatprep.mubr.msk.bf16.mxu0 %vm1843_vm0, %v9009_v31  ;;  %v9016_v31 = vld [vmem:[%s12235_s1 + $0x288] sm:$0xff]  }
 0x14b   :  { %v8388_v48 = vpop.f32.mrb[44].mxu0 }
 0x14c   :  { %v2822_v47 = vpop.f32.mrb[45].mxu0  ;;  %v4739_v55 = vmax.f32 %v8388_v48, 0.0 }
 0x14d   :  { %v8389_v50 = vpop.f32.mrb[46].mxu0  ;;  %v4737_v45 = vmax.f32 %v2822_v47, 0.0  ;;  %v5894_v47 = vsel %vm5860_vm7, %v9708_v29, %v5828_v32  ;;  %vm10082_vm7 = vmand %vm6253_vm6, %vm6257_vm2 }
 0x14e   :  { %v4740_v39 = vmax.f32 %v8389_v50, 0.0  ;;  %v2825_v56 = vpop.f32.mrb[47].mxu0  ;;  %v5897_v50 = vsel %vm5863_vm8, %v9708_v29, %v5831_v35  ;;  %vm6260_vm8 = vcmp.eq.s32.totalorder %v9985_v46, %v9796_v20  ;;  %v9022_v35 = vld [vmem:[%s12235_s1 + $0x2b8] sm:$0xff]  }
 0x14f   :  { %v4738_v57 = vmax.f32 %v2825_v56, 0.0  ;;  %v5963_v56 = vsel %vm5929_vm10, %v9727_v44, %v5897_v50 }
 0x150   :  { %v9995_v52 = vpack.c.bf16 %v4740_v39, %v4739_v55  ;;  %8495 = vmatmul.mubr.msk.bf16.gmra.mrb[152].mxu0 %vm1843_vm0, %v9010_v49  ;;  %v5960_v55 = vsel %vm5926_vm9, %v9727_v44, %v5894_v47 }
 0x151   :  { %v10000_v6 = vpack.c.bf16 %v4738_v57, %v4737_v45  ;;  %8498 = vmatprep.mubr.msk.bf16.mxu0 %vm1843_vm0, %v9013_v53  ;;  %v6026_v59 = vsel %vm5992_vm11, %v9744_v51, %v5960_v55  ;;  %vm10103_vm11 = vmand %vm6253_vm6, %vm6260_vm8 }
 0x153   :  { %v8392_v61 = vpop.f32.mrb[48].mxu0 }
 0x154   :  { %v2838_v63 = vpop.f32.mrb[49].mxu0  ;;  %v4743_v11 = vmax.f32 %v8392_v61, 0.0 }
 0x155   :  { %v8393_v1 = vpop.f32.mrb[50].mxu0  ;;  %v4741_v5 = vmax.f32 %v2838_v63, 0.0 }
 0x156   :  { %v4744_v37 = vmax.f32 %v8393_v1, 0.0  ;;  %v2841_v14 = vpop.f32.mrb[51].mxu0 }
 0x157   :  { %v4742_v16 = vmax.f32 %v2841_v14, 0.0 }
 0x158   :  { %8499 = vmatmul.mubr.msk.bf16.gmra.mrb[156].mxu0 %vm1843_vm0, %v9014_v0  ;;  %v5230_v19 = vpack.c.bf16 %v4744_v37, %v4743_v11  ;;  %v6029_v0 = vsel %vm5995_vm12, %v9744_v51, %v5963_v56 }
 0x159   :  { %v5229_v21 = vpack.c.bf16 %v4742_v16, %v4741_v5  ;;  %8502 = vmatprep.mubr.msk.bf16.mxu0 %vm1843_vm0, %v9015_v10  ;;  %v6092_v10 = vsel %vm6058_vm13, %v9760_v60, %v6026_v59  ;;  %v6095_v37 = vsel %vm6061_vm14, %v9760_v60, %v6029_v0 }
 0x15a   :  { %v6158_v9 = vsel %vm6124_vm15, %v9780_v12, %v6092_v10  ;;  %v6161_v16 = vsel %vm6127_vm1, %v9780_v12, %v6095_v37  ;;  %v5466_v10 = vadd.s32 512, %v9578_v40 }
 0x15b   :  { %v8396_v28 = vpop.f32.mrb[52].mxu0  ;;  %8004 = vmatprep.subr.bf16.mxu1 %v5229_v21  ;;  %vm6191_vm4 = vcmp.eq.s32.totalorder %v6158_v9, %v9768_v7  ;;  %vm6194_vm5 = vcmp.eq.s32.totalorder %v6161_v16, %v9768_v7  ;;  %v5469_v16 = vadd.s32 896, %v9578_v40 }
 0x15c   :  { %v2854_v30 = vpop.f32.mrb[53].mxu0  ;;  %8005 = vmatpush3.bf16.msra.mxu1 %v9952_v3  ;;  %v4747_v36 = vmax.f32 %v8396_v28, 0.0  ;;  %vm10091_vm9 = vmand %vm6188_vm3, %vm6191_vm4 }
 0x15d   :  { %v8397_v33 = vpop.f32.mrb[54].mxu0  ;;  %8006 = vmatprep.subr.bf16.mxu1 %v5230_v19  ;;  %v4745_v41 = vmax.f32 %v2854_v30, 0.0  ;;  %v9021_v19 = vld [vmem:[%s12235_s1 + $0x2b0] sm:$0xff]   ;;  %vm10097_vm10 = vmand %vm6188_vm3, %vm6194_vm5 }
 0x15e   :  { %v4748_v3 = vmax.f32 %v8397_v33, 0.0  ;;  %v2857_v38 = vpop.f32.mrb[55].mxu0  ;;  %vm6321_vm12 = vmor %vm10091_vm9, %vm10082_vm7 }
 0x15f   :  { %v4746_v48 = vmax.f32 %v2857_v38, 0.0  ;;  %vm6324_vm13 = vmor %vm10097_vm10, %vm10103_vm11 }
 0x160   :  { %8503 = vmatmul.mubr.msk.bf16.gmra.mrb[160].mxu0 %vm1843_vm0, %v9016_v31  ;;  %8007 = vmatpush3.bf16.msra.mxu1 %v9948_v2  ;;  %v5232_v49 = vpack.c.bf16 %v4748_v3, %v4747_v36  ;;  %v9018_v2 = vld [vmem:[%s12235_s1 + $0x298] sm:$0xff]   ;;  %v9023_v3 = vld [vmem:[%s12235_s1 + $0x2c0] sm:$0xff]   ;;  %vm7664_vm14 = vmpackc.low %vm6321_vm12, %vm6321_vm12 }
 0x161   :  { %v5231_v53 = vpack.c.bf16 %v4746_v48, %v4745_v41  ;;  %8506 = vmatprep.mubr.msk.bf16.mxu0 %vm1843_vm0, %v9017_v34  ;;  %vm7666_vm15 = vmpackc.low %vm6324_vm13, %vm6324_vm13 }
 0x163   :  { %v8400_v39 = vpop.f32.mrb[56].mxu0  ;;  %8008 = vmatprep.subr.bf16.mxu1 %v5231_v53 }
 0x164   :  { %v2870_v45 = vpop.f32.mrb[57].mxu0  ;;  %8009 = vmatpush3.bf16.msra.mxu1 %v9966_v24  ;;  %v4751_v61 = vmax.f32 %v8400_v39, 0.0  ;;  %v9024_v39 = vld [vmem:[%s12235_s1 + $0x2c8] sm:$0xff]  }
 0x165   :  { %v8401_v57 = vpop.f32.mrb[58].mxu0  ;;  %8010 = vmatprep.subr.bf16.mxu1 %v5232_v49  ;;  %v4749_v24 = vmax.f32 %v2870_v45, 0.0 }
 0x166   :  { %v4752_v62 = vmax.f32 %v8401_v57, 0.0  ;;  %v2873_v63 = vpop.f32.mrb[59].mxu0 }
 0x167   :  { %v4750_v13 = vmax.f32 %v2873_v63, 0.0 }
 0x168   :  { %8507 = vmatmul.mubr.msk.bf16.gmra.mrb[164].mxu0 %vm1843_vm0, %v9018_v2  ;;  %8011 = vmatpush3.bf16.msra.mxu1 %v9963_v23  ;;  %v5234_v1 = vpack.c.bf16 %v4752_v62, %v4751_v61  ;;  %v9020_v23 = vld [vmem:[%s12235_s1 + $0x2a8] sm:$0xff]  }
 0x169   :  { %v5233_v11 = vpack.c.bf16 %v4750_v13, %v4749_v24  ;;  %8510 = vmatprep.mubr.msk.bf16.mxu0 %vm1843_vm0, %v9019_v58  ;;  %v9026_v24 = vld [vmem:[%s12235_s1 + $0x2d8] sm:$0xff]  }
 0x16b   :  { %v8404_v14 = vpop.f32.mrb[60].mxu0  ;;  %8012 = vmatprep.subr.bf16.mxu1 %v5233_v11 }
 0x16c   :  { %v2886_v5 = vpop.f32.mrb[61].mxu0  ;;  %8013 = vmatpush3.bf16.msra.mxu1 %v9980_v42  ;;  %v4755_v21 = vmax.f32 %v8404_v14, 0.0 }
 0x16d   :  { %v8405_v18 = vpop.f32.mrb[62].mxu0  ;;  %8014 = vmatprep.subr.bf16.mxu1 %v5234_v1  ;;  %v4753_v42 = vmax.f32 %v2886_v5, 0.0  ;;  %v9027_v1 = vld [vmem:[%s12235_s1 + $0x2e0] sm:$0xff]  }
 0x16e   :  { %v4756_v26 = vmax.f32 %v8405_v18, 0.0  ;;  %v2889_v27 = vpop.f32.mrb[63].mxu0 }
 0x16f   :  { %v4754_v28 = vmax.f32 %v2889_v27, 0.0 }
 0x170   :  { %8511 = vmatmul.mubr.msk.bf16.gmra.mrb[168].mxu0 %vm1843_vm0, %v9020_v23  ;;  %8015 = vmatpush3.bf16.msra.mxu1 %v9976_v22  ;;  %v5236_v30 = vpack.c.bf16 %v4756_v26, %v4755_v21  ;;  %v10159_v21 = vshra.s32 %v5469_v16, 8 }
 0x171   :  { %v5235_v43 = vpack.c.bf16 %v4754_v28, %v4753_v42  ;;  %8514 = vmatprep.mubr.msk.bf16.mxu0 %vm1843_vm0, %v9021_v19  ;;  %v10157_v19 = vshra.s32 %v5466_v10, 8  ;;  %v9028_v42 = vld [vmem:[%s12235_s1 + $0x2e8] sm:$0xff]  }
 0x172   :  { %vm5535_vm2 = vcmp.eq.s32.totalorder %v10159_v21, 0  ;;  %vm5601_vm5 = vcmp.eq.s32.totalorder %v10159_v21, 1  ;;  %vm5667_vm8 = vcmp.eq.s32.totalorder %v10159_v21, 2  ;;  %vm5733_vm10 = vcmp.eq.s32.totalorder %v10159_v21, 3 }
 0x173   :  { %v8408_v33 = vpop.f32.mrb[64].mxu0  ;;  %8016 = vmatprep.subr.bf16.mxu1 %v5235_v43  ;;  %vm5532_vm1 = vcmp.eq.s32.totalorder %v10157_v19, 0  ;;  %vm5598_vm4 = vcmp.eq.s32.totalorder %v10157_v19, 1  ;;  %vm5664_vm7 = vcmp.eq.s32.totalorder %v10157_v19, 2  ;;  %vm5730_vm9 = vcmp.eq.s32.totalorder %v10157_v19, 3 }
 0x174   :  { %v2902_v34 = vpop.f32.mrb[65].mxu0  ;;  %8017 = vmatpush3.bf16.msra.mxu1 %v10000_v6  ;;  %v4759_v38 = vmax.f32 %v8408_v33, 0.0  ;;  %vm5796_vm11 = vcmp.eq.s32.totalorder %v10157_v19, 4  ;;  %vm5799_vm12 = vcmp.eq.s32.totalorder %v10159_v21, 4  ;;  %vm5862_vm13 = vcmp.eq.s32.totalorder %v10157_v19, 5 }
 0x175   :  { %v8409_v36 = vpop.f32.mrb[66].mxu0  ;;  %8018 = vmatprep.subr.bf16.mxu1 %v5236_v30  ;;  %v4757_v6 = vmax.f32 %v2902_v34, 0.0  ;;  %v9029_v30 = vld [vmem:[%s12235_s1 + $0x2f0] sm:$0xff]   ;;  %v5566_v34 = vsel %vm5532_vm1, %v9638_v54, 4294967295  ;;  %vm5931_vm1 = vcmp.eq.s32.totalorder %v10159_v21, 6 }
 0x176   :  { %v4760_v41 = vmax.f32 %v8409_v36, 0.0  ;;  %v2905_v48 = vpop.f32.mrb[67].mxu0  ;;  %v5569_v36 = vsel %vm5535_vm2, %v9638_v54, 4294967295  ;;  %vm5994_vm2 = vcmp.eq.s32.totalorder %v10157_v19, 7 }
 0x177   :  { %v4758_v47 = vmax.f32 %v2905_v48, 0.0  ;;  %v9030_v48 = vld [vmem:[%s12235_s1 + $0x2f8] sm:$0xff]  }
 0x178   :  { %v10122_v49 = vpack.c.bf16 %v4760_v41, %v4759_v38  ;;  %8515 = vmatmul.mubr.msk.bf16.gmra.mrb[172].mxu0 %vm1843_vm0, %v9022_v35  ;;  %8019 = vmatpush3.bf16.msra.mxu1 %v9995_v52  ;;  %v9025_v52 = vld [vmem:[%s12235_s1 + $0x2d0] sm:$0xff]   ;;  %v5632_v38 = vsel %vm5598_vm4, %v9658_v4, %v5566_v34  ;;  %vm5997_vm4 = vcmp.eq.s32.totalorder %v10159_v21, 7  ;;  %v9035_v34 = vld [vmem:[%s12235_s1 + $0x320] sm:$0xff]  }
 0x179   :  { %v10126_v50 = vpack.c.bf16 %v4758_v47, %v4757_v6  ;;  %8518 = vmatprep.mubr.msk.bf16.mxu0 %vm1843_vm0, %v9023_v3  ;;  %v5635_v6 = vsel %vm5601_vm5, %v9658_v4, %v5569_v36  ;;  %vm6060_vm5 = vcmp.eq.s32.totalorder %v10157_v19, 8 }
 0x17b   :  { %v8412_v53 = vpop.f32.mrb[68].mxu0  ;;  %7665 = vmatmul.mubr.msk.bf16.vlgmr.msra.gmra.mrb[136].mxu1 %vm7664_vm14, %v12238_v17  ;;  %vm5865_vm14 = vcmp.eq.s32.totalorder %v10159_v21, 5 }
 0x17c   :  { %v2918_v55 = vpop.f32.mrb[69].mxu0  ;;  %7667 = vmatprep.mubr.msk.bf16.mxu1 %vm7666_vm15, %v12238_v17  ;;  %v4763_v45 = vmax.f32 %v8412_v53, 0.0  ;;  %v9031_v53 = vld [vmem:[%s12235_s1 + $0x300] sm:$0xff]   ;;  %vm5928_vm15 = vcmp.eq.s32.totalorder %v10157_v19, 6 }
 0x17d   :  { %v8413_v56 = vpop.f32.mrb[70].mxu0  ;;  %v4761_v58 = vmax.f32 %v2918_v55, 0.0 }
 0x17e   :  { %v4764_v2 = vmax.f32 %v8413_v56, 0.0  ;;  %v2921_v57 = vpop.f32.mrb[71].mxu0 }
 0x17f   :  { %v4762_v59 = vmax.f32 %v2921_v57, 0.0  ;;  %v5701_v57 = vsel %vm5667_vm8, %v9668_v8, %v5635_v6  ;;  %vm6126_vm8 = vcmp.eq.s32.totalorder %v10157_v19, 9 }
 0x180   :  { %v10137_v61 = vpack.c.bf16 %v4764_v2, %v4763_v45  ;;  %8519 = vmatmul.mubr.msk.bf16.gmra.mrb[176].mxu0 %vm1843_vm0, %v9024_v39 }
 0x181   :  { %v10140_v62 = vpack.c.bf16 %v4762_v59, %v4761_v58  ;;  %8522 = vmatprep.mubr.msk.bf16.mxu0 %vm1843_vm0, %v9025_v52  ;;  %v5698_v52 = vsel %vm5664_vm7, %v9668_v8, %v5632_v38  ;;  %vm6063_vm7 = vcmp.eq.s32.totalorder %v10159_v21, 8 }
 0x183   :  { %v8416_v63 = vpop.f32.mrb[72].mxu0 }
 0x184   :  { %v2934_v0 = vpop.f32.mrb[73].mxu0  ;;  %v4767_v11 = vmax.f32 %v8416_v63, 0.0  ;;  %v5764_v63 = vsel %vm5730_vm9, %v9683_v15, %v5698_v52  ;;  %vm6129_vm9 = vcmp.eq.s32.totalorder %v10159_v21, 9 }
 0x185   :  { %v8417_v13 = vpop.f32.mrb[74].mxu0  ;;  %v4765_v9 = vmax.f32 %v2934_v0, 0.0  ;;  %v5767_v0 = vsel %vm5733_vm10, %v9683_v15, %v5701_v57  ;;  %v5830_v10 = vsel %vm5796_vm11, %v9697_v25, %v5764_v63  ;;  %vm6259_vm10 = vcmp.eq.s32.totalorder %v10157_v19, %v9796_v20 }
 0x186   :  { %v4768_v37 = vmax.f32 %v8417_v13, 0.0  ;;  %v2937_v14 = vpop.f32.mrb[75].mxu0 }
 0x187   :  { %v4766_v5 = vmax.f32 %v2937_v14, 0.0  ;;  %v5833_v14 = vsel %vm5799_vm12, %v9697_v25, %v5767_v0 }
 0x188   :  { %v10150_v23 = vpack.c.bf16 %v4768_v37, %v4767_v11  ;;  %8523 = vmatmul.mubr.msk.bf16.gmra.mrb[180].mxu0 %vm1843_vm0, %v9026_v24  ;;  %v9033_v37 = vld [vmem:[%s12235_s1 + $0x310] sm:$0xff]  }
 0x189   :  { %v10154_v18 = vpack.c.bf16 %v4766_v5, %v4765_v9  ;;  %8526 = vmatprep.mubr.msk.bf16.mxu0 %vm1843_vm0, %v9027_v1  ;;  %v9032_v1 = vld [vmem:[%s12235_s1 + $0x308] sm:$0xff]  }
 0x18b   :  { %v8420_v26 = vpop.f32.mrb[76].mxu0 }
 0x18c   :  { %v2950_v27 = vpop.f32.mrb[77].mxu0  ;;  %v4771_v31 = vmax.f32 %v8420_v26, 0.0 }
 0x18d   :  { %v8421_v28 = vpop.f32.mrb[78].mxu0  ;;  %v4769_v22 = vmax.f32 %v2950_v27, 0.0  ;;  %v5896_v27 = vsel %vm5862_vm13, %v9708_v29, %v5830_v10  ;;  %vm10256_vm13 = vmand %vm6253_vm6, %vm6259_vm10 }
 0x18e   :  { %v4772_v43 = vmax.f32 %v8421_v28, 0.0  ;;  %v2953_v32 = vpop.f32.mrb[79].mxu0  ;;  %v5899_v28 = vsel %vm5865_vm14, %v9708_v29, %v5833_v14  ;;  %vm6262_vm14 = vcmp.eq.s32.totalorder %v10159_v21, %v9796_v20  ;;  %v9038_v14 = vld [vmem:[%s12235_s1 + $0x338] sm:$0xff]  }
 0x18f   :  { %v4770_v33 = vmax.f32 %v2953_v32, 0.0  ;;  %v5965_v32 = vsel %vm5931_vm1, %v9727_v44, %v5899_v28 }
 0x190   :  { %v10169_v46 = vpack.c.bf16 %v4772_v43, %v4771_v31  ;;  %8527 = vmatmul.mubr.msk.bf16.gmra.mrb[184].mxu0 %vm1843_vm0, %v9028_v42  ;;  %v5962_v31 = vsel %vm5928_vm15, %v9727_v44, %v5896_v27 }
 0x191   :  { %v10174_v35 = vpack.c.bf16 %v4770_v33, %v4769_v22  ;;  %8530 = vmatprep.mubr.msk.bf16.mxu0 %vm1843_vm0, %v9029_v30  ;;  %v6028_v36 = vsel %vm5994_vm2, %v9744_v51, %v5962_v31  ;;  %vm10277_vm2 = vmand %vm6253_vm6, %vm6262_vm14 }
 0x193   :  { %v8424_v3 = vpop.f32.mrb[80].mxu0 }
 0x194   :  { %v2966_v41 = vpop.f32.mrb[81].mxu0  ;;  %v4775_v55 = vmax.f32 %v8424_v3, 0.0 }
 0x195   :  { %v8425_v47 = vpop.f32.mrb[82].mxu0  ;;  %v4773_v45 = vmax.f32 %v2966_v41, 0.0 }
 0x196   :  { %v4776_v39 = vmax.f32 %v8425_v47, 0.0  ;;  %v2969_v56 = vpop.f32.mrb[83].mxu0 }
 0x197   :  { %v4774_v2 = vmax.f32 %v2969_v56, 0.0 }
 0x198   :  { %8531 = vmatmul.mubr.msk.bf16.gmra.mrb[188].mxu0 %vm1843_vm0, %v9030_v48  ;;  %v5246_v58 = vpack.c.bf16 %v4776_v39, %v4775_v55  ;;  %v6031_v48 = vsel %vm5997_vm4, %v9744_v51, %v5965_v32 }
 0x199   :  { %v5245_v59 = vpack.c.bf16 %v4774_v2, %v4773_v45  ;;  %8534 = vmatprep.mubr.msk.bf16.mxu0 %vm1843_vm0, %v9031_v53  ;;  %v6094_v53 = vsel %vm6060_vm5, %v9760_v60, %v6028_v36  ;;  %v6097_v39 = vsel %vm6063_vm7, %v9760_v60, %v6031_v48 }
 0x19a   :  { %v6160_v52 = vsel %vm6126_vm8, %v9780_v12, %v6094_v53  ;;  %v6163_v2 = vsel %vm6129_vm9, %v9780_v12, %v6097_v39  ;;  %v9043_v53 = vld [vmem:[%s12235_s1 + $0x360] sm:$0xff]  }
 0x19b   :  { %v8428_v24 = vpop.f32.mrb[84].mxu0  ;;  %8026 = vmatprep.subr.bf16.mxu1 %v5245_v59  ;;  %vm6193_vm11 = vcmp.eq.s32.totalorder %v6160_v52, %v9768_v7  ;;  %vm6196_vm12 = vcmp.eq.s32.totalorder %v6163_v2, %v9768_v7 }
 0x19c   :  { %v2982_v13 = vpop.f32.mrb[85].mxu0  ;;  %8027 = vmatpush3.bf16.msra.mxu1 %v10126_v50  ;;  %v4779_v9 = vmax.f32 %v8428_v24, 0.0  ;;  %vm10265_vm15 = vmand %vm6188_vm3, %vm6193_vm11 }
 0x19d   :  { %v8429_v11 = vpop.f32.mrb[86].mxu0  ;;  %8028 = vmatprep.subr.bf16.mxu1 %v5246_v58  ;;  %v4777_v16 = vmax.f32 %v2982_v13, 0.0  ;;  %v9037_v58 = vld [vmem:[%s12235_s1 + $0x330] sm:$0xff]   ;;  %vm10271_vm1 = vmand %vm6188_vm3, %vm6196_vm12 }
 0x19e   :  { %v4780_v50 = vmax.f32 %v8429_v11, 0.0  ;;  %v2985_v5 = vpop.f32.mrb[87].mxu0  ;;  %vm6323_vm4 = vmor %vm10265_vm15, %vm10256_vm13 }
 0x19f   :  { %v4778_v26 = vmax.f32 %v2985_v5, 0.0  ;;  %vm6326_vm5 = vmor %vm10271_vm1, %vm10277_vm2 }
 0x1a0   :  { %8535 = vmatmul.mubr.msk.bf16.gmra.mrb[192].mxu0 %vm1843_vm0, %v9032_v1  ;;  %8029 = vmatpush3.bf16.msra.mxu1 %v10122_v49  ;;  %v5248_v42 = vpack.c.bf16 %v4780_v50, %v4779_v9  ;;  %v9034_v49 = vld [vmem:[%s12235_s1 + $0x318] sm:$0xff]   ;;  %v9039_v50 = vld [vmem:[%s12235_s1 + $0x340] sm:$0xff]   ;;  %vm7668_vm7 = vmpackc.low %vm6323_vm4, %vm6323_vm4 }
 0x1a1   :  { %v5247_v30 = vpack.c.bf16 %v4778_v26, %v4777_v16  ;;  %8538 = vmatprep.mubr.msk.bf16.mxu0 %vm1843_vm0, %v9033_v37  ;;  %vm7670_vm8 = vmpackc.low %vm6326_vm5, %vm6326_vm5 }
 0x1a3   :  { %v8432_v43 = vpop.f32.mrb[88].mxu0  ;;  %8030 = vmatprep.subr.bf16.mxu1 %v5247_v30 }
 0x1a4   :  { %v2998_v22 = vpop.f32.mrb[89].mxu0  ;;  %8031 = vmatpush3.bf16.msra.mxu1 %v10140_v62  ;;  %v4783_v3 = vmax.f32 %v8432_v43, 0.0  ;;  %v9040_v43 = vld [vmem:[%s12235_s1 + $0x348] sm:$0xff]  }
 0x1a5   :  { %v8433_v33 = vpop.f32.mrb[90].mxu0  ;;  %8032 = vmatprep.subr.bf16.mxu1 %v5248_v42  ;;  %v4781_v62 = vmax.f32 %v2998_v22, 0.0 }
 0x1a6   :  { %v4784_v38 = vmax.f32 %v8433_v33, 0.0  ;;  %v3001_v41 = vpop.f32.mrb[91].mxu0 }
 0x1a7   :  { %v4782_v6 = vmax.f32 %v3001_v41, 0.0 }
 0x1a8   :  { %8539 = vmatmul.mubr.msk.bf16.gmra.mrb[196].mxu0 %vm1843_vm0, %v9034_v49  ;;  %8033 = vmatpush3.bf16.msra.mxu1 %v10137_v61  ;;  %v5250_v47 = vpack.c.bf16 %v4784_v38, %v4783_v3  ;;  %v9036_v61 = vld [vmem:[%s12235_s1 + $0x328] sm:$0xff]  }
 0x1a9   :  { %v5249_v55 = vpack.c.bf16 %v4782_v6, %v4781_v62  ;;  %8542 = vmatprep.mubr.msk.bf16.mxu0 %vm1843_vm0, %v9035_v34  ;;  %v9042_v62 = vld [vmem:[%s12235_s1 + $0x358] sm:$0xff]   ;;  %v5468_v6 = vadd.s32 768, %v9578_v40 }
 0x1ab   :  { %v8436_v56 = vpop.f32.mrb[92].mxu0  ;;  %8034 = vmatprep.subr.bf16.mxu1 %v5249_v55  ;;  %v10327_v2 = vshra.s32 %v5468_v6, 8 }
 0x1ac   :  { %v3014_v45 = vpop.f32.mrb[93].mxu0  ;;  %8035 = vmatpush3.bf16.msra.mxu1 %v10154_v18  ;;  %v4787_v59 = vmax.f32 %v8436_v56, 0.0 }
 0x1ad   :  { %v8437_v57 = vpop.f32.mrb[94].mxu0  ;;  %8036 = vmatprep.subr.bf16.mxu1 %v5250_v47  ;;  %v4785_v18 = vmax.f32 %v3014_v45, 0.0  ;;  %vm5534_vm9 = vcmp.eq.s32.totalorder %v10327_v2, 0  ;;  %vm5600_vm11 = vcmp.eq.s32.totalorder %v10327_v2, 1  ;;  %vm5666_vm13 = vcmp.eq.s32.totalorder %v10327_v2, 2 }
 0x1ae   :  { %v4788_v63 = vmax.f32 %v8437_v57, 0.0  ;;  %v3017_v0 = vpop.f32.mrb[95].mxu0  ;;  %v5471_v57 = vadd.s32 1152, %v9578_v40  ;;  %v5568_v21 = vsel %vm5534_vm9, %v9638_v54, 4294967295  ;;  %vm5732_vm15 = vcmp.eq.s32.totalorder %v10327_v2, 3 }
 0x1af   :  { %v4786_v24 = vmax.f32 %v3017_v0, 0.0  ;;  %vm5798_vm2 = vcmp.eq.s32.totalorder %v10327_v2, 4  ;;  %vm5864_vm5 = vcmp.eq.s32.totalorder %v10327_v2, 5 }
 0x1b0   :  { %8543 = vmatmul.mubr.msk.bf16.gmra.mrb[200].mxu0 %vm1843_vm0, %v9036_v61  ;;  %8037 = vmatpush3.bf16.msra.mxu1 %v10150_v23  ;;  %v5252_v13 = vpack.c.bf16 %v4788_v63, %v4787_v59  ;;  %v10333_v59 = vshra.s32 %v5471_v57, 8 }
 0x1b1   :  { %v5251_v19 = vpack.c.bf16 %v4786_v24, %v4785_v18  ;;  %8546 = vmatprep.mubr.msk.bf16.mxu0 %vm1843_vm0, %v9037_v58  ;;  %v9044_v18 = vld [vmem:[%s12235_s1 + $0x368] sm:$0xff]  }
 0x1b2   :  { %vm5537_vm10 = vcmp.eq.s32.totalorder %v10333_v59, 0  ;;  %vm5603_vm12 = vcmp.eq.s32.totalorder %v10333_v59, 1  ;;  %vm5669_vm14 = vcmp.eq.s32.totalorder %v10333_v59, 2  ;;  %vm5735_vm1 = vcmp.eq.s32.totalorder %v10333_v59, 3 }
 0x1b3   :  { %v8440_v11 = vpop.f32.mrb[96].mxu0  ;;  %8038 = vmatprep.subr.bf16.mxu1 %v5251_v19  ;;  %vm5801_vm4 = vcmp.eq.s32.totalorder %v10333_v59, 4  ;;  %vm5933_vm9 = vcmp.eq.s32.totalorder %v10333_v59, 6 }
 0x1b4   :  { %v3030_v37 = vpop.f32.mrb[97].mxu0  ;;  %8039 = vmatpush3.bf16.msra.mxu1 %v10174_v35  ;;  %v4791_v5 = vmax.f32 %v8440_v11, 0.0 }
 0x1b5   :  { %v8441_v9 = vpop.f32.mrb[98].mxu0  ;;  %8040 = vmatprep.subr.bf16.mxu1 %v5252_v13  ;;  %v4789_v35 = vmax.f32 %v3030_v37, 0.0  ;;  %v9045_v13 = vld [vmem:[%s12235_s1 + $0x370] sm:$0xff]  }
 0x1b6   :  { %v4792_v16 = vmax.f32 %v8441_v9, 0.0  ;;  %v3033_v26 = vpop.f32.mrb[99].mxu0 }
 0x1b7   :  { %v4790_v27 = vmax.f32 %v3033_v26, 0.0 }
 0x1b8   :  { %v10296_v42 = vpack.c.bf16 %v4792_v16, %v4791_v5  ;;  %8547 = vmatmul.mubr.msk.bf16.gmra.mrb[204].mxu0 %vm1843_vm0, %v9038_v14  ;;  %8041 = vmatpush3.bf16.msra.mxu1 %v10169_v46  ;;  %v9041_v46 = vld [vmem:[%s12235_s1 + $0x350] sm:$0xff]   ;;  %v5571_v14 = vsel %vm5537_vm10, %v9638_v54, 4294967295  ;;  %vm5996_vm10 = vcmp.eq.s32.totalorder %v10327_v2, 7 }
 0x1b9   :  { %v10300_v28 = vpack.c.bf16 %v4790_v27, %v4789_v35  ;;  %8550 = vmatprep.mubr.msk.bf16.mxu0 %vm1843_vm0, %v9039_v50  ;;  %v5634_v50 = vsel %vm5600_vm11, %v9658_v4, %v5568_v21  ;;  %v5637_v16 = vsel %vm5603_vm12, %v9658_v4, %v5571_v14  ;;  %v9046_v35 = vld [vmem:[%s12235_s1 + $0x378] sm:$0xff]   ;;  %vm5999_vm11 = vcmp.eq.s32.totalorder %v10333_v59, 7  ;;  %v8724_v21 = vpop.f32.mrb[0].mxu1 }
 0x1ba   :  { %vm6062_vm12 = vcmp.eq.s32.totalorder %v10327_v2, 8 }
 0x1bb   :  { %v8444_v30 = vpop.f32.mrb[100].mxu0  ;;  %7669 = vmatmul.mubr.msk.bf16.vlgmr.msra.gmra.mrb[140].mxu1 %vm7668_vm7, %v12238_v17  ;;  %vm5867_vm7 = vcmp.eq.s32.totalorder %v10333_v59, 5 }
 0x1bc   :  { %v3046_v31 = vpop.f32.mrb[101].mxu0  ;;  %7671 = vmatprep.mubr.msk.bf16.mxu1 %vm7670_vm8, %v12238_v17  ;;  %v4795_v22 = vmax.f32 %v8444_v30, 0.0  ;;  %v9047_v30 = vld [vmem:[%s12235_s1 + $0x380] sm:$0xff]   ;;  %vm5930_vm8 = vcmp.eq.s32.totalorder %v10327_v2, 6 }
 0x1bd   :  { %v8445_v32 = vpop.f32.mrb[102].mxu0  ;;  %v4793_v34 = vmax.f32 %v3046_v31, 0.0  ;;  %v5700_v31 = vsel %vm5666_vm13, %v9668_v8, %v5634_v50  ;;  %v9051_v50 = vld [vmem:[%s12235_s1 + $0x3a0] sm:$0xff]   ;;  %vm6065_vm13 = vcmp.eq.s32.totalorder %v10333_v59, 8 }
 0x1be   :  { %v4796_v49 = vmax.f32 %v8445_v32, 0.0  ;;  %v3049_v33 = vpop.f32.mrb[103].mxu0 }
 0x1bf   :  { %v4794_v36 = vmax.f32 %v3049_v33, 0.0 }
 0x1c0   :  { %v10311_v3 = vpack.c.bf16 %v4796_v49, %v4795_v22  ;;  %8551 = vmatmul.mubr.msk.bf16.gmra.mrb[208].mxu0 %vm1843_vm0, %v9040_v43  ;;  %v5703_v22 = vsel %vm5669_vm14, %v9668_v8, %v5637_v16  ;;  %v4166_v16 = vpop.f32.mrb[1].mxu1  ;;  %vm6128_vm14 = vcmp.eq.s32.totalorder %v10327_v2, 9 }
 0x1c1   :  { %v10314_v38 = vpack.c.bf16 %v4794_v36, %v4793_v34  ;;  %8554 = vmatprep.mubr.msk.bf16.mxu0 %vm1843_vm0, %v9041_v46  ;;  %v5766_v36 = vsel %vm5732_vm15, %v9683_v15, %v5700_v31  ;;  %vm6131_vm15 = vcmp.eq.s32.totalorder %v10333_v59, 9 }
 0x1c2   :  { %v5832_v6 = vsel %vm5798_vm2, %v9697_v25, %v5766_v36 }
 0x1c3   :  { %v8448_v41 = vpop.f32.mrb[104].mxu0 }
 0x1c4   :  { %v3062_v48 = vpop.f32.mrb[105].mxu0  ;;  %v4799_v55 = vmax.f32 %v8448_v41, 0.0 }
 0x1c5   :  { %v8449_v47 = vpop.f32.mrb[106].mxu0  ;;  %v4797_v52 = vmax.f32 %v3062_v48, 0.0  ;;  %v5769_v48 = vsel %vm5735_vm1, %v9683_v15, %v5703_v22  ;;  %vm6261_vm1 = vcmp.eq.s32.totalorder %v10327_v2, %v9796_v20 }
 0x1c6   :  { %v4800_v39 = vmax.f32 %v8449_v47, 0.0  ;;  %v3065_v56 = vpop.f32.mrb[107].mxu0 }
 0x1c7   :  { %v4798_v45 = vmax.f32 %v3065_v56, 0.0  ;;  %v9049_v56 = vld [vmem:[%s12235_s1 + $0x390] sm:$0xff]  }
 0x1c8   :  { %v10324_v61 = vpack.c.bf16 %v4800_v39, %v4799_v55  ;;  %8555 = vmatmul.mubr.msk.bf16.gmra.mrb[212].mxu0 %vm1843_vm0, %v9042_v62  ;;  %v5835_v55 = vsel %vm5801_vm4, %v9697_v25, %v5769_v48 }
 0x1c9   :  { %v10330_v58 = vpack.c.bf16 %v4798_v45, %v4797_v52  ;;  %8558 = vmatprep.mubr.msk.bf16.mxu0 %vm1843_vm0, %v9043_v53  ;;  %v9048_v53 = vld [vmem:[%s12235_s1 + $0x388] sm:$0xff]  }
 0x1cb   :  { %v8452_v63 = vpop.f32.mrb[108].mxu0 }
 0x1cc   :  { %v3078_v0 = vpop.f32.mrb[109].mxu0  ;;  %v4803_v1 = vmax.f32 %v8452_v63, 0.0  ;;  %v5898_v63 = vsel %vm5864_vm5, %v9708_v29, %v5832_v6  ;;  %vm6264_vm5 = vcmp.eq.s32.totalorder %v10333_v59, %v9796_v20  ;;  %v9055_v59 = vld [vmem:[%s12235_s1 + $0x3c0] sm:$0xff]  }
 0x1cd   :  { %v8453_v24 = vpop.f32.mrb[110].mxu0  ;;  %v4801_v23 = vmax.f32 %v3078_v0, 0.0 }
 0x1ce   :  { %v4804_v19 = vmax.f32 %v8453_v24, 0.0  ;;  %v3081_v10 = vpop.f32.mrb[111].mxu0 }
 0x1cf   :  { %v4802_v11 = vmax.f32 %v3081_v10, 0.0 }
 0x1d0   :  { %v10345_v37 = vpack.c.bf16 %v4804_v19, %v4803_v1  ;;  %8559 = vmatmul.mubr.msk.bf16.gmra.mrb[216].mxu0 %vm1843_vm0, %v9044_v18  ;;  %v5901_v18 = vsel %vm5867_vm7, %v9708_v29, %v5835_v55  ;;  %v5964_v1 = vsel %vm5930_vm8, %v9727_v44, %v5898_v63  ;;  %vm10443_vm7 = vmand %vm6253_vm6, %vm6261_vm1 }
 0x1d1   :  { %v10350_v9 = vpack.c.bf16 %v4802_v11, %v4801_v23  ;;  %8562 = vmatprep.mubr.msk.bf16.mxu0 %vm1843_vm0, %v9045_v13  ;;  %v5967_v19 = vsel %vm5933_vm9, %v9727_v44, %v5901_v18  ;;  %v6030_v11 = vsel %vm5996_vm10, %v9744_v51, %v5964_v1  ;;  %vm10471_vm10 = vmand %vm6253_vm6, %vm6264_vm5 }
 0x1d3   :  { %v8456_v5 = vpop.f32.mrb[112].mxu0 }
 0x1d4   :  { %v3094_v26 = vpop.f32.mrb[113].mxu0  ;;  %v4807_v43 = vmax.f32 %v8456_v5, 0.0  ;;  %v6033_v5 = vsel %vm5999_vm11, %v9744_v51, %v5967_v19 }
 0x1d5   :  { %v8457_v27 = vpop.f32.mrb[114].mxu0  ;;  %v4805_v49 = vmax.f32 %v3094_v26, 0.0 }
 0x1d6   :  { %v4808_v32 = vmax.f32 %v8457_v27, 0.0  ;;  %v3097_v46 = vpop.f32.mrb[115].mxu0  ;;  %v5075_v27 = vmax.f32 %v8724_v21, 0.0 }
 0x1d7   :  { %v4806_v33 = vmax.f32 %v3097_v46, 0.0 }
 0x1d8   :  { %8563 = vmatmul.mubr.msk.bf16.gmra.mrb[220].mxu0 %vm1843_vm0, %v9046_v35  ;;  %v5262_v34 = vpack.c.bf16 %v4808_v32, %v4807_v43  ;;  %v6096_v32 = vsel %vm6062_vm12, %v9760_v60, %v6030_v11 }
 0x1d9   :  { %v5261_v41 = vpack.c.bf16 %v4806_v33, %v4805_v49  ;;  %8566 = vmatprep.mubr.msk.bf16.mxu0 %vm1843_vm0, %v9047_v30  ;;  %v8725_v30 = vpop.f32.mrb[2].mxu1  ;;  %v5073_v49 = vmax.f32 %v4166_v16, 0.0 }
 0x1da   :  { %v4169_v46 = vpop.f32.mrb[3].mxu1  ;;  %v5076_v33 = vmax.f32 %v8725_v30, 0.0 }
 0x1db   :  { %v8460_v62 = vpop.f32.mrb[116].mxu0  ;;  %8048 = vmatprep.subr.bf16.mxu1 %v5261_v41  ;;  %v6099_v41 = vsel %vm6065_vm13, %v9760_v60, %v6033_v5 }
 0x1dc   :  { %v3110_v47 = vpop.f32.mrb[117].mxu0  ;;  %8049 = vmatpush3.bf16.msra.mxu1 %v10300_v28  ;;  %v4811_v52 = vmax.f32 %v8460_v62, 0.0  ;;  %v10415_v48 = vpack.c.bf16 %v5076_v33, %v5075_v27  ;;  %v6165_v55 = vsel %vm6131_vm15, %v9780_v12, %v6099_v41 }
 0x1dd   :  { %v8461_v39 = vpop.f32.mrb[118].mxu0  ;;  %8050 = vmatprep.subr.bf16.mxu1 %v5262_v34  ;;  %v4809_v28 = vmax.f32 %v3110_v47, 0.0  ;;  %v5074_v34 = vmax.f32 %v4169_v46, 0.0  ;;  %vm6198_vm4 = vcmp.eq.s32.totalorder %v6165_v55, %v9768_v7 }
 0x1de   :  { %v4812_v45 = vmax.f32 %v8461_v39, 0.0  ;;  %v3113_v57 = vpop.f32.mrb[119].mxu0  ;;  %v8728_v39 = vpop.f32.mrb[4].mxu1  ;;  %vm10458_vm9 = vmand %vm6188_vm3, %vm6198_vm4 }
 0x1df   :  { %v4810_v0 = vmax.f32 %v3113_v57, 0.0  ;;  %v10417_v62 = vpack.c.bf16 %v5074_v34, %v5073_v49  ;;  %vm6328_vm12 = vmor %vm10458_vm9, %vm10471_vm10 }
 0x1e0   :  { %8567 = vmatmul.mubr.msk.bf16.gmra.mrb[224].mxu0 %vm1843_vm0, %v9048_v53  ;;  %8051 = vmatpush3.bf16.msra.mxu1 %v10296_v42  ;;  %v5264_v24 = vpack.c.bf16 %v4812_v45, %v4811_v52  ;;  %v9050_v42 = vld [vmem:[%s12235_s1 + $0x398] sm:$0xff]   ;;  %v9052_v53 = vld [vmem:[%s12235_s1 + $0x3a8] sm:$0xff]   ;;  %v9053_v52 = vld [vmem:[%s12235_s1 + $0x3b0] sm:$0xff]   ;;  %v4182_v45 = vpop.f32.mrb[5].mxu1 }
 0x1e1   :  { %v5263_v13 = vpack.c.bf16 %v4810_v0, %v4809_v28  ;;  %8570 = vmatprep.mubr.msk.bf16.mxu0 %vm1843_vm0, %v9049_v56  ;;  %v5079_v28 = vmax.f32 %v8728_v39, 0.0  ;;  %v8729_v0 = vpop.f32.mrb[6].mxu1 }
 0x1e3   :  { %v8464_v10 = vpop.f32.mrb[120].mxu0  ;;  %8052 = vmatprep.subr.bf16.mxu1 %v5263_v13  ;;  %v4185_v13 = vpop.f32.mrb[7].mxu1 }
 0x1e4   :  { %v3126_v23 = vpop.f32.mrb[121].mxu0  ;;  %8053 = vmatpush3.bf16.msra.mxu1 %v10314_v38  ;;  %v4815_v26 = vmax.f32 %v8464_v10, 0.0  ;;  %v5077_v10 = vmax.f32 %v4182_v45, 0.0 }
 0x1e5   :  { %v8465_v14 = vpop.f32.mrb[122].mxu0  ;;  %8054 = vmatprep.subr.bf16.mxu1 %v5264_v24  ;;  %v4813_v31 = vmax.f32 %v3126_v23, 0.0  ;;  %v5080_v23 = vmax.f32 %v8729_v0, 0.0 }
 0x1e6   :  { %v4816_v38 = vmax.f32 %v8465_v14, 0.0  ;;  %v3129_v35 = vpop.f32.mrb[123].mxu0 }
 0x1e7   :  { %v4814_v43 = vmax.f32 %v3129_v35, 0.0  ;;  %v10462_v21 = vpack.c.bf16 %v5080_v23, %v5079_v28 }
 0x1e8   :  { %8571 = vmatmul.mubr.msk.bf16.gmra.mrb[228].mxu0 %vm1843_vm0, %v9050_v42  ;;  %8055 = vmatpush3.bf16.msra.mxu1 %v10311_v3  ;;  %v5266_v22 = vpack.c.bf16 %v4816_v38, %v4815_v26  ;;  %v6162_v3 = vsel %vm6128_vm14, %v9780_v12, %v6096_v32  ;;  %v5078_v42 = vmax.f32 %v4185_v13, 0.0  ;;  %v9054_v26 = vld [vmem:[%s12235_s1 + $0x3b8] sm:$0xff]   ;;  %v8732_v38 = vpop.f32.mrb[8].mxu1  ;;  %vm7674_vm14 = vmpackc.low %vm6328_vm12, %vm6328_vm12 }
 0x1e9   :  { %v5265_v36 = vpack.c.bf16 %v4814_v43, %v4813_v31  ;;  %8574 = vmatprep.mubr.msk.bf16.mxu0 %vm1843_vm0, %v9051_v50  ;;  %vm6195_vm2 = vcmp.eq.s32.totalorder %v6162_v3, %v9768_v7  ;;  %v4198_v27 = vpop.f32.mrb[9].mxu1  ;;  %v5083_v43 = vmax.f32 %v8732_v38, 0.0 }
 0x1ea   :  { %vm10452_vm8 = vmand %vm6188_vm3, %vm6195_vm2  ;;  %v10464_v14 = vpack.c.bf16 %v5078_v42, %v5077_v10  ;;  %v8733_v32 = vpop.f32.mrb[10].mxu1  ;;  %v5081_v34 = vmax.f32 %v4198_v27, 0.0 }
 0x1eb   :  { %v8468_v6 = vpop.f32.mrb[124].mxu0  ;;  %8056 = vmatprep.subr.bf16.mxu1 %v5265_v36  ;;  %vm6325_vm11 = vmor %vm10452_vm8, %vm10443_vm7  ;;  %v4201_v49 = vpop.f32.mrb[11].mxu1  ;;  %v5084_v36 = vmax.f32 %v8733_v32, 0.0 }
 0x1ec   :  { %v3142_v47 = vpop.f32.mrb[125].mxu0  ;;  %8057 = vmatpush3.bf16.msra.mxu1 %v10330_v58  ;;  %v4819_v57 = vmax.f32 %v8468_v6, 0.0  ;;  %vm7672_vm13 = vmpackc.low %vm6325_vm11, %vm6325_vm11  ;;  %v5082_v41 = vmax.f32 %v4201_v49, 0.0  ;;  %v8736_v39 = vpop.f32.mrb[12].mxu1 }
 0x1ed   :  { %v8469_v56 = vpop.f32.mrb[126].mxu0  ;;  %8058 = vmatprep.subr.bf16.mxu1 %v5266_v22  ;;  %v4817_v18 = vmax.f32 %v3142_v47, 0.0  ;;  %v10497_v3 = vpack.c.bf16 %v5084_v36, %v5083_v43  ;;  %v4214_v45 = vpop.f32.mrb[13].mxu1  ;;  %v5087_v28 = vmax.f32 %v8736_v39, 0.0 }
 0x1ee   :  { %v4820_v63 = vmax.f32 %v8469_v56, 0.0  ;;  %v3145_v58 = vpop.f32.mrb[127].mxu0  ;;  %v10499_v47 = vpack.c.bf16 %v5082_v41, %v5081_v34  ;;  %v8737_v0 = vpop.f32.mrb[14].mxu1  ;;  %v5085_v19 = vmax.f32 %v4214_v45, 0.0 }
 0x1ef   :  { %v4818_v24 = vmax.f32 %v3145_v58, 0.0  ;;  %v4217_v13 = vpop.f32.mrb[15].mxu1  ;;  %v5088_v10 = vmax.f32 %v8737_v0, 0.0 }
 0x1f0   :  { %v5268_v1 = vpack.c.bf16 %v4820_v63, %v4819_v57  ;;  %8575 = vmatmul.mubr.msk.bf16.gmra.mrb[232].mxu0 %vm1843_vm0, %v9052_v53  ;;  %8059 = vmatpush3.bf16.msra.mxu1 %v10324_v61  ;;  %v5086_v23 = vmax.f32 %v4217_v13, 0.0 }
 0x1f1   :  { %v5267_v11 = vpack.c.bf16 %v4818_v24, %v4817_v18  ;;  %8578 = vmatprep.mubr.msk.bf16.mxu0 %vm1843_vm0, %v9053_v52  ;;  %v9057_v52 = vld [vmem:[%s12235_s1 + $0x3d0] sm:$0xff]   ;;  %v10516_v61 = vpack.c.bf16 %v5088_v10, %v5087_v28 }
 0x1f2   :  { %v10518_v2 = vpack.c.bf16 %v5086_v23, %v5085_v19 }
 0x1f3   :  { %v8472_v50 = vpop.f32.mrb[128].mxu0  ;;  %8060 = vmatprep.subr.bf16.mxu1 %v5267_v11  ;;  %v5470_v11 = vadd.s32 1024, %v9578_v40 }
 0x1f4   :  { %v3158_v16 = vpop.f32.mrb[129].mxu0  ;;  %8061 = vmatpush3.bf16.msra.mxu1 %v10350_v9  ;;  %v4823_v30 = vmax.f32 %v8472_v50, 0.0 }
 0x1f5   :  { %v8473_v35 = vpop.f32.mrb[130].mxu0  ;;  %8062 = vmatprep.subr.bf16.mxu1 %v5268_v1  ;;  %v4821_v46 = vmax.f32 %v3158_v16, 0.0  ;;  %v9058_v16 = vld [vmem:[%s12235_s1 + $0x3d8] sm:$0xff]  }
 0x1f6   :  { %v4824_v31 = vmax.f32 %v8473_v35, 0.0  ;;  %v3161_v9 = vpop.f32.mrb[131].mxu0  ;;  %v9059_v35 = vld [vmem:[%s12235_s1 + $0x3e0] sm:$0xff]  }
 0x1f7   :  { %v4822_v22 = vmax.f32 %v3161_v9, 0.0 }
 0x1f8   :  { %v10490_v33 = vpack.c.bf16 %v4824_v31, %v4823_v30  ;;  %8579 = vmatmul.mubr.msk.bf16.gmra.mrb[236].mxu0 %vm1843_vm0, %v9054_v26  ;;  %8063 = vmatpush3.bf16.msra.mxu1 %v10345_v37  ;;  %v9056_v37 = vld [vmem:[%s12235_s1 + $0x3c8] sm:$0xff]   ;;  %v8740_v26 = vpop.f32.mrb[16].mxu1 }
 0x1f9   :  { %v10494_v6 = vpack.c.bf16 %v4822_v22, %v4821_v46  ;;  %8582 = vmatprep.mubr.msk.bf16.mxu0 %vm1843_vm0, %v9055_v59  ;;  %v10526_v59 = vshra.s32 %v5470_v11, 8  ;;  %v4230_v27 = vpop.f32.mrb[17].mxu1  ;;  %v5091_v43 = vmax.f32 %v8740_v26, 0.0 }
 0x1fa   :  { %v8741_v32 = vpop.f32.mrb[18].mxu1  ;;  %v5089_v36 = vmax.f32 %v4230_v27, 0.0 }
 0x1fb   :  { %v8476_v53 = vpop.f32.mrb[132].mxu0  ;;  %7673 = vmatmul.mubr.msk.bf16.vlgmr.msra.gmra.mrb[144].mxu1 %vm7672_vm13, %v12238_v17  ;;  %v4233_v49 = vpop.f32.mrb[19].mxu1  ;;  %v5092_v41 = vmax.f32 %v8741_v32, 0.0  ;;  %vm5536_vm15 = vcmp.eq.s32.totalorder %v10526_v59, 0  ;;  %vm5602_vm1 = vcmp.eq.s32.totalorder %v10526_v59, 1  ;;  %vm5668_vm4 = vcmp.eq.s32.totalorder %v10526_v59, 2 }
 0x1fc   :  { %v3174_v55 = vpop.f32.mrb[133].mxu0  ;;  %7675 = vmatprep.mubr.msk.bf16.mxu1 %vm7674_vm14, %v12238_v17  ;;  %v4827_v57 = vmax.f32 %v8476_v53, 0.0  ;;  %v5090_v53 = vmax.f32 %v4233_v49, 0.0  ;;  %v8744_v28 = vpop.f32.mrb[20].mxu1  ;;  %vm5734_vm7 = vcmp.eq.s32.totalorder %v10526_v59, 3  ;;  %vm5800_vm9 = vcmp.eq.s32.totalorder %v10526_v59, 4 }
 0x1fd   :  { %v8477_v56 = vpop.f32.mrb[134].mxu0  ;;  %v4825_v18 = vmax.f32 %v3174_v55, 0.0  ;;  %v10536_v39 = vpack.c.bf16 %v5092_v41, %v5091_v43  ;;  %v5095_v23 = vmax.f32 %v8744_v28, 0.0  ;;  %vm5866_vm11 = vcmp.eq.s32.totalorder %v10526_v59, 5 }
 0x1fe   :  { %v4828_v63 = vmax.f32 %v8477_v56, 0.0  ;;  %v3177_v58 = vpop.f32.mrb[135].mxu0  ;;  %v10538_v56 = vpack.c.bf16 %v5090_v53, %v5089_v36  ;;  %v9062_v36 = vld [vmem:[%s12235_s1 + $0x3f8] sm:$0xff]   ;;  %vm5932_vm14 = vcmp.eq.s32.totalorder %v10526_v59, 6 }
 0x1ff   :  { %v4826_v24 = vmax.f32 %v3177_v58, 0.0  ;;  %v5570_v58 = vsel %vm5536_vm15, %v9638_v54, 4294967295 }
 0x200   :  { %v10509_v1 = vpack.c.bf16 %v4828_v63, %v4827_v57  ;;  %8583 = vmatmul.mubr.msk.bf16.gmra.mrb[240].mxu0 %vm1843_vm0, %v9056_v37  ;;  %v5473_v37 = vadd.s32 1408, %v9578_v40  ;;  %v9060_v63 = vld [vmem:[%s12235_s1 + $0x3e8] sm:$0xff]  }
 0x201   :  { %v10512_v42 = vpack.c.bf16 %v4826_v24, %v4825_v18  ;;  %8586 = vmatprep.mubr.msk.bf16.mxu0 %vm1843_vm0, %v9057_v52  ;;  %v9061_v18 = vld [vmem:[%s12235_s1 + $0x3f0] sm:$0xff]   ;;  %v4246_v24 = vpop.f32.mrb[21].mxu1 }
 0x202   :  { %v10540_v45 = vshra.s32 %v5473_v37, 8  ;;  %v8745_v11 = vpop.f32.mrb[22].mxu1 }
 0x203   :  { %v8480_v50 = vpop.f32.mrb[136].mxu0  ;;  %v4249_v26 = vpop.f32.mrb[23].mxu1  ;;  %v5096_v27 = vmax.f32 %v8745_v11, 0.0 }
 0x204   :  { %v3190_v5 = vpop.f32.mrb[137].mxu0  ;;  %v4831_v30 = vmax.f32 %v8480_v50, 0.0  ;;  %vm5539_vm2 = vcmp.eq.s32.totalorder %v10540_v45, 0  ;;  %vm5605_vm5 = vcmp.eq.s32.totalorder %v10540_v45, 1  ;;  %v8748_v41 = vpop.f32.mrb[24].mxu1  ;;  %vm5671_vm8 = vcmp.eq.s32.totalorder %v10540_v45, 2 }
 0x205   :  { %v8481_v38 = vpop.f32.mrb[138].mxu0  ;;  %v4829_v46 = vmax.f32 %v3190_v5, 0.0  ;;  %v10563_v32 = vpack.c.bf16 %v5096_v27, %v5095_v23  ;;  %vm5737_vm10 = vcmp.eq.s32.totalorder %v10540_v45, 3  ;;  %vm5803_vm12 = vcmp.eq.s32.totalorder %v10540_v45, 4 }
 0x206   :  { %v4832_v31 = vmax.f32 %v8481_v38, 0.0  ;;  %v3193_v9 = vpop.f32.mrb[139].mxu0  ;;  %vm5869_vm13 = vcmp.eq.s32.totalorder %v10540_v45, 5  ;;  %vm5935_vm15 = vcmp.eq.s32.totalorder %v10540_v45, 6 }
 0x207   :  { %v4830_v22 = vmax.f32 %v3193_v9, 0.0  ;;  %v5573_v9 = vsel %vm5539_vm2, %v9638_v54, 4294967295  ;;  %vm6001_vm2 = vcmp.eq.s32.totalorder %v10540_v45, 7 }
 0x208   :  { %v10528_v34 = vpack.c.bf16 %v4832_v31, %v4831_v30  ;;  %8587 = vmatmul.mubr.msk.bf16.gmra.mrb[244].mxu0 %vm1843_vm0, %v9058_v16  ;;  %v5636_v16 = vsel %vm5602_vm1, %v9658_v4, %v5570_v58  ;;  %v5094_v30 = vmax.f32 %v4249_v26, 0.0  ;;  %v5639_v53 = vsel %vm5605_vm5, %v9658_v4, %v5573_v9 }
 0x209   :  { %v10531_v55 = vpack.c.bf16 %v4830_v22, %v4829_v46  ;;  %8590 = vmatprep.mubr.msk.bf16.mxu0 %vm1843_vm0, %v9059_v35  ;;  %v5093_v35 = vmax.f32 %v4246_v24, 0.0  ;;  %v5702_v43 = vsel %vm5668_vm4, %v9668_v8, %v5636_v16  ;;  %v5705_v23 = vsel %vm5671_vm8, %v9668_v8, %v5639_v53  ;;  %v9065_v53 = vld [vmem:[%s12235_s1 + $0x410] sm:$0xff]  }
 0x20a   :  { %v5771_v9 = vsel %vm5737_vm10, %v9683_v15, %v5705_v23  ;;  %vm5998_vm1 = vcmp.eq.s32.totalorder %v10526_v59, 7  ;;  %vm6064_vm4 = vcmp.eq.s32.totalorder %v10526_v59, 8  ;;  %vm6067_vm5 = vcmp.eq.s32.totalorder %v10540_v45, 8 }
 0x20b   :  { %v8484_v52 = vpop.f32.mrb[140].mxu0  ;;  %v10565_v46 = vpack.c.bf16 %v5094_v30, %v5093_v35  ;;  %vm6133_vm8 = vcmp.eq.s32.totalorder %v10540_v45, 9 }
 0x20c   :  { %v3206_v57 = vpop.f32.mrb[141].mxu0  ;;  %v4835_v13 = vmax.f32 %v8484_v52, 0.0  ;;  %v9063_v52 = vld [vmem:[%s12235_s1 + $0x400] sm:$0xff]  }
 0x20d   :  { %v8485_v0 = vpop.f32.mrb[142].mxu0  ;;  %v4833_v50 = vmax.f32 %v3206_v57, 0.0  ;;  %v5768_v57 = vsel %vm5734_vm7, %v9683_v15, %v5702_v43  ;;  %vm6130_vm7 = vcmp.eq.s32.totalorder %v10526_v59, 9 }
 0x20e   :  { %v4836_v19 = vmax.f32 %v8485_v0, 0.0  ;;  %v3209_v10 = vpop.f32.mrb[143].mxu0  ;;  %v5834_v35 = vsel %vm5800_vm9, %v9697_v25, %v5768_v57  ;;  %vm6263_vm9 = vcmp.eq.s32.totalorder %v10526_v59, %v9796_v20 }
 0x20f   :  { %v4834_v5 = vmax.f32 %v3209_v10, 0.0 }
 0x210   :  { %v10553_v38 = vpack.c.bf16 %v4836_v19, %v4835_v13  ;;  %8591 = vmatmul.mubr.msk.bf16.gmra.mrb[248].mxu0 %vm1843_vm0, %v9060_v63  ;;  %v4262_v63 = vpop.f32.mrb[25].mxu1 }
 0x211   :  { %v10556_v31 = vpack.c.bf16 %v4834_v5, %v4833_v50  ;;  %8594 = vmatprep.mubr.msk.bf16.mxu0 %vm1843_vm0, %v9061_v18  ;;  %v5099_v18 = vmax.f32 %v8748_v41, 0.0  ;;  %v8749_v24 = vpop.f32.mrb[26].mxu1  ;;  %v5097_v50 = vmax.f32 %v4262_v63, 0.0 }
 0x212   :  { %v4265_v10 = vpop.f32.mrb[27].mxu1  ;;  %v5100_v5 = vmax.f32 %v8749_v24, 0.0 }
 0x213   :  { %v8488_v22 = vpop.f32.mrb[144].mxu0  ;;  %v5098_v16 = vmax.f32 %v4265_v10, 0.0 }
 0x214   :  { %v3222_v49 = vpop.f32.mrb[145].mxu0  ;;  %v4839_v58 = vmax.f32 %v8488_v22, 0.0  ;;  %v10583_v27 = vpack.c.bf16 %v5100_v5, %v5099_v18 }
 0x215   :  { %v8489_v37 = vpop.f32.mrb[146].mxu0  ;;  %v4837_v13 = vmax.f32 %v3222_v49, 0.0  ;;  %v10585_v30 = vpack.c.bf16 %v5098_v16, %v5097_v50  ;;  %v9064_v49 = vld [vmem:[%s12235_s1 + $0x408] sm:$0xff]  }
 0x216   :  { %v4840_v28 = vmax.f32 %v8489_v37, 0.0  ;;  %v3225_v0 = vpop.f32.mrb[147].mxu0  ;;  %v5900_v37 = vsel %vm5866_vm11, %v9708_v29, %v5834_v35 }
 0x217   :  { %v4838_v19 = vmax.f32 %v3225_v0, 0.0  ;;  %v5966_v5 = vsel %vm5932_vm14, %v9727_v44, %v5900_v37 }
 0x218   :  { %v5278_v11 = vpack.c.bf16 %v4840_v28, %v4839_v58  ;;  %8595 = vmatmul.mubr.msk.bf16.gmra.mrb[252].mxu0 %vm1843_vm0, %v9062_v36  ;;  %v8752_v36 = vpop.f32.mrb[28].mxu1 }
 0x219   :  { %v5277_v26 = vpack.c.bf16 %v4838_v19, %v4837_v13  ;;  %8598 = vmatprep.mubr.msk.bf16.mxu0 %vm1843_vm0, %v9063_v52  ;;  %v5837_v52 = vsel %vm5803_vm12, %v9697_v25, %v5771_v9  ;;  %v4278_v57 = vpop.f32.mrb[29].mxu1  ;;  %v5103_v28 = vmax.f32 %v8752_v36, 0.0  ;;  %vm6266_vm12 = vcmp.eq.s32.totalorder %v10540_v45, %v9796_v20 }
 0x21a   :  { %v8753_v0 = vpop.f32.mrb[30].mxu1  ;;  %v5903_v10 = vsel %vm5869_vm13, %v9708_v29, %v5837_v52  ;;  %v5101_v23 = vmax.f32 %v4278_v57, 0.0  ;;  %vm10665_vm13 = vmand %vm6253_vm6, %vm6263_vm9 }
 0x21b   :  { %v8492_v43 = vpop.f32.mrb[148].mxu0  ;;  %8070 = vmatprep.subr.bf16.mxu1 %v5277_v26  ;;  %v4281_v13 = vpop.f32.mrb[31].mxu1 }
 0x21c   :  { %v3238_v22 = vpop.f32.mrb[149].mxu0  ;;  %8071 = vmatpush3.bf16.msra.mxu1 %v10494_v6  ;;  %v4843_v63 = vmax.f32 %v8492_v43, 0.0  ;;  %v5102_v16 = vmax.f32 %v4281_v13, 0.0  ;;  %v8756_v36 = vpop.f32.mrb[32].mxu1 }
 0x21d   :  { %v8493_v41 = vpop.f32.mrb[150].mxu0  ;;  %8072 = vmatprep.subr.bf16.mxu1 %v5278_v11  ;;  %v4841_v18 = vmax.f32 %v3238_v22, 0.0  ;;  %v5104_v11 = vmax.f32 %v8753_v0, 0.0  ;;  %v9066_v22 = vld [vmem:[%s12235_s1 + $0x418] sm:$0xff]   ;;  %v4294_v37 = vpop.f32.mrb[33].mxu1 }
 0x21e   :  { %v4844_v6 = vmax.f32 %v8493_v41, 0.0  ;;  %v3241_v58 = vpop.f32.mrb[151].mxu0  ;;  %v10613_v9 = vpack.c.bf16 %v5102_v16, %v5101_v23 }
 0x21f   :  { %v4842_v24 = vmax.f32 %v3241_v58, 0.0  ;;  %v10607_v26 = vpack.c.bf16 %v5104_v11, %v5103_v28  ;;  %v8757_v58 = vpop.f32.mrb[34].mxu1 }
 0x220   :  { %v5280_v19 = vpack.c.bf16 %v4844_v6, %v4843_v63  ;;  %8599 = vmatmul.mubr.msk.bf16.gmra.mrb[0].mxu0 %vm1843_vm0, %v9064_v49  ;;  %8073 = vmatpush3.bf16.msra.mxu1 %v10490_v33  ;;  %v5969_v33 = vsel %vm5935_vm15, %v9727_v44, %v5903_v10  ;;  %v6032_v49 = vsel %vm5998_vm1, %v9744_v51, %v5966_v5  ;;  %v5107_v6 = vmax.f32 %v8756_v36, 0.0  ;;  %vm10680_vm15 = vmand %vm6253_vm6, %vm6266_vm12 }
 0x221   :  { %v5279_v50 = vpack.c.bf16 %v4842_v24, %v4841_v18  ;;  %8602 = vmatprep.mubr.msk.bf16.mxu0 %vm1843_vm0, %v9065_v53  ;;  %v9067_v53 = vld [vmem:[%s12235_s1 + $0x420] sm:$0xff]   ;;  %v6035_v63 = vsel %vm6001_vm2, %v9744_v51, %v5969_v33  ;;  %v6098_v18 = vsel %vm6064_vm4, %v9760_v60, %v6032_v49  ;;  %v4297_v24 = vpop.f32.mrb[35].mxu1  ;;  %v5108_v10 = vmax.f32 %v8757_v58, 0.0 }
 0x222   :  { %v5106_v23 = vmax.f32 %v4297_v24, 0.0  ;;  %v8760_v49 = vpop.f32.mrb[36].mxu1 }
 0x223   :  { %v8496_v35 = vpop.f32.mrb[152].mxu0  ;;  %8074 = vmatprep.subr.bf16.mxu1 %v5279_v50  ;;  %v6101_v50 = vsel %vm6067_vm5, %v9760_v60, %v6035_v63  ;;  %v10637_v5 = vpack.c.bf16 %v5108_v10, %v5107_v6 }
 0x224   :  { %v3254_v43 = vpop.f32.mrb[153].mxu0  ;;  %8075 = vmatpush3.bf16.msra.mxu1 %v10512_v42  ;;  %v4847_v52 = vmax.f32 %v8496_v35, 0.0 }
 0x225   :  { %v8497_v41 = vpop.f32.mrb[154].mxu0  ;;  %8076 = vmatprep.subr.bf16.mxu1 %v5280_v19  ;;  %v4845_v28 = vmax.f32 %v3254_v43, 0.0  ;;  %v5105_v19 = vmax.f32 %v4294_v37, 0.0  ;;  %v9068_v43 = vld [vmem:[%s12235_s1 + $0x428] sm:$0xff]  }
 0x226   :  { %v4848_v42 = vmax.f32 %v8497_v41, 0.0  ;;  %v3257_v57 = vpop.f32.mrb[155].mxu0  ;;  %v9069_v41 = vld [vmem:[%s12235_s1 + $0x430] sm:$0xff]  }
 0x227   :  { %v4846_v0 = vmax.f32 %v3257_v57, 0.0  ;;  %v10639_v16 = vpack.c.bf16 %v5106_v23, %v5105_v19 }
 0x228   :  { %v5282_v13 = vpack.c.bf16 %v4848_v42, %v4847_v52  ;;  %8603 = vmatmul.mubr.msk.bf16.gmra.mrb[4].mxu0 %vm1843_vm0, %v9066_v22  ;;  %8077 = vmatpush3.bf16.msra.mxu1 %v10509_v1  ;;  %v6164_v1 = vsel %vm6130_vm7, %v9780_v12, %v6098_v18  ;;  %v6167_v22 = vsel %vm6133_vm8, %v9780_v12, %v6101_v50  ;;  %v5111_v42 = vmax.f32 %v8760_v49, 0.0 }
 0x229   :  { %v5281_v11 = vpack.c.bf16 %v4846_v0, %v4845_v28  ;;  %8606 = vmatprep.mubr.msk.bf16.mxu0 %vm1843_vm0, %v9067_v53  ;;  %v4310_v53 = vpop.f32.mrb[37].mxu1  ;;  %vm6197_vm10 = vcmp.eq.s32.totalorder %v6164_v1, %v9768_v7  ;;  %vm6200_vm11 = vcmp.eq.s32.totalorder %v6167_v22, %v9768_v7 }
 0x22a   :  { %v8761_v57 = vpop.f32.mrb[38].mxu1  ;;  %v5109_v18 = vmax.f32 %v4310_v53, 0.0  ;;  %vm10674_vm14 = vmand %vm6188_vm3, %vm6197_vm10 }
 0x22b   :  { %v8500_v35 = vpop.f32.mrb[156].mxu0  ;;  %8078 = vmatprep.subr.bf16.mxu1 %v5281_v11  ;;  %v4313_v58 = vpop.f32.mrb[39].mxu1  ;;  %v5112_v24 = vmax.f32 %v8761_v57, 0.0  ;;  %vm10692_vm1 = vmand %vm6188_vm3, %vm6200_vm11 }
 0x22c   :  { %v3270_v33 = vpop.f32.mrb[157].mxu0  ;;  %8079 = vmatpush3.bf16.msra.mxu1 %v10531_v55  ;;  %v4851_v37 = vmax.f32 %v8500_v35, 0.0  ;;  %v9070_v35 = vld [vmem:[%s12235_s1 + $0x438] sm:$0xff]   ;;  %v8764_v1 = vpop.f32.mrb[40].mxu1  ;;  %vm6327_vm2 = vmor %vm10674_vm14, %vm10665_vm13 }
 0x22d   :  { %v8501_v36 = vpop.f32.mrb[158].mxu0  ;;  %8080 = vmatprep.subr.bf16.mxu1 %v5282_v13  ;;  %v4849_v63 = vmax.f32 %v3270_v33, 0.0  ;;  %v5110_v13 = vmax.f32 %v4313_v58, 0.0  ;;  %v10684_v45 = vpack.c.bf16 %v5112_v24, %v5111_v42  ;;  %v4326_v22 = vpop.f32.mrb[41].mxu1  ;;  %vm6330_vm4 = vmor %vm10692_vm1, %vm10680_vm15 }
 0x22e   :  { %v4852_v52 = vmax.f32 %v8501_v36, 0.0  ;;  %v3273_v55 = vpop.f32.mrb[159].mxu0  ;;  %v8765_v53 = vpop.f32.mrb[42].mxu1  ;;  %vm7676_vm5 = vmpackc.low %vm6327_vm2, %vm6327_vm2  ;;  %v5113_v57 = vmax.f32 %v4326_v22, 0.0 }
 0x22f   :  { %v4850_v6 = vmax.f32 %v3273_v55, 0.0  ;;  %12282 = vst [vmem:[#allocation5_spill] sm:$0xff] %v10684_v45  ;;  %v10686_v10 = vpack.c.bf16 %v5110_v13, %v5109_v18  ;;  %v4329_v55 = vpop.f32.mrb[43].mxu1  ;;  %vm7678_vm7 = vmpackc.low %vm6330_vm4, %vm6330_vm4 }
 0x230   :  { %v5284_v28 = vpack.c.bf16 %v4852_v52, %v4851_v37  ;;  %8607 = vmatmul.mubr.msk.bf16.gmra.mrb[8].mxu0 %vm1843_vm0, %v9068_v43  ;;  %8081 = vmatpush3.bf16.msra.mxu1 %v10528_v34  ;;  %v9071_v43 = vld [vmem:[%s12235_s1 + $0x440] sm:$0xff]   ;;  %v8768_v13 = vpop.f32.mrb[44].mxu1  ;;  %v9073_v34 = vld [vmem:[%s12235_s1 + $0x450] sm:$0xff]  }
 0x231   :  { %v5283_v19 = vpack.c.bf16 %v4850_v6, %v4849_v63  ;;  %8610 = vmatprep.mubr.msk.bf16.mxu0 %vm1843_vm0, %v9069_v41  ;;  %12283 = vst [vmem:[#allocation6_spill] sm:$0xff] %v10686_v10  ;;  %v5115_v41 = vmax.f32 %v8764_v1, 0.0  ;;  %v5116_v63 = vmax.f32 %v8765_v53, 0.0  ;;  %v5114_v6 = vmax.f32 %v4329_v55, 0.0  ;;  %v4342_v59 = vpop.f32.mrb[45].mxu1 }
 0x232   :  { %v8769_v1 = vpop.f32.mrb[46].mxu1 }
 0x233   :  { %v8504_v23 = vpop.f32.mrb[160].mxu0  ;;  %8082 = vmatprep.subr.bf16.mxu1 %v5283_v19  ;;  %v10720_v0 = vpack.c.bf16 %v5114_v6, %v5113_v57  ;;  %v4345_v22 = vpop.f32.mrb[47].mxu1  ;;  %v5472_v57 = vadd.s32 1280, %v9578_v40 }
 0x234   :  { %v3286_v50 = vpop.f32.mrb[161].mxu0  ;;  %8083 = vmatpush3.bf16.msra.mxu1 %v10556_v31  ;;  %v4855_v49 = vmax.f32 %v8504_v23, 0.0 }
 0x235   :  { %v8505_v33 = vpop.f32.mrb[162].mxu0  ;;  %8084 = vmatprep.subr.bf16.mxu1 %v5284_v28  ;;  %v4853_v37 = vmax.f32 %v3286_v50, 0.0  ;;  %v10718_v28 = vpack.c.bf16 %v5116_v63, %v5115_v41  ;;  %12287 = vst [vmem:[#allocation8_spill] sm:$0xff] %v10720_v0  ;;  %v5118_v41 = vmax.f32 %v4345_v22, 0.0  ;;  %v5475_v63 = vadd.s32 1664, %v9578_v40 }
 0x236   :  { %v4856_v36 = vmax.f32 %v8505_v33, 0.0  ;;  %v3289_v31 = vpop.f32.mrb[163].mxu0 }
 0x237   :  { %v4854_v52 = vmax.f32 %v3289_v31, 0.0  ;;  %12286 = vst [vmem:[#allocation7_spill] sm:$0xff] %v10718_v28  ;;  %v5120_v31 = vmax.f32 %v8769_v1, 0.0 }
 0x238   :  { %v10711_v42 = vpack.c.bf16 %v4856_v36, %v4855_v49  ;;  %8611 = vmatmul.mubr.msk.bf16.gmra.mrb[12].mxu0 %vm1843_vm0, %v9070_v35  ;;  %8085 = vmatpush3.bf16.msra.mxu1 %v10553_v38  ;;  %v9072_v38 = vld [vmem:[%s12235_s1 + $0x448] sm:$0xff]   ;;  %v5119_v35 = vmax.f32 %v8768_v13, 0.0  ;;  %v5117_v36 = vmax.f32 %v4342_v59, 0.0  ;;  %v9075_v13 = vld [vmem:[%s12235_s1 + $0x460] sm:$0xff]  }
 0x239   :  { %v10715_v58 = vpack.c.bf16 %v4854_v52, %v4853_v37  ;;  %8614 = vmatprep.mubr.msk.bf16.mxu0 %vm1843_vm0, %v9071_v43 }
 0x23a   :  { %v10736_v37 = vpack.c.bf16 %v5120_v31, %v5119_v35  ;;  %v10738_v52 = vpack.c.bf16 %v5118_v41, %v5117_v36 }
 0x23b   :  { %v8508_v18 = vpop.f32.mrb[164].mxu0  ;;  %7677 = vmatmul.mubr.msk.bf16.vlgmr.msra.gmra.mrb[148].mxu1 %vm7676_vm5, %v12238_v17 }
 0x23c   :  { %v3302_v24 = vpop.f32.mrb[165].mxu0  ;;  %7679 = vmatprep.mubr.msk.bf16.mxu1 %vm7678_vm7, %v12238_v17  ;;  %v4859_v23 = vmax.f32 %v8508_v18, 0.0  ;;  %12288 = vst [vmem:[#allocation9_spill] sm:$0xff] %v10736_v37  ;;  %12289 = vst [vmem:[#allocation10_spill] sm:$0xff] %v10738_v52  ;;  %v9074_v18 = vld [vmem:[%s12235_s1 + $0x458] sm:$0xff]  }
 0x23d   :  { %v8509_v19 = vpop.f32.mrb[166].mxu0  ;;  %v4857_v33 = vmax.f32 %v3302_v24, 0.0  ;;  %v8772_v24 = vpop.f32.mrb[48].mxu1 }
 0x23e   :  { %v4860_v11 = vmax.f32 %v8509_v19, 0.0  ;;  %v3305_v50 = vpop.f32.mrb[167].mxu0  ;;  %v4358_v19 = vpop.f32.mrb[49].mxu1 }
 0x23f   :  { %v4858_v43 = vmax.f32 %v3305_v50, 0.0  ;;  %v8773_v50 = vpop.f32.mrb[50].mxu1  ;;  %v5121_v31 = vmax.f32 %v4358_v19, 0.0 }
 0x240   :  { %v10730_v49 = vpack.c.bf16 %v4860_v11, %v4859_v23  ;;  %8615 = vmatmul.mubr.msk.bf16.gmra.mrb[16].mxu0 %vm1843_vm0, %v9072_v38  ;;  %v5123_v11 = vmax.f32 %v8772_v24, 0.0  ;;  %v4361_v22 = vpop.f32.mrb[51].mxu1  ;;  %v5124_v41 = vmax.f32 %v8773_v50, 0.0  ;;  %v9076_v24 = vld [vmem:[%s12235_s1 + $0x468] sm:$0xff]  }
 0x241   :  { %v10733_v53 = vpack.c.bf16 %v4858_v43, %v4857_v33  ;;  %8618 = vmatprep.mubr.msk.bf16.mxu0 %vm1843_vm0, %v9073_v34  ;;  %v10748_v33 = vshra.s32 %v5472_v57, 8  ;;  %v10750_v43 = vshra.s32 %v5475_v63, 8  ;;  %v5122_v17 = vmax.f32 %v4361_v22, 0.0 }
 0x243   :  { %v8512_v55 = vpop.f32.mrb[168].mxu0  ;;  %vm5538_vm8 = vcmp.eq.s32.totalorder %v10748_v33, 0  ;;  %vm5541_vm9 = vcmp.eq.s32.totalorder %v10750_v43, 0  ;;  %vm5604_vm10 = vcmp.eq.s32.totalorder %v10748_v33, 1  ;;  %vm5607_vm11 = vcmp.eq.s32.totalorder %v10750_v43, 1 }
 0x244   :  { %v3318_v6 = vpop.f32.mrb[169].mxu0  ;;  %v4863_v34 = vmax.f32 %v8512_v55, 0.0  ;;  %v10758_v55 = vpack.c.bf16 %v5124_v41, %v5123_v11  ;;  %v5575_v22 = vsel %vm5541_vm9, %v9638_v54, 4294967295  ;;  %vm5670_vm12 = vcmp.eq.s32.totalorder %v10748_v33, 2 }
 0x245   :  { %v8513_v38 = vpop.f32.mrb[170].mxu0  ;;  %v4861_v35 = vmax.f32 %v3318_v6, 0.0  ;;  %v10760_v6 = vpack.c.bf16 %v5122_v17, %v5121_v31  ;;  %vm5673_vm13 = vcmp.eq.s32.totalorder %v10750_v43, 2  ;;  %vm5736_vm14 = vcmp.eq.s32.totalorder %v10748_v33, 3 }
 0x246   :  { %v4864_v59 = vmax.f32 %v8513_v38, 0.0  ;;  %v3321_v23 = vpop.f32.mrb[171].mxu0  ;;  %12290 = vst [vmem:[#allocation11_spill] sm:$0xff] %v10758_v55  ;;  %vm5739_vm15 = vcmp.eq.s32.totalorder %v10750_v43, 3  ;;  %vm5802_vm1 = vcmp.eq.s32.totalorder %v10748_v33, 4  ;;  %vm5805_vm2 = vcmp.eq.s32.totalorder %v10750_v43, 4 }
 0x247   :  { %v4862_v1 = vmax.f32 %v3321_v23, 0.0  ;;  %12291 = vst [vmem:[#allocation12_spill] sm:$0xff] %v10760_v6  ;;  %v5572_v23 = vsel %vm5538_vm8, %v9638_v54, 4294967295  ;;  %vm5868_vm4 = vcmp.eq.s32.totalorder %v10748_v33, 5  ;;  %vm5871_vm5 = vcmp.eq.s32.totalorder %v10750_v43, 5 }
 0x248   :  { %v10752_v36 = vpack.c.bf16 %v4864_v59, %v4863_v34  ;;  %8619 = vmatmul.mubr.msk.bf16.gmra.mrb[20].mxu0 %vm1843_vm0, %v9074_v18  ;;  %v8776_v18 = vpop.f32.mrb[52].mxu1  ;;  %vm5934_vm7 = vcmp.eq.s32.totalorder %v10748_v33, 6  ;;  %vm5937_vm8 = vcmp.eq.s32.totalorder %v10750_v43, 6  ;;  %vm6000_vm9 = vcmp.eq.s32.totalorder %v10748_v33, 7 }
 0x249   :  { %v10755_v37 = vpack.c.bf16 %v4862_v1, %v4861_v35  ;;  %8622 = vmatprep.mubr.msk.bf16.mxu0 %vm1843_vm0, %v9075_v13  ;;  %v9077_v13 = vld [vmem:[%s12235_s1 + $0x470] sm:$0xff]   ;;  %v4374_v17 = vpop.f32.mrb[53].mxu1  ;;  %v5127_v11 = vmax.f32 %v8776_v18, 0.0  ;;  %v5641_v18 = vsel %vm5607_vm11, %v9658_v4, %v5575_v22  ;;  %vm6066_vm11 = vcmp.eq.s32.totalorder %v10748_v33, 8 }
 0x24a   :  { %v8777_v50 = vpop.f32.mrb[54].mxu1  ;;  %v5125_v55 = vmax.f32 %v4374_v17, 0.0 }
 0x24b   :  { %v8516_v57 = vpop.f32.mrb[172].mxu0  ;;  %v4377_v31 = vpop.f32.mrb[55].mxu1  ;;  %v5128_v6 = vmax.f32 %v8777_v50, 0.0 }
 0x24c   :  { %v3334_v63 = vpop.f32.mrb[173].mxu0  ;;  %v4867_v19 = vmax.f32 %v8516_v57, 0.0  ;;  %v5126_v57 = vmax.f32 %v4377_v31, 0.0 }
 0x24d   :  { %v8517_v38 = vpop.f32.mrb[174].mxu0  ;;  %v4865_v35 = vmax.f32 %v3334_v63, 0.0  ;;  %v5638_v63 = vsel %vm5604_vm10, %v9658_v4, %v5572_v23  ;;  %v8780_v23 = vpop.f32.mrb[56].mxu1  ;;  %vm6003_vm10 = vcmp.eq.s32.totalorder %v10750_v43, 7 }
 0x24e   :  { %v4868_v34 = vmax.f32 %v8517_v38, 0.0  ;;  %v3337_v59 = vpop.f32.mrb[175].mxu0  ;;  %v5131_v31 = vmax.f32 %v8780_v23, 0.0 }
 0x24f   :  { %v4866_v1 = vmax.f32 %v3337_v59, 0.0  ;;  %v5704_v59 = vsel %vm5670_vm12, %v9668_v8, %v5638_v63  ;;  %vm6069_vm12 = vcmp.eq.s32.totalorder %v10750_v43, 8 }
 0x250   :  { %v10774_v41 = vpack.c.bf16 %v4868_v34, %v4867_v19  ;;  %8623 = vmatmul.mubr.msk.bf16.gmra.mrb[24].mxu0 %vm1843_vm0, %v9076_v24  ;;  %v10786_v19 = vpack.c.bf16 %v5128_v6, %v5127_v11  ;;  %v10788_v24 = vpack.c.bf16 %v5126_v57, %v5125_v55  ;;  %v5707_v6 = vsel %vm5673_vm13, %v9668_v8, %v5641_v18  ;;  %v4390_v55 = vpop.f32.mrb[57].mxu1 }
 0x251   :  { %v10777_v38 = vpack.c.bf16 %v4866_v1, %v4865_v35  ;;  %8626 = vmatprep.mubr.msk.bf16.mxu0 %vm1843_vm0, %v9077_v13  ;;  %v9078_v13 = vld [vmem:[%s12235_s1 + $0x478] sm:$0xff]   ;;  %v9079_v35 = vld [vmem:[%s12235_s1 + $0x480] sm:$0xff]   ;;  %v8781_v57 = vpop.f32.mrb[58].mxu1  ;;  %v5770_v28 = vsel %vm5736_vm14, %v9683_v15, %v5704_v59  ;;  %vm6132_vm13 = vcmp.eq.s32.totalorder %v10748_v33, 9  ;;  %vm6135_vm14 = vcmp.eq.s32.totalorder %v10750_v43, 9 }
 0x252   :  { %12292 = vst [vmem:[#allocation13_spill] sm:$0xff] %v10786_v19  ;;  %12293 = vst [vmem:[#allocation14_spill] sm:$0xff] %v10788_v24  ;;  %v4393_v0 = vpop.f32.mrb[59].mxu1  ;;  %v5129_v19 = vmax.f32 %v4390_v55, 0.0  ;;  %v5132_v18 = vmax.f32 %v8781_v57, 0.0 }
 0x253   :  { %v8520_v17 = vpop.f32.mrb[176].mxu0  ;;  %v5130_v10 = vmax.f32 %v4393_v0, 0.0  ;;  %v9080_v0 = vld [vmem:[%s12235_s1 + $0x488] sm:$0xff]  }
 0x254   :  { %v3350_v34 = vpop.f32.mrb[177].mxu0  ;;  %v4871_v11 = vmax.f32 %v8520_v17, 0.0 }
 0x255   :  { %v8521_v50 = vpop.f32.mrb[178].mxu0  ;;  %v4869_v52 = vmax.f32 %v3350_v34, 0.0  ;;  %v10806_v34 = vpack.c.bf16 %v5132_v18, %v5131_v31  ;;  %v10808_v23 = vpack.c.bf16 %v5130_v10, %v5129_v19 }
 0x256   :  { %v4872_v1 = vmax.f32 %v8521_v50, 0.0  ;;  %v3353_v22 = vpop.f32.mrb[179].mxu0  ;;  %v5773_v50 = vsel %vm5739_vm15, %v9683_v15, %v5707_v6  ;;  %vm6265_vm15 = vcmp.eq.s32.totalorder %v10748_v33, %v9796_v20 }
 0x257   :  { %v4870_v63 = vmax.f32 %v3353_v22, 0.0  ;;  %12294 = vst [vmem:[#allocation15_spill] sm:$0xff] %v10806_v34  ;;  %12295 = vst [vmem:[#allocation16_spill] sm:$0xff] %v10808_v23 }
 0x258   :  { %v5294_v45 = vpack.c.bf16 %v4872_v1, %v4871_v11  ;;  %8627 = vmatmul.mubr.msk.bf16.gmra.mrb[28].mxu0 %vm1843_vm0, %v9078_v13  ;;  %v5836_v11 = vsel %vm5802_vm1, %v9697_v25, %v5770_v28  ;;  %v9081_v28 = vld [vmem:[%s12235_s1 + $0x490] sm:$0xff]  }
 0x259   :  { %v5293_v17 = vpack.c.bf16 %v4870_v63, %v4869_v52  ;;  %8630 = vmatprep.mubr.msk.bf16.mxu0 %vm1843_vm0, %v9079_v35  ;;  %v5839_v52 = vsel %vm5805_vm2, %v9697_v25, %v5773_v50  ;;  %v8784_v35 = vpop.f32.mrb[60].mxu1  ;;  %v5902_v1 = vsel %vm5868_vm4, %v9708_v29, %v5836_v11  ;;  %vm6268_vm4 = vcmp.eq.s32.totalorder %v10750_v43, %v9796_v20 }
 0x25a   :  { %v4406_v19 = vpop.f32.mrb[61].mxu1  ;;  %v5135_v22 = vmax.f32 %v8784_v35, 0.0  ;;  %v5905_v18 = vsel %vm5871_vm5, %v9708_v29, %v5839_v52  ;;  %v5968_v11 = vsel %vm5934_vm7, %v9727_v44, %v5902_v1  ;;  %vm10888_vm5 = vmand %vm6253_vm6, %vm6265_vm15 }
 0x25b   :  { %v8524_v59 = vpop.f32.mrb[180].mxu0  ;;  %8092 = vmatprep.subr.bf16.mxu1 %v5293_v17  ;;  %v8785_v31 = vpop.f32.mrb[62].mxu1  ;;  %v5133_v50 = vmax.f32 %v4406_v19, 0.0  ;;  %v6034_v19 = vsel %vm6000_vm9, %v9744_v51, %v5968_v11 }
 0x25c   :  { %v3366_v13 = vpop.f32.mrb[181].mxu0  ;;  %8093 = vmatpush3.bf16.msra.mxu1 %v10715_v58  ;;  %v4875_v6 = vmax.f32 %v8524_v59, 0.0  ;;  %v5136_v59 = vmax.f32 %v8785_v31, 0.0 }
 0x25d   :  { %v8525_v10 = vpop.f32.mrb[182].mxu0  ;;  %8094 = vmatprep.subr.bf16.mxu1 %v5294_v45  ;;  %v4873_v57 = vmax.f32 %v3366_v13, 0.0  ;;  %v4409_v45 = vpop.f32.mrb[63].mxu1 }
 0x25e   :  { %v4876_v58 = vmax.f32 %v8525_v10, 0.0  ;;  %v3369_v55 = vpop.f32.mrb[183].mxu0  ;;  %v5134_v10 = vmax.f32 %v4409_v45, 0.0  ;;  %v10832_v13 = vpack.c.bf16 %v5136_v59, %v5135_v22 }
 0x25f   :  { %v4874_v63 = vmax.f32 %v3369_v55, 0.0 }
 0x260   :  { %v5296_v17 = vpack.c.bf16 %v4876_v58, %v4875_v6  ;;  %8631 = vmatmul.mubr.msk.bf16.gmra.mrb[32].mxu0 %vm1843_vm0, %v9080_v0  ;;  %8095 = vmatpush3.bf16.msra.mxu1 %v10711_v42  ;;  %12296 = vst [vmem:[#allocation17_spill] sm:$0xff] %v10832_v13  ;;  %v10834_v52 = vpack.c.bf16 %v5134_v10, %v5133_v50  ;;  %v8788_v6 = vpop.f32.mrb[64].mxu1 }
 0x261   :  { %v5295_v34 = vpack.c.bf16 %v4874_v63, %v4873_v57  ;;  %8634 = vmatprep.mubr.msk.bf16.mxu0 %vm1843_vm0, %v9081_v28  ;;  %v5971_v42 = vsel %vm5937_vm8, %v9727_v44, %v5905_v18  ;;  %v9082_v28 = vld [vmem:[%s12235_s1 + $0x498] sm:$0xff]   ;;  %v4422_v55 = vpop.f32.mrb[65].mxu1  ;;  %v5139_v57 = vmax.f32 %v8788_v6, 0.0  ;;  %v6100_v50 = vsel %vm6066_vm11, %v9760_v60, %v6034_v19  ;;  %vm10903_vm8 = vmand %vm6253_vm6, %vm6268_vm4 }
 0x262   :  { %12297 = vst [vmem:[#allocation18_spill] sm:$0xff] %v10834_v52  ;;  %v6037_v31 = vsel %vm6003_vm10, %v9744_v51, %v5971_v42  ;;  %v8789_v63 = vpop.f32.mrb[66].mxu1  ;;  %v5137_v10 = vmax.f32 %v4422_v55, 0.0 }
 0x263   :  { %v8528_v35 = vpop.f32.mrb[184].mxu0  ;;  %8096 = vmatprep.subr.bf16.mxu1 %v5295_v34  ;;  %v9083_v34 = vld [vmem:[%s12235_s1 + $0x4a0] sm:$0xff]   ;;  %v5140_v11 = vmax.f32 %v8789_v63, 0.0  ;;  %v6103_v42 = vsel %vm6069_vm12, %v9760_v60, %v6037_v31 }
 0x264   :  { %v3382_v0 = vpop.f32.mrb[185].mxu0  ;;  %8097 = vmatpush3.bf16.msra.mxu1 %v10733_v53  ;;  %v4879_v1 = vmax.f32 %v8528_v35, 0.0  ;;  %v6169_v55 = vsel %vm6135_vm14, %v9780_v12, %v6103_v42 }
 0x265   :  { %v8529_v58 = vpop.f32.mrb[186].mxu0  ;;  %8098 = vmatprep.subr.bf16.mxu1 %v5296_v17  ;;  %v4877_v18 = vmax.f32 %v3382_v0, 0.0  ;;  %v4425_v17 = vpop.f32.mrb[67].mxu1  ;;  %v10860_v0 = vpack.c.bf16 %v5140_v11, %v5139_v57  ;;  %vm6202_vm2 = vcmp.eq.s32.totalorder %v6169_v55, %v9768_v7  ;;  %v9087_v55 = vld [vmem:[%s12235_s1 + $0x4c0] sm:$0xff]  }
 0x266   :  { %v4880_v53 = vmax.f32 %v8529_v58, 0.0  ;;  %v3385_v22 = vpop.f32.mrb[187].mxu0  ;;  %v5138_v35 = vmax.f32 %v4425_v17, 0.0  ;;  %vm10915_vm9 = vmand %vm6188_vm3, %vm6202_vm2 }
 0x267   :  { %v4878_v45 = vmax.f32 %v3385_v22, 0.0  ;;  %12298 = vst [vmem:[#allocation19_spill] sm:$0xff] %v10860_v0  ;;  %v9085_v22 = vld [vmem:[%s12235_s1 + $0x4b0] sm:$0xff]   ;;  %vm6332_vm11 = vmor %vm10915_vm9, %vm10903_vm8 }
 0x268   :  { %v5298_v59 = vpack.c.bf16 %v4880_v53, %v4879_v1  ;;  %8635 = vmatmul.mubr.msk.bf16.gmra.mrb[36].mxu0 %vm1843_vm0, %v9082_v28  ;;  %8099 = vmatpush3.bf16.msra.mxu1 %v10730_v49  ;;  %v10862_v19 = vpack.c.bf16 %v5138_v35, %v5137_v10  ;;  %v6166_v49 = vsel %vm6132_vm13, %v9780_v12, %v6100_v50  ;;  %v8792_v1 = vpop.f32.mrb[68].mxu1  ;;  %vm7682_vm13 = vmpackc.low %vm6332_vm11, %vm6332_vm11 }
 0x269   :  { %v5297_v58 = vpack.c.bf16 %v4878_v45, %v4877_v18  ;;  %8638 = vmatprep.mubr.msk.bf16.mxu0 %vm1843_vm0, %v9083_v34  ;;  %v9084_v34 = vld [vmem:[%s12235_s1 + $0x4a8] sm:$0xff]   ;;  %v4438_v31 = vpop.f32.mrb[69].mxu1  ;;  %vm6199_vm1 = vcmp.eq.s32.totalorder %v6166_v49, %v9768_v7  ;;  %v5143_v18 = vmax.f32 %v8792_v1, 0.0 }
 0x26a   :  { %12299 = vst [vmem:[#allocation20_spill] sm:$0xff] %v10862_v19  ;;  %v8793_v45 = vpop.f32.mrb[70].mxu1  ;;  %v5141_v35 = vmax.f32 %v4438_v31, 0.0  ;;  %vm10897_vm7 = vmand %vm6188_vm3, %vm6199_vm1 }
 0x26b   :  { %v8532_v6 = vpop.f32.mrb[188].mxu0  ;;  %8100 = vmatprep.subr.bf16.mxu1 %v5297_v58  ;;  %v5144_v58 = vmax.f32 %v8793_v45, 0.0  ;;  %vm6329_vm10 = vmor %vm10897_vm7, %vm10888_vm5 }
 0x26c   :  { %v3398_v28 = vpop.f32.mrb[189].mxu0  ;;  %8101 = vmatpush3.bf16.msra.mxu1 %v10755_v37  ;;  %v4883_v57 = vmax.f32 %v8532_v6, 0.0  ;;  %vm7680_vm12 = vmpackc.low %vm6329_vm10, %vm6329_vm10 }
 0x26d   :  { %v8533_v53 = vpop.f32.mrb[190].mxu0  ;;  %8102 = vmatprep.subr.bf16.mxu1 %v5298_v59  ;;  %v4881_v50 = vmax.f32 %v3398_v28, 0.0  ;;  %v4441_v59 = vpop.f32.mrb[71].mxu1 }
 0x26e   :  { %v4884_v63 = vmax.f32 %v8533_v53, 0.0  ;;  %v3401_v37 = vpop.f32.mrb[191].mxu0  ;;  %v5142_v42 = vmax.f32 %v4441_v59, 0.0  ;;  %v9086_v53 = vld [vmem:[%s12235_s1 + $0x4b8] sm:$0xff]  }
 0x26f   :  { %v4882_v17 = vmax.f32 %v3401_v37, 0.0 }
 0x270   :  { %v5300_v10 = vpack.c.bf16 %v4884_v63, %v4883_v57  ;;  %8639 = vmatmul.mubr.msk.bf16.gmra.mrb[40].mxu0 %vm1843_vm0, %v9084_v34  ;;  %8103 = vmatpush3.bf16.msra.mxu1 %v10752_v36  ;;  %v10907_v36 = vpack.c.bf16 %v5144_v58, %v5143_v18  ;;  %v10909_v28 = vpack.c.bf16 %v5142_v42, %v5141_v35 }
 0x271   :  { %v5299_v6 = vpack.c.bf16 %v4882_v17, %v4881_v50  ;;  %8642 = vmatprep.mubr.msk.bf16.mxu0 %vm1843_vm0, %v9085_v22  ;;  %v8796_v22 = vpop.f32.mrb[72].mxu1 }
 0x272   :  { %12306 = vst [vmem:[#allocation21_spill] sm:$0xff] %v10907_v36  ;;  %12307 = vst [vmem:[#allocation22_spill] sm:$0xff] %v10909_v28  ;;  %v4454_v57 = vpop.f32.mrb[73].mxu1  ;;  %v5147_v18 = vmax.f32 %v8796_v22, 0.0  ;;  %v9089_v22 = vld [vmem:[%s12235_s1 + $0x4d0] sm:$0xff]  }
 0x273   :  { %v8536_v34 = vpop.f32.mrb[192].mxu0  ;;  %8104 = vmatprep.subr.bf16.mxu1 %v5299_v6  ;;  %v8797_v45 = vpop.f32.mrb[74].mxu1  ;;  %v5145_v11 = vmax.f32 %v4454_v57, 0.0 }
 0x274   :  { %v3414_v1 = vpop.f32.mrb[193].mxu0  ;;  %8105 = vmatpush3.bf16.msra.mxu1 %v10777_v38  ;;  %v4887_v63 = vmax.f32 %v8536_v34, 0.0  ;;  %v4457_v59 = vpop.f32.mrb[75].mxu1  ;;  %v5148_v35 = vmax.f32 %v8797_v45, 0.0  ;;  %v12312_v34 = vmov 0.00390625|0.00390625  }
 0x275   :  { %v8537_v31 = vpop.f32.mrb[194].mxu0  ;;  %8106 = vmatprep.subr.bf16.mxu1 %v5300_v10  ;;  %v4885_v50 = vmax.f32 %v3414_v1, 0.0  ;;  %v5146_v58 = vmax.f32 %v4457_v59, 0.0  ;;  %v8800_v1 = vpop.f32.mrb[76].mxu1 }
 0x276   :  { %v4888_v37 = vmax.f32 %v8537_v31, 0.0  ;;  %v3417_v38 = vpop.f32.mrb[195].mxu0  ;;  %v10941_v6 = vpack.c.bf16 %v5148_v35, %v5147_v18  ;;  %v4470_v31 = vpop.f32.mrb[77].mxu1 }
 0x277   :  { %v4886_v17 = vmax.f32 %v3417_v38, 0.0  ;;  %v10943_v43 = vpack.c.bf16 %v5146_v58, %v5145_v11  ;;  %v8801_v38 = vpop.f32.mrb[78].mxu1  ;;  %v5149_v59 = vmax.f32 %v4470_v31, 0.0 }
 0x278   :  { %v10934_v10 = vpack.c.bf16 %v4888_v37, %v4887_v63  ;;  %8643 = vmatmul.mubr.msk.bf16.gmra.mrb[44].mxu0 %vm1843_vm0, %v9086_v53  ;;  %8107 = vmatpush3.bf16.msra.mxu1 %v10774_v41  ;;  %12310 = vst [vmem:[#allocation23_spill] sm:$0xff] %v10941_v6  ;;  %v9088_v41 = vld [vmem:[%s12235_s1 + $0x4c8] sm:$0xff]   ;;  %v5151_v37 = vmax.f32 %v8800_v1, 0.0  ;;  %v5152_v11 = vmax.f32 %v8801_v38, 0.0 }
 0x279   :  { %v10938_v42 = vpack.c.bf16 %v4886_v17, %v4885_v50  ;;  %8646 = vmatprep.mubr.msk.bf16.mxu0 %vm1843_vm0, %v9087_v55  ;;  %12311 = vst [vmem:[#allocation24_spill] sm:$0xff] %v10943_v43  ;;  %v4473_v50 = vpop.f32.mrb[79].mxu1 }
 0x27a   :  { %v5150_v35 = vmax.f32 %v4473_v50, 0.0  ;;  %v8804_v31 = vpop.f32.mrb[80].mxu1 }
 0x27b   :  { %v8540_v33 = vpop.f32.mrb[196].mxu0  ;;  %7681 = vmatmul.mubr.msk.bf16.vlgmr.msra.gmra.mrb[152].mxu1 %vm7680_vm12, %v12312_v34  ;;  %v4486_v38 = vpop.f32.mrb[81].mxu1 }
 0x27c   :  { %v3430_v49 = vpop.f32.mrb[197].mxu0  ;;  %7683 = vmatprep.mubr.msk.bf16.mxu1 %vm7682_vm13, %v12312_v34  ;;  %v4891_v55 = vmax.f32 %v8540_v33, 0.0  ;;  %v5474_v33 = vadd.s32 1536, %v9578_v40  ;;  %v10962_v1 = vpack.c.bf16 %v5150_v35, %v5149_v59  ;;  %v5155_v59 = vmax.f32 %v8804_v31, 0.0  ;;  %v9092_v31 = vld [vmem:[%s12235_s1 + $0x4e8] sm:$0xff]  }
 0x27d   :  { %v8541_v53 = vpop.f32.mrb[198].mxu0  ;;  %v4889_v18 = vmax.f32 %v3430_v49, 0.0  ;;  %v5153_v36 = vmax.f32 %v4486_v38, 0.0 }
 0x27e   :  { %v4892_v57 = vmax.f32 %v8541_v53, 0.0  ;;  %v3433_v63 = vpop.f32.mrb[199].mxu0  ;;  %v10960_v53 = vpack.c.bf16 %v5152_v11, %v5151_v37  ;;  %12314 = vst [vmem:[#allocation26_spill] sm:$0xff] %v10962_v1  ;;  %v10971_v50 = vshra.s32 %v5474_v33, 8  ;;  %v8805_v11 = vpop.f32.mrb[82].mxu1 }
 0x27f   :  { %v4890_v45 = vmax.f32 %v3433_v63, 0.0  ;;  %v5477_v63 = vadd.s32 1920, %v9578_v40  ;;  %v4489_v6 = vpop.f32.mrb[83].mxu1  ;;  %v5156_v28 = vmax.f32 %v8805_v11, 0.0 }
 0x280   :  { %v10953_v17 = vpack.c.bf16 %v4892_v57, %v4891_v55  ;;  %8647 = vmatmul.mubr.msk.bf16.gmra.mrb[48].mxu0 %vm1843_vm0, %v9088_v41  ;;  %12313 = vst [vmem:[#allocation25_spill] sm:$0xff] %v10960_v53  ;;  %v9090_v41 = vld [vmem:[%s12235_s1 + $0x4d8] sm:$0xff]   ;;  %v5154_v0 = vmax.f32 %v4489_v6, 0.0  ;;  %vm5540_vm14 = vcmp.eq.s32.totalorder %v10971_v50, 0  ;;  %vm5606_vm1 = vcmp.eq.s32.totalorder %v10971_v50, 1 }
 0x281   :  { %v10956_v58 = vpack.c.bf16 %v4890_v45, %v4889_v18  ;;  %8650 = vmatprep.mubr.msk.bf16.mxu0 %vm1843_vm0, %v9089_v22  ;;  %v9091_v22 = vld [vmem:[%s12235_s1 + $0x4e0] sm:$0xff]   ;;  %v10973_v1 = vshra.s32 %v5477_v63, 8  ;;  %v10982_v33 = vpack.c.bf16 %v5156_v28, %v5155_v59  ;;  %vm5672_vm4 = vcmp.eq.s32.totalorder %v10971_v50, 2 }
 0x282   :  { %vm5738_vm7 = vcmp.eq.s32.totalorder %v10971_v50, 3  ;;  %vm5804_vm9 = vcmp.eq.s32.totalorder %v10971_v50, 4  ;;  %vm5870_vm11 = vcmp.eq.s32.totalorder %v10971_v50, 5  ;;  %vm5936_vm13 = vcmp.eq.s32.totalorder %v10971_v50, 6 }
 0x283   :  { %v8544_v49 = vpop.f32.mrb[200].mxu0  ;;  %12315 = vst [vmem:[#allocation27_spill] sm:$0xff] %v10982_v33  ;;  %vm5543_vm15 = vcmp.eq.s32.totalorder %v10973_v1, 0  ;;  %vm5609_vm2 = vcmp.eq.s32.totalorder %v10973_v1, 1  ;;  %vm5675_vm5 = vcmp.eq.s32.totalorder %v10973_v1, 2  ;;  %vm5741_vm8 = vcmp.eq.s32.totalorder %v10973_v1, 3 }
 0x284   :  { %v3446_v55 = vpop.f32.mrb[201].mxu0  ;;  %v4895_v18 = vmax.f32 %v8544_v49, 0.0  ;;  %v10984_v49 = vpack.c.bf16 %v5154_v0, %v5153_v36  ;;  %v5577_v59 = vsel %vm5543_vm15, %v9638_v54, 4294967295  ;;  %vm5807_vm10 = vcmp.eq.s32.totalorder %v10973_v1, 4 }
 0x285   :  { %v8545_v57 = vpop.f32.mrb[202].mxu0  ;;  %v4893_v35 = vmax.f32 %v3446_v55, 0.0  ;;  %vm5873_vm12 = vcmp.eq.s32.totalorder %v10973_v1, 5  ;;  %vm6002_vm15 = vcmp.eq.s32.totalorder %v10971_v50, 7 }
 0x286   :  { %v4896_v37 = vmax.f32 %v8545_v57, 0.0  ;;  %v3449_v45 = vpop.f32.mrb[203].mxu0  ;;  %12316 = vst [vmem:[#allocation28_spill] sm:$0xff] %v10984_v49  ;;  %v5574_v57 = vsel %vm5540_vm14, %v9638_v54, 4294967295  ;;  %vm5939_vm14 = vcmp.eq.s32.totalorder %v10973_v1, 6 }
 0x287   :  { %v4894_v53 = vmax.f32 %v3449_v45, 0.0 }
 0x288   :  { %v10975_v43 = vpack.c.bf16 %v4896_v37, %v4895_v18  ;;  %8651 = vmatmul.mubr.msk.bf16.gmra.mrb[52].mxu0 %vm1843_vm0, %v9090_v41  ;;  %v8808_v41 = vpop.f32.mrb[84].mxu1 }
 0x289   :  { %v10978_v19 = vpack.c.bf16 %v4894_v53, %v4893_v35  ;;  %8654 = vmatprep.mubr.msk.bf16.mxu0 %vm1843_vm0, %v9091_v22  ;;  %v9093_v53 = vld [vmem:[%s12235_s1 + $0x4f0] sm:$0xff]   ;;  %v4502_v28 = vpop.f32.mrb[85].mxu1  ;;  %v5159_v38 = vmax.f32 %v8808_v41, 0.0  ;;  %v5640_v41 = vsel %vm5606_vm1, %v9658_v4, %v5574_v57  ;;  %vm6005_vm1 = vcmp.eq.s32.totalorder %v10973_v1, 7 }
 0x28a   :  { %v8809_v18 = vpop.f32.mrb[86].mxu1  ;;  %v5157_v33 = vmax.f32 %v4502_v28, 0.0 }
 0x28b   :  { %v8548_v63 = vpop.f32.mrb[204].mxu0  ;;  %v4505_v11 = vpop.f32.mrb[87].mxu1  ;;  %v5160_v49 = vmax.f32 %v8809_v18, 0.0 }
 0x28c   :  { %v3462_v55 = vpop.f32.mrb[205].mxu0  ;;  %v4899_v22 = vmax.f32 %v8548_v63, 0.0  ;;  %v5158_v63 = vmax.f32 %v4505_v11, 0.0  ;;  %v8812_v57 = vpop.f32.mrb[88].mxu1 }
 0x28d   :  { %v8549_v6 = vpop.f32.mrb[206].mxu0  ;;  %v4897_v37 = vmax.f32 %v3462_v55, 0.0  ;;  %v5643_v55 = vsel %vm5609_vm2, %v9658_v4, %v5577_v59  ;;  %v5163_v11 = vmax.f32 %v8812_v57, 0.0  ;;  %vm6068_vm2 = vcmp.eq.s32.totalorder %v10971_v50, 8 }
 0x28e   :  { %v4900_v0 = vmax.f32 %v8549_v6, 0.0  ;;  %v3465_v36 = vpop.f32.mrb[207].mxu0 }
 0x28f   :  { %v4898_v45 = vmax.f32 %v3465_v36, 0.0  ;;  %v11007_v36 = vpack.c.bf16 %v5160_v49, %v5159_v38  ;;  %v5709_v49 = vsel %vm5675_vm5, %v9668_v8, %v5643_v55  ;;  %vm6134_vm5 = vcmp.eq.s32.totalorder %v10971_v50, 9 }
 0x290   :  { %v10997_v35 = vpack.c.bf16 %v4900_v0, %v4899_v22  ;;  %8655 = vmatmul.mubr.msk.bf16.gmra.mrb[56].mxu0 %vm1843_vm0, %v9092_v31  ;;  %v11009_v22 = vpack.c.bf16 %v5158_v63, %v5157_v33  ;;  %v9094_v0 = vld [vmem:[%s12235_s1 + $0x4f8] sm:$0xff]   ;;  %v4518_v33 = vpop.f32.mrb[89].mxu1 }
 0x291   :  { %v11000_v6 = vpack.c.bf16 %v4898_v45, %v4897_v37  ;;  %8658 = vmatprep.mubr.msk.bf16.mxu0 %vm1843_vm0, %v9093_v53  ;;  %12317 = vst [vmem:[#allocation29_spill] sm:$0xff] %v11007_v36  ;;  %v5706_v53 = vsel %vm5672_vm4, %v9668_v8, %v5640_v41  ;;  %v9095_v37 = vld [vmem:[%s12235_s1 + $0x500] sm:$0xff]   ;;  %v8813_v63 = vpop.f32.mrb[90].mxu1  ;;  %v5161_v23 = vmax.f32 %v4518_v33, 0.0  ;;  %vm6071_vm4 = vcmp.eq.s32.totalorder %v10973_v1, 8 }
 0x292   :  { %12318 = vst [vmem:[#allocation30_spill] sm:$0xff] %v11009_v22  ;;  %v5772_v22 = vsel %vm5738_vm7, %v9683_v15, %v5706_v53  ;;  %v4521_v13 = vpop.f32.mrb[91].mxu1  ;;  %v5164_v55 = vmax.f32 %v8813_v63, 0.0  ;;  %vm6137_vm7 = vcmp.eq.s32.totalorder %v10973_v1, 9 }
 0x293   :  { %v8552_v31 = vpop.f32.mrb[208].mxu0  ;;  %v5162_v24 = vmax.f32 %v4521_v13, 0.0  ;;  %v9096_v13 = vld [vmem:[%s12235_s1 + $0x508] sm:$0xff]  }
 0x294   :  { %v3478_v28 = vpop.f32.mrb[209].mxu0  ;;  %v4903_v38 = vmax.f32 %v8552_v31, 0.0 }
 0x295   :  { %v8553_v18 = vpop.f32.mrb[210].mxu0  ;;  %v4901_v36 = vmax.f32 %v3478_v28, 0.0  ;;  %v11027_v28 = vpack.c.bf16 %v5164_v55, %v5163_v11  ;;  %v11029_v57 = vpack.c.bf16 %v5162_v24, %v5161_v23  ;;  %v9097_v23 = vld [vmem:[%s12235_s1 + $0x510] sm:$0xff]  }
 0x296   :  { %v4904_v45 = vmax.f32 %v8553_v18, 0.0  ;;  %v3481_v59 = vpop.f32.mrb[211].mxu0  ;;  %v5775_v18 = vsel %vm5741_vm8, %v9683_v15, %v5709_v49  ;;  %vm6267_vm8 = vcmp.eq.s32.totalorder %v10971_v50, %v9796_v20 }
 0x297   :  { %v4902_v41 = vmax.f32 %v3481_v59, 0.0  ;;  %12319 = vst [vmem:[#allocation31_spill] sm:$0xff] %v11027_v28  ;;  %12320 = vst [vmem:[#allocation32_spill] sm:$0xff] %v11029_v57 }
 0x298   :  { %v5310_v52 = vpack.c.bf16 %v4904_v45, %v4903_v38  ;;  %8659 = vmatmul.mubr.msk.bf16.gmra.mrb[60].mxu0 %vm1843_vm0, %v9094_v0  ;;  %v5838_v38 = vsel %vm5804_vm9, %v9697_v25, %v5772_v22 }
 0x299   :  { %v5309_v31 = vpack.c.bf16 %v4902_v41, %v4901_v36  ;;  %8662 = vmatprep.mubr.msk.bf16.mxu0 %vm1843_vm0, %v9095_v37  ;;  %v5841_v36 = vsel %vm5807_vm10, %v9697_v25, %v5775_v18  ;;  %v8816_v37 = vpop.f32.mrb[92].mxu1  ;;  %v5904_v45 = vsel %vm5870_vm11, %v9708_v29, %v5838_v38  ;;  %vm6270_vm11 = vcmp.eq.s32.totalorder %v10973_v1, %v9796_v20 }
 0x29a   :  { %v4534_v22 = vpop.f32.mrb[93].mxu1  ;;  %v5167_v59 = vmax.f32 %v8816_v37, 0.0  ;;  %v5907_v55 = vsel %vm5873_vm12, %v9708_v29, %v5841_v36  ;;  %v5970_v38 = vsel %vm5936_vm13, %v9727_v44, %v5904_v45  ;;  %vm11109_vm12 = vmand %vm6253_vm6, %vm6267_vm8 }
 0x29b   :  { %v8556_v53 = vpop.f32.mrb[212].mxu0  ;;  %8114 = vmatprep.subr.bf16.mxu1 %v5309_v31  ;;  %v8817_v11 = vpop.f32.mrb[94].mxu1  ;;  %v5165_v18 = vmax.f32 %v4534_v22, 0.0  ;;  %v6036_v22 = vsel %vm6002_vm15, %v9744_v51, %v5970_v38 }
 0x29c   :  { %v3494_v0 = vpop.f32.mrb[213].mxu0  ;;  %8115 = vmatpush3.bf16.msra.mxu1 %v10938_v42  ;;  %v4907_v49 = vmax.f32 %v8556_v53, 0.0  ;;  %v5168_v53 = vmax.f32 %v8817_v11, 0.0 }
 0x29d   :  { %v8557_v24 = vpop.f32.mrb[214].mxu0  ;;  %8116 = vmatprep.subr.bf16.mxu1 %v5310_v52  ;;  %v4905_v63 = vmax.f32 %v3494_v0, 0.0  ;;  %v4537_v52 = vpop.f32.mrb[95].mxu1 }
 0x29e   :  { %v4908_v42 = vmax.f32 %v8557_v24, 0.0  ;;  %v3497_v33 = vpop.f32.mrb[215].mxu0  ;;  %v5166_v24 = vmax.f32 %v4537_v52, 0.0  ;;  %v11053_v0 = vpack.c.bf16 %v5168_v53, %v5167_v59 }
 0x29f   :  { %v4906_v41 = vmax.f32 %v3497_v33, 0.0 }
 0x2a0   :  { %v5312_v31 = vpack.c.bf16 %v4908_v42, %v4907_v49  ;;  %8663 = vmatmul.mubr.msk.bf16.gmra.mrb[64].mxu0 %vm1843_vm0, %v9096_v13  ;;  %8117 = vmatpush3.bf16.msra.mxu1 %v10934_v10  ;;  %12321 = vst [vmem:[#allocation33_spill] sm:$0xff] %v11053_v0  ;;  %v11055_v36 = vpack.c.bf16 %v5166_v24, %v5165_v18  ;;  %v8820_v49 = vpop.f32.mrb[96].mxu1 }
 0x2a1   :  { %v5311_v28 = vpack.c.bf16 %v4906_v41, %v4905_v63  ;;  %8666 = vmatprep.mubr.msk.bf16.mxu0 %vm1843_vm0, %v9097_v23  ;;  %v5973_v10 = vsel %vm5939_vm14, %v9727_v44, %v5907_v55  ;;  %v9098_v23 = vld [vmem:[%s12235_s1 + $0x518] sm:$0xff]   ;;  %v4550_v33 = vpop.f32.mrb[97].mxu1  ;;  %v5171_v63 = vmax.f32 %v8820_v49, 0.0  ;;  %v6102_v18 = vsel %vm6068_vm2, %v9760_v60, %v6036_v22  ;;  %vm11124_vm14 = vmand %vm6253_vm6, %vm6270_vm11 }
 0x2a2   :  { %12322 = vst [vmem:[#allocation34_spill] sm:$0xff] %v11055_v36  ;;  %v6039_v11 = vsel %vm6005_vm1, %v9744_v51, %v5973_v10  ;;  %v8821_v41 = vpop.f32.mrb[98].mxu1  ;;  %v5169_v24 = vmax.f32 %v4550_v33, 0.0 }
 0x2a3   :  { %v8560_v37 = vpop.f32.mrb[216].mxu0  ;;  %8118 = vmatprep.subr.bf16.mxu1 %v5311_v28  ;;  %v9099_v28 = vld [vmem:[%s12235_s1 + $0x520] sm:$0xff]   ;;  %v5172_v38 = vmax.f32 %v8821_v41, 0.0  ;;  %v6105_v10 = vsel %vm6071_vm4, %v9760_v60, %v6039_v11 }
 0x2a4   :  { %v3510_v13 = vpop.f32.mrb[217].mxu0  ;;  %8119 = vmatpush3.bf16.msra.mxu1 %v10956_v58  ;;  %v4911_v45 = vmax.f32 %v8560_v37, 0.0  ;;  %v6171_v33 = vsel %vm6137_vm7, %v9780_v12, %v6105_v10 }
 0x2a5   :  { %v8561_v42 = vpop.f32.mrb[218].mxu0  ;;  %8120 = vmatprep.subr.bf16.mxu1 %v5312_v31  ;;  %v4909_v55 = vmax.f32 %v3510_v13, 0.0  ;;  %v4553_v31 = vpop.f32.mrb[99].mxu1  ;;  %v11081_v13 = vpack.c.bf16 %v5172_v38, %v5171_v63  ;;  %vm6204_vm10 = vcmp.eq.s32.totalorder %v6171_v33, %v9768_v7  ;;  %v9103_v33 = vld [vmem:[%s12235_s1 + $0x540] sm:$0xff]  }
 0x2a6   :  { %v4912_v58 = vmax.f32 %v8561_v42, 0.0  ;;  %v3513_v59 = vpop.f32.mrb[219].mxu0  ;;  %v5170_v37 = vmax.f32 %v4553_v31, 0.0  ;;  %vm11136_vm15 = vmand %vm6188_vm3, %vm6204_vm10 }
 0x2a7   :  { %v4910_v52 = vmax.f32 %v3513_v59, 0.0  ;;  %12323 = vst [vmem:[#allocation35_spill] sm:$0xff] %v11081_v13  ;;  %v9101_v59 = vld [vmem:[%s12235_s1 + $0x530] sm:$0xff]   ;;  %vm6334_vm2 = vmor %vm11136_vm15, %vm11124_vm14 }
 0x2a8   :  { %v5314_v53 = vpack.c.bf16 %v4912_v58, %v4911_v45  ;;  %8667 = vmatmul.mubr.msk.bf16.gmra.mrb[68].mxu0 %vm1843_vm0, %v9098_v23  ;;  %8121 = vmatpush3.bf16.msra.mxu1 %v10953_v17  ;;  %v11083_v22 = vpack.c.bf16 %v5170_v37, %v5169_v24  ;;  %v6168_v17 = vsel %vm6134_vm5, %v9780_v12, %v6102_v18  ;;  %v8824_v45 = vpop.f32.mrb[100].mxu1  ;;  %vm7686_vm5 = vmpackc.low %vm6334_vm2, %vm6334_vm2 }
 0x2a9   :  { %v5313_v42 = vpack.c.bf16 %v4910_v52, %v4909_v55  ;;  %8670 = vmatprep.mubr.msk.bf16.mxu0 %vm1843_vm0, %v9099_v28  ;;  %v9100_v28 = vld [vmem:[%s12235_s1 + $0x528] sm:$0xff]   ;;  %v4566_v11 = vpop.f32.mrb[101].mxu1  ;;  %vm6201_vm9 = vcmp.eq.s32.totalorder %v6168_v17, %v9768_v7  ;;  %v5175_v55 = vmax.f32 %v8824_v45, 0.0 }
 0x2aa   :  { %12324 = vst [vmem:[#allocation36_spill] sm:$0xff] %v11083_v22  ;;  %v8825_v52 = vpop.f32.mrb[102].mxu1  ;;  %v5173_v37 = vmax.f32 %v4566_v11, 0.0  ;;  %vm11118_vm13 = vmand %vm6188_vm3, %vm6201_vm9 }
 0x2ab   :  { %v8564_v49 = vpop.f32.mrb[220].mxu0  ;;  %8122 = vmatprep.subr.bf16.mxu1 %v5313_v42  ;;  %v5176_v42 = vmax.f32 %v8825_v52, 0.0  ;;  %vm6331_vm1 = vmor %vm11118_vm13, %vm11109_vm12 }
 0x2ac   :  { %v3526_v23 = vpop.f32.mrb[221].mxu0  ;;  %8123 = vmatpush3.bf16.msra.mxu1 %v10978_v19  ;;  %v4915_v63 = vmax.f32 %v8564_v49, 0.0  ;;  %vm7684_vm4 = vmpackc.low %vm6331_vm1, %vm6331_vm1 }
 0x2ad   :  { %v8565_v58 = vpop.f32.mrb[222].mxu0  ;;  %8124 = vmatprep.subr.bf16.mxu1 %v5314_v53  ;;  %v4913_v18 = vmax.f32 %v3526_v23, 0.0  ;;  %v4569_v53 = vpop.f32.mrb[103].mxu1  ;;  %v11128_v50 = vpack.c.bf16 %v5176_v42, %v5175_v55 }
 0x2ae   :  { %v4916_v41 = vmax.f32 %v8565_v58, 0.0  ;;  %v3529_v19 = vpop.f32.mrb[223].mxu0  ;;  %v5174_v10 = vmax.f32 %v4569_v53, 0.0  ;;  %v9102_v58 = vld [vmem:[%s12235_s1 + $0x538] sm:$0xff]  }
 0x2af   :  { %v4914_v31 = vmax.f32 %v3529_v19, 0.0  ;;  %12331 = vst [vmem:[#allocation37_spill] sm:$0xff] %v11128_v50 }
 0x2b0   :  { %v5316_v24 = vpack.c.bf16 %v4916_v41, %v4915_v63  ;;  %8671 = vmatmul.mubr.msk.bf16.gmra.mrb[72].mxu0 %vm1843_vm0, %v9100_v28  ;;  %8125 = vmatpush3.bf16.msra.mxu1 %v10975_v43  ;;  %v11130_v23 = vpack.c.bf16 %v5174_v10, %v5173_v37 }
 0x2b1   :  { %v5315_v49 = vpack.c.bf16 %v4914_v31, %v4913_v18  ;;  %8674 = vmatprep.mubr.msk.bf16.mxu0 %vm1843_vm0, %v9101_v59  ;;  %v8828_v59 = vpop.f32.mrb[104].mxu1 }
 0x2b2   :  { %12332 = vst [vmem:[#allocation38_spill] sm:$0xff] %v11130_v23  ;;  %v4582_v63 = vpop.f32.mrb[105].mxu1  ;;  %v5179_v55 = vmax.f32 %v8828_v59, 0.0 }
 0x2b3   :  { %v8568_v28 = vpop.f32.mrb[224].mxu0  ;;  %8126 = vmatprep.subr.bf16.mxu1 %v5315_v49  ;;  %v8829_v52 = vpop.f32.mrb[106].mxu1  ;;  %v5177_v38 = vmax.f32 %v4582_v63, 0.0 }
 0x2b4   :  { %v3542_v45 = vpop.f32.mrb[225].mxu0  ;;  %8127 = vmatpush3.bf16.msra.mxu1 %v11000_v6  ;;  %v4919_v41 = vmax.f32 %v8568_v28, 0.0  ;;  %v4585_v53 = vpop.f32.mrb[107].mxu1  ;;  %v5180_v37 = vmax.f32 %v8829_v52, 0.0 }
 0x2b5   :  { %v8569_v11 = vpop.f32.mrb[226].mxu0  ;;  %8128 = vmatprep.subr.bf16.mxu1 %v5316_v24  ;;  %v4917_v18 = vmax.f32 %v3542_v45, 0.0  ;;  %v5178_v42 = vmax.f32 %v4585_v53, 0.0  ;;  %v8832_v17 = vpop.f32.mrb[108].mxu1 }
 0x2b6   :  { %v4920_v19 = vmax.f32 %v8569_v11, 0.0  ;;  %v3545_v6 = vpop.f32.mrb[227].mxu0  ;;  %v11162_v49 = vpack.c.bf16 %v5180_v37, %v5179_v55  ;;  %v4598_v59 = vpop.f32.mrb[109].mxu1 }
 0x2b7   :  { %v4918_v31 = vmax.f32 %v3545_v6, 0.0  ;;  %v11164_v43 = vpack.c.bf16 %v5178_v42, %v5177_v38 }
 0x2b8   :  { %v11155_v24 = vpack.c.bf16 %v4920_v19, %v4919_v41  ;;  %8675 = vmatmul.mubr.msk.bf16.gmra.mrb[76].mxu0 %vm1843_vm0, %v9102_v58  ;;  %8129 = vmatpush3.bf16.msra.mxu1 %v10997_v35  ;;  %12335 = vst [vmem:[#allocation39_spill] sm:$0xff] %v11162_v49  ;;  %v9104_v35 = vld [vmem:[%s12235_s1 + $0x548] sm:$0xff]   ;;  %v9105_v58 = vld [vmem:[%s12235_s1 + $0x550] sm:$0xff]   ;;  %v5183_v41 = vmax.f32 %v8832_v17, 0.0  ;;  %v8833_v19 = vpop.f32.mrb[110].mxu1 }
 0x2b9   :  { %v11159_v10 = vpack.c.bf16 %v4918_v31, %v4917_v18  ;;  %8678 = vmatprep.mubr.msk.bf16.mxu0 %vm1843_vm0, %v9103_v33  ;;  %12336 = vst [vmem:[#allocation40_spill] sm:$0xff] %v11164_v43  ;;  %v4601_v52 = vpop.f32.mrb[111].mxu1  ;;  %v5181_v31 = vmax.f32 %v4598_v59, 0.0  ;;  %v5184_v53 = vmax.f32 %v8833_v19, 0.0 }
 0x2ba   :  { %v5182_v38 = vmax.f32 %v4601_v52, 0.0 }
 0x2bb   :  { %v8572_v1 = vpop.f32.mrb[228].mxu0  ;;  %7685 = vmatmul.mubr.msk.bf16.vlgmr.msra.gmra.mrb[156].mxu1 %vm7684_vm4, %v12312_v34  ;;  %v11180_v42 = vpack.c.bf16 %v5184_v53, %v5183_v41 }
 0x2bc   :  { %v3558_v28 = vpop.f32.mrb[229].mxu0  ;;  %7687 = vmatprep.mubr.msk.bf16.mxu1 %vm7686_vm5, %v12312_v34  ;;  %v4923_v11 = vmax.f32 %v8572_v1, 0.0  ;;  %v11182_v1 = vpack.c.bf16 %v5182_v38, %v5181_v31 }
 0x2bd   :  { %v8573_v45 = vpop.f32.mrb[230].mxu0  ;;  %v4921_v6 = vmax.f32 %v3558_v28, 0.0  ;;  %12337 = vst [vmem:[#allocation41_spill] sm:$0xff] %v11180_v42  ;;  %v5476_v28 = vadd.s32 1792, %v9578_v40 }
 0x2be   :  { %v4924_v33 = vmax.f32 %v8573_v45, 0.0  ;;  %v3561_v63 = vpop.f32.mrb[231].mxu0  ;;  %12338 = vst [vmem:[#allocation42_spill] sm:$0xff] %v11182_v1 }
 0x2bf   :  { %v4922_v55 = vmax.f32 %v3561_v63, 0.0  ;;  %v11192_v38 = vshra.s32 %v5476_v28, 8 }
 0x2c0   :  { %v11174_v18 = vpack.c.bf16 %v4924_v33, %v4923_v11  ;;  %8679 = vmatmul.mubr.msk.bf16.gmra.mrb[80].mxu0 %vm1843_vm0, %v9104_v35  ;;  %v9106_v11 = vld [vmem:[%s12235_s1 + $0x558] sm:$0xff]   ;;  %v8836_v35 = vpop.f32.mrb[112].mxu1  ;;  %v9107_v33 = vld [vmem:[%s12235_s1 + $0x560] sm:$0xff]  }
 0x2c1   :  { %v11177_v37 = vpack.c.bf16 %v4922_v55, %v4921_v6  ;;  %8682 = vmatprep.mubr.msk.bf16.mxu0 %vm1843_vm0, %v9105_v58  ;;  %v4614_v63 = vpop.f32.mrb[113].mxu1  ;;  %v5479_v6 = vadd.s32 2176, %v9578_v40  ;;  %v5187_v55 = vmax.f32 %v8836_v35, 0.0  ;;  %vm5542_vm7 = vcmp.eq.s32.totalorder %v11192_v38, 0 }
 0x2c2   :  { %v8837_v52 = vpop.f32.mrb[114].mxu1  ;;  %v5185_v49 = vmax.f32 %v4614_v63, 0.0  ;;  %vm5608_vm9 = vcmp.eq.s32.totalorder %v11192_v38, 1  ;;  %vm5674_vm11 = vcmp.eq.s32.totalorder %v11192_v38, 2  ;;  %vm5740_vm13 = vcmp.eq.s32.totalorder %v11192_v38, 3 }
 0x2c3   :  { %v8576_v17 = vpop.f32.mrb[232].mxu0  ;;  %v4617_v42 = vpop.f32.mrb[115].mxu1  ;;  %v5188_v43 = vmax.f32 %v8837_v52, 0.0  ;;  %v5576_v52 = vsel %vm5542_vm7, %v9638_v54, 4294967295  ;;  %vm5806_vm15 = vcmp.eq.s32.totalorder %v11192_v38, 4  ;;  %vm5872_vm2 = vcmp.eq.s32.totalorder %v11192_v38, 5 }
 0x2c4   :  { %v3574_v45 = vpop.f32.mrb[233].mxu0  ;;  %v4927_v58 = vmax.f32 %v8576_v17, 0.0  ;;  %v5186_v50 = vmax.f32 %v4617_v42, 0.0  ;;  %v11200_v17 = vshra.s32 %v5479_v6, 8  ;;  %vm5938_vm5 = vcmp.eq.s32.totalorder %v11192_v38, 6 }
 0x2c5   :  { %v8577_v59 = vpop.f32.mrb[234].mxu0  ;;  %v4925_v31 = vmax.f32 %v3574_v45, 0.0  ;;  %v11202_v35 = vpack.c.bf16 %v5188_v43, %v5187_v55 }
 0x2c6   :  { %v4928_v41 = vmax.f32 %v8577_v59, 0.0  ;;  %v3577_v19 = vpop.f32.mrb[235].mxu0  ;;  %v11204_v45 = vpack.c.bf16 %v5186_v50, %v5185_v49  ;;  %vm5545_vm8 = vcmp.eq.s32.totalorder %v11200_v17, 0  ;;  %vm5611_vm10 = vcmp.eq.s32.totalorder %v11200_v17, 1 }
 0x2c7   :  { %v4926_v53 = vmax.f32 %v3577_v19, 0.0  ;;  %12339 = vst [vmem:[#allocation43_spill] sm:$0xff] %v11202_v35  ;;  %vm5677_vm12 = vcmp.eq.s32.totalorder %v11200_v17, 2  ;;  %vm5743_vm14 = vcmp.eq.s32.totalorder %v11200_v17, 3  ;;  %vm5809_vm1 = vcmp.eq.s32.totalorder %v11200_v17, 4 }
 0x2c8   :  { %v11194_v1 = vpack.c.bf16 %v4928_v41, %v4927_v58  ;;  %8683 = vmatmul.mubr.msk.bf16.gmra.mrb[84].mxu0 %vm1843_vm0, %v9106_v11  ;;  %12340 = vst [vmem:[#allocation44_spill] sm:$0xff] %v11204_v45  ;;  %v9108_v58 = vld [vmem:[%s12235_s1 + $0x568] sm:$0xff]   ;;  %v8840_v11 = vpop.f32.mrb[116].mxu1  ;;  %vm5875_vm4 = vcmp.eq.s32.totalorder %v11200_v17, 5  ;;  %vm5941_vm7 = vcmp.eq.s32.totalorder %v11200_v17, 6 }
 0x2c9   :  { %v11197_v23 = vpack.c.bf16 %v4926_v53, %v4925_v31  ;;  %8686 = vmatprep.mubr.msk.bf16.mxu0 %vm1843_vm0, %v9107_v33  ;;  %v9109_v33 = vld [vmem:[%s12235_s1 + $0x570] sm:$0xff]   ;;  %v4630_v63 = vpop.f32.mrb[117].mxu1  ;;  %v5191_v50 = vmax.f32 %v8840_v11, 0.0  ;;  %v5579_v11 = vsel %vm5545_vm8, %v9638_v54, 4294967295  ;;  %vm6004_vm8 = vcmp.eq.s32.totalorder %v11192_v38, 7 }
 0x2ca   :  { %v8841_v49 = vpop.f32.mrb[118].mxu1  ;;  %v5189_v35 = vmax.f32 %v4630_v63, 0.0 }
 0x2cb   :  { %v8580_v28 = vpop.f32.mrb[236].mxu0  ;;  %v4633_v31 = vpop.f32.mrb[119].mxu1  ;;  %v5192_v45 = vmax.f32 %v8841_v49, 0.0 }
 0x2cc   :  { %v3590_v59 = vpop.f32.mrb[237].mxu0  ;;  %v4931_v41 = vmax.f32 %v8580_v28, 0.0  ;;  %v5190_v28 = vmax.f32 %v4633_v31, 0.0  ;;  %v8844_v49 = vpop.f32.mrb[120].mxu1 }
 0x2cd   :  { %v8581_v42 = vpop.f32.mrb[238].mxu0  ;;  %v4929_v6 = vmax.f32 %v3590_v59, 0.0  ;;  %v5642_v59 = vsel %vm5608_vm9, %v9658_v4, %v5576_v52  ;;  %vm6007_vm9 = vcmp.eq.s32.totalorder %v11200_v17, 7 }
 0x2ce   :  { %v4932_v43 = vmax.f32 %v8581_v42, 0.0  ;;  %v3593_v19 = vpop.f32.mrb[239].mxu0 }
 0x2cf   :  { %v4930_v55 = vmax.f32 %v3593_v19, 0.0  ;;  %v11226_v19 = vpack.c.bf16 %v5192_v45, %v5191_v50  ;;  %v5708_v45 = vsel %vm5674_vm11, %v9668_v8, %v5642_v59  ;;  %vm6073_vm11 = vcmp.eq.s32.totalorder %v11200_v17, 8 }
 0x2d0   :  { %v11216_v53 = vpack.c.bf16 %v4932_v43, %v4931_v41  ;;  %8687 = vmatmul.mubr.msk.bf16.gmra.mrb[88].mxu0 %vm1843_vm0, %v9108_v58  ;;  %v11228_v41 = vpack.c.bf16 %v5190_v28, %v5189_v35  ;;  %v9110_v43 = vld [vmem:[%s12235_s1 + $0x578] sm:$0xff]   ;;  %v4646_v35 = vpop.f32.mrb[121].mxu1  ;;  %v5195_v28 = vmax.f32 %v8844_v49, 0.0 }
 0x2d1   :  { %v11219_v42 = vpack.c.bf16 %v4930_v55, %v4929_v6  ;;  %8690 = vmatprep.mubr.msk.bf16.mxu0 %vm1843_vm0, %v9109_v33  ;;  %12341 = vst [vmem:[#allocation45_spill] sm:$0xff] %v11226_v19  ;;  %v5645_v33 = vsel %vm5611_vm10, %v9658_v4, %v5579_v11  ;;  %v9111_v55 = vld [vmem:[%s12235_s1 + $0x580] sm:$0xff]   ;;  %v8845_v19 = vpop.f32.mrb[122].mxu1  ;;  %v5193_v36 = vmax.f32 %v4646_v35, 0.0  ;;  %vm6070_vm10 = vcmp.eq.s32.totalorder %v11192_v38, 8 }
 0x2d2   :  { %12342 = vst [vmem:[#allocation46_spill] sm:$0xff] %v11228_v41  ;;  %v5711_v13 = vsel %vm5677_vm12, %v9668_v8, %v5645_v33  ;;  %v4649_v22 = vpop.f32.mrb[123].mxu1  ;;  %v5196_v59 = vmax.f32 %v8845_v19, 0.0  ;;  %vm6136_vm12 = vcmp.eq.s32.totalorder %v11192_v38, 9 }
 0x2d3   :  { %v8584_v58 = vpop.f32.mrb[240].mxu0  ;;  %v5194_v57 = vmax.f32 %v4649_v22, 0.0  ;;  %v5777_v49 = vsel %vm5743_vm14, %v9683_v15, %v5711_v13  ;;  %vm6269_vm14 = vcmp.eq.s32.totalorder %v11192_v38, %v9796_v20 }
 0x2d4   :  { %v3606_v63 = vpop.f32.mrb[241].mxu0  ;;  %v4935_v50 = vmax.f32 %v8584_v58, 0.0  ;;  %v11248_v33 = vpack.c.bf16 %v5196_v59, %v5195_v28 }
 0x2d5   :  { %v8585_v6 = vpop.f32.mrb[242].mxu0  ;;  %v4933_v41 = vmax.f32 %v3606_v63, 0.0  ;;  %v8848_v63 = vpop.f32.mrb[124].mxu1 }
 0x2d6   :  { %v4936_v52 = vmax.f32 %v8585_v6, 0.0  ;;  %v3609_v31 = vpop.f32.mrb[243].mxu0  ;;  %v5774_v6 = vsel %vm5740_vm13, %v9683_v15, %v5708_v45  ;;  %12343 = vst [vmem:[#allocation47_spill] sm:$0xff] %v11248_v33  ;;  %v5199_v19 = vmax.f32 %v8848_v63, 0.0  ;;  %v4662_v22 = vpop.f32.mrb[125].mxu1  ;;  %vm6139_vm13 = vcmp.eq.s32.totalorder %v11200_v17, 9 }
 0x2d7   :  { %v4934_v11 = vmax.f32 %v3609_v31, 0.0  ;;  %v5840_v45 = vsel %vm5806_vm15, %v9697_v25, %v5774_v6  ;;  %v8849_v13 = vpop.f32.mrb[126].mxu1  ;;  %v5197_v59 = vmax.f32 %v4662_v22, 0.0 }
 0x2d8   :  { %v5326_v0 = vpack.c.bf16 %v4936_v52, %v4935_v50  ;;  %8691 = vmatmul.mubr.msk.bf16.gmra.mrb[92].mxu0 %vm1843_vm0, %v9110_v43  ;;  %v11250_v50 = vpack.c.bf16 %v5194_v57, %v5193_v36  ;;  %v9113_v57 = vld [vmem:[%s12235_s1 + $0x590] sm:$0xff]   ;;  %v5843_v36 = vsel %vm5809_vm1, %v9697_v25, %v5777_v49  ;;  %v4665_v52 = vpop.f32.mrb[127].mxu1  ;;  %v5906_v63 = vsel %vm5872_vm2, %v9708_v29, %v5840_v45  ;;  %vm11337_vm2 = vmand %vm6253_vm6, %vm6269_vm14 }
 0x2d9   :  { %v5325_v58 = vpack.c.bf16 %v4934_v11, %v4933_v41  ;;  %8694 = vmatprep.mubr.msk.bf16.mxu0 %vm1843_vm0, %v9111_v55  ;;  %v9112_v55 = vld [vmem:[%s12235_s1 + $0x588] sm:$0xff]   ;;  %v5198_v22 = vmax.f32 %v4665_v52, 0.0  ;;  %vm6272_vm1 = vcmp.eq.s32.totalorder %v11200_v17, %v9796_v20 }
 0x2da   :  { %12344 = vst [vmem:[#allocation48_spill] sm:$0xff] %v11250_v50 }
 0x2db   :  { %v8588_v43 = vpop.f32.mrb[244].mxu0  ;;  %8136 = vmatprep.subr.bf16.mxu1 %v5325_v58  ;;  %v8852_v58 = vpop.f32.mrb[128].mxu1 }
 0x2dc   :  { %v3622_v41 = vpop.f32.mrb[245].mxu0  ;;  %8137 = vmatpush3.bf16.msra.mxu1 %v11159_v10  ;;  %v5200_v10 = vmax.f32 %v8849_v13, 0.0  ;;  %v4939_v31 = vmax.f32 %v8588_v43, 0.0  ;;  %v4678_v49 = vpop.f32.mrb[129].mxu1  ;;  %v5909_v43 = vsel %vm5875_vm4, %v9708_v29, %v5843_v36  ;;  %v5203_v45 = vmax.f32 %v8852_v58, 0.0  ;;  %v9114_v58 = vld [vmem:[%s12235_s1 + $0x598] sm:$0xff]  }
 0x2dd   :  { %v8589_v35 = vpop.f32.mrb[246].mxu0  ;;  %8138 = vmatprep.subr.bf16.mxu1 %v5326_v0  ;;  %v4937_v0 = vmax.f32 %v3622_v41, 0.0  ;;  %v8853_v41 = vpop.f32.mrb[130].mxu1 }
 0x2de   :  { %v4940_v28 = vmax.f32 %v8589_v35, 0.0  ;;  %v3625_v11 = vpop.f32.mrb[247].mxu0  ;;  %v11269_v33 = vpack.c.bf16 %v5200_v10, %v5199_v19  ;;  %v5201_v19 = vmax.f32 %v4678_v49, 0.0  ;;  %v5204_v35 = vmax.f32 %v8853_v41, 0.0  ;;  %v4681_v10 = vpop.f32.mrb[131].mxu1 }
 0x2df   :  { %v4938_v6 = vmax.f32 %v3625_v11, 0.0  ;;  %v5202_v36 = vmax.f32 %v4681_v10, 0.0 }
 0x2e0   :  { %v5328_v50 = vpack.c.bf16 %v4940_v28, %v4939_v31  ;;  %8695 = vmatmul.mubr.msk.bf16.gmra.mrb[96].mxu0 %vm1843_vm0, %v9112_v55  ;;  %8139 = vmatpush3.bf16.msra.mxu1 %v11155_v24  ;;  %v5972_v55 = vsel %vm5938_vm5, %v9727_v44, %v5906_v63  ;;  %v11282_v24 = vpack.c.bf16 %v5198_v22, %v5197_v59  ;;  %v7998_v31 = vpop.f32.mrb[132].mxu1 }
 0x2e1   :  { %v5327_v13 = vpack.c.bf16 %v4938_v6, %v4937_v0  ;;  %8698 = vmatprep.mubr.msk.bf16.mxu0 %vm1843_vm0, %v9113_v57  ;;  %v11284_v52 = vpack.c.bf16 %v5204_v35, %v5203_v45  ;;  %v7999_v11 = vpop.f32.mrb[133].mxu1  ;;  %v5975_v0 = vsel %vm5941_vm7, %v9727_v44, %v5909_v43  ;;  %v11294_v59 = vpack.c.bf16 %v5202_v36, %v5201_v19  ;;  %vm11353_vm7 = vmand %vm6253_vm6, %vm6272_vm1 }
 0x2e2   :  { %v8000_v6 = vadd.f32 %v7999_v11, %v7998_v31  ;;  %v8001_v63 = vpop.f32.mrb[134].mxu1  ;;  %v6038_v22 = vsel %vm6004_vm8, %v9744_v51, %v5972_v55 }
 0x2e3   :  { %v8592_v28 = vpop.f32.mrb[248].mxu0  ;;  %8140 = vmatprep.subr.bf16.mxu1 %v5327_v13  ;;  %v8002_v41 = vpop.f32.mrb[135].mxu1  ;;  %v6104_v55 = vsel %vm6070_vm10, %v9760_v60, %v6038_v22 }
 0x2e4   :  { %v3638_v57 = vpop.f32.mrb[249].mxu0  ;;  %8141 = vmatpush3.bf16.msra.mxu1 %v11177_v37  ;;  %v9115_v37 = vld [vmem:[%s12235_s1 + $0x5a0] sm:$0xff]   ;;  %v4943_v43 = vmax.f32 %v8592_v28, 0.0  ;;  %v8020_v19 = vpop.f32.mrb[136].mxu1 }
 0x2e5   :  { %v8593_v49 = vpop.f32.mrb[250].mxu0  ;;  %8142 = vmatprep.subr.bf16.mxu1 %v5328_v50  ;;  %v4941_v35 = vmax.f32 %v3638_v57, 0.0  ;;  %v6041_v50 = vsel %vm6007_vm9, %v9744_v51, %v5975_v0  ;;  %v8021_v36 = vpop.f32.mrb[137].mxu1 }
 0x2e6   :  { %v4944_v13 = vmax.f32 %v8593_v49, 0.0  ;;  %v3641_v45 = vpop.f32.mrb[251].mxu0  ;;  %v8023_v28 = vpop.f32.mrb[138].mxu1  ;;  %v8022_v57 = vadd.f32 %v8021_v36, %v8020_v19  ;;  %v6107_v0 = vsel %vm6073_vm11, %v9760_v60, %v6041_v50 }
 0x2e7   :  { %v4942_v10 = vmax.f32 %v3641_v45, 0.0  ;;  %v8024_v63 = vpop.f32.mrb[139].mxu1 }
 0x2e8   :  { %v5330_v31 = vpack.c.bf16 %v4944_v13, %v4943_v43  ;;  %8699 = vmatmul.mubr.msk.bf16.gmra.mrb[100].mxu0 %vm1843_vm0, %v9114_v58  ;;  %8143 = vmatpush3.bf16.msra.mxu1 %v11174_v18  ;;  %v8042_v49 = vpop.f32.mrb[140].mxu1  ;;  %v6170_v58 = vsel %vm6136_vm12, %v9780_v12, %v6104_v55  ;;  %v6490_v18 = vadd.f32 %v8022_v57, %v8000_v6 }
 0x2e9   :  { %v5329_v11 = vpack.c.bf16 %v4942_v10, %v4941_v35  ;;  %8702 = vmatprep.mubr.msk.bf16.mxu0 %vm1843_vm0, %v9115_v37  ;;  %v8043_v43 = vpop.f32.mrb[141].mxu1  ;;  %v9116_v37 = vld [vmem:[%s12235_s1 + $0x5a8] sm:$0xff]   ;;  %v9117_v35 = vld [vmem:[%s12235_s1 + $0x5b0] sm:$0xff]   ;;  %v6173_v6 = vsel %vm6139_vm13, %v9780_v12, %v6107_v0  ;;  %vm6203_vm15 = vcmp.eq.s32.totalorder %v6170_v58, %v9768_v7 }
 0x2ea   :  { %v8044_v13 = vadd.f32 %v8043_v43, %v8042_v49  ;;  %v8045_v45 = vpop.f32.mrb[142].mxu1  ;;  %vm6206_vm4 = vcmp.eq.s32.totalorder %v6173_v6, %v9768_v7  ;;  %vm11347_vm5 = vmand %vm6188_vm3, %vm6203_vm15 }
 0x2eb   :  { %v8596_v41 = vpop.f32.mrb[252].mxu0  ;;  %8144 = vmatprep.subr.bf16.mxu1 %v5329_v11  ;;  %vm11359_vm8 = vmand %vm6188_vm3, %vm6206_vm4 }
 0x2ec   :  { %v3654_v22 = vpop.f32.mrb[253].mxu0  ;;  %8145 = vmatpush3.bf16.msra.mxu1 %v11197_v23  ;;  %v8046_v23 = vpop.f32.mrb[143].mxu1  ;;  %v4947_v10 = vmax.f32 %v8596_v41, 0.0  ;;  %v6530_v55 = vadd.f32 %v8044_v13, %v6490_v18  ;;  %v9118_v13 = vld [vmem:[%s12235_s1 + $0x5b8] sm:$0xff]   ;;  %vm6333_vm9 = vmor %vm11347_vm5, %vm11337_vm2 }
 0x2ed   :  { %v8597_v19 = vpop.f32.mrb[254].mxu0  ;;  %8146 = vmatprep.subr.bf16.mxu1 %v5330_v31  ;;  %v8064_v28 = vpop.f32.mrb[144].mxu1  ;;  %v4945_v31 = vmax.f32 %v3654_v22, 0.0  ;;  %vm6336_vm10 = vmor %vm11359_vm8, %vm11353_vm7 }
 0x2ee   :  { %v4948_v50 = vmax.f32 %v8597_v19, 0.0  ;;  %v3657_v36 = vpop.f32.mrb[255].mxu0  ;;  %v8065_v57 = vpop.f32.mrb[145].mxu1  ;;  %v9119_v19 = vld [vmem:[%s12235_s1 + $0x5c0] sm:$0xff]   ;;  %vm7688_vm11 = vmpackc.low %vm6333_vm9, %vm6333_vm9 }
 0x2ef   :  { %v4946_v11 = vmax.f32 %v3657_v36, 0.0  ;;  %v8067_v49 = vpop.f32.mrb[146].mxu1  ;;  %v8066_v38 = vadd.f32 %v8065_v57, %v8064_v28  ;;  %vm7690_vm12 = vmpackc.low %vm6336_vm10, %vm6336_vm10 }
 0x2f0   :  { %v5332_v63 = vpack.c.bf16 %v4948_v50, %v4947_v10  ;;  %8703 = vmatmul.mubr.msk.bf16.gmra.mrb[104].mxu0 %vm1843_vm0, %v9116_v37  ;;  %8147 = vmatpush3.bf16.msra.mxu1 %v11194_v1  ;;  %v8068_v17 = vpop.f32.mrb[147].mxu1 }
 0x2f1   :  { %v5331_v41 = vpack.c.bf16 %v4946_v11, %v4945_v31  ;;  %8706 = vmatprep.mubr.msk.bf16.mxu0 %vm1843_vm0, %v9117_v35  ;;  %v11363_v22 = vadd.f32 %v8066_v38, %v6530_v55  ;;  %v9120_v31 = vld [vmem:[%s12235_s1 + $0x5c8] sm:$0xff]  }
 0x2f3   :  { %v8600_v43 = vpop.f32.mrb[0].mxu0  ;;  %8148 = vmatprep.subr.bf16.mxu1 %v5331_v41 }
 0x2f4   :  { %v3670_v37 = vpop.f32.mrb[1].mxu0  ;;  %8149 = vmatpush3.bf16.msra.mxu1 %v11219_v42  ;;  %v4951_v35 = vmax.f32 %v8600_v43, 0.0  ;;  %v9122_v43 = vld [vmem:[%s12235_s1 + $0x5d8] sm:$0xff]  }
 0x2f5   :  { %v8601_v45 = vpop.f32.mrb[2].mxu0  ;;  %8150 = vmatprep.subr.bf16.mxu1 %v5332_v63  ;;  %v4949_v42 = vmax.f32 %v3670_v37, 0.0  ;;  %v9123_v37 = vld [vmem:[%s12235_s1 + $0x5e0] sm:$0xff]  }
 0x2f6   :  { %v4952_v6 = vmax.f32 %v8601_v45, 0.0  ;;  %v3673_v23 = vpop.f32.mrb[3].mxu0 }
 0x2f7   :  { %v4950_v10 = vmax.f32 %v3673_v23, 0.0 }
 0x2f8   :  { %v11380_v50 = vpack.c.bf16 %v4952_v6, %v4951_v35  ;;  %8707 = vmatmul.mubr.msk.bf16.gmra.mrb[108].mxu0 %vm1843_vm0, %v9118_v13  ;;  %8151 = vmatpush3.bf16.msra.mxu1 %v11216_v53  ;;  %v9121_v53 = vld [vmem:[%s12235_s1 + $0x5d0] sm:$0xff]   ;;  %v5478_v13 = vadd.s32 2048, %v9578_v40  ;;  %v5481_v6 = vadd.s32 2432, %v9578_v40 }
 0x2f9   :  { %v11384_v36 = vpack.c.bf16 %v4950_v10, %v4949_v42  ;;  %8710 = vmatprep.mubr.msk.bf16.mxu0 %vm1843_vm0, %v9119_v19 }
 0x2fb   :  { %v8604_v55 = vpop.f32.mrb[4].mxu0  ;;  %7689 = vmatmul.mubr.msk.bf16.vlgmr.msra.gmra.mrb[160].mxu1 %vm7688_vm11, %v12312_v34 }
 0x2fc   :  { %v3686_v28 = vpop.f32.mrb[5].mxu0  ;;  %7691 = vmatprep.mubr.msk.bf16.mxu1 %vm7690_vm12, %v12312_v34  ;;  %v4955_v57 = vmax.f32 %v8604_v55, 0.0 }
 0x2fd   :  { %v8605_v11 = vpop.f32.mrb[6].mxu0  ;;  %v4953_v49 = vmax.f32 %v3686_v28, 0.0  ;;  %v11415_v28 = vshra.s32 %v5478_v13, 8 }
 0x2fe   :  { %v4956_v63 = vmax.f32 %v8605_v11, 0.0  ;;  %v3689_v0 = vpop.f32.mrb[7].mxu0 }
 0x2ff   :  { %v4954_v41 = vmax.f32 %v3689_v0, 0.0  ;;  %vm5544_vm13 = vcmp.eq.s32.totalorder %v11415_v28, 0  ;;  %vm5610_vm15 = vcmp.eq.s32.totalorder %v11415_v28, 1  ;;  %vm5742_vm4 = vcmp.eq.s32.totalorder %v11415_v28, 3 }
 0x300   :  { %v11395_v1 = vpack.c.bf16 %v4956_v63, %v4955_v57  ;;  %8711 = vmatmul.mubr.msk.bf16.gmra.mrb[112].mxu0 %vm1843_vm0, %v9120_v31  ;;  %v11417_v31 = vshra.s32 %v5481_v6, 8  ;;  %v9124_v57 = vld [vmem:[%s12235_s1 + $0x5e8] sm:$0xff]   ;;  %v5578_v13 = vsel %vm5544_vm13, %v9638_v54, 4294967295  ;;  %vm5808_vm7 = vcmp.eq.s32.totalorder %v11415_v28, 4 }
 0x301   :  { %v11398_v38 = vpack.c.bf16 %v4954_v41, %v4953_v49  ;;  %8714 = vmatprep.mubr.msk.bf16.mxu0 %vm1843_vm0, %v9121_v53  ;;  %vm5874_vm9 = vcmp.eq.s32.totalorder %v11415_v28, 5  ;;  %vm5940_vm11 = vcmp.eq.s32.totalorder %v11415_v28, 6  ;;  %vm6006_vm13 = vcmp.eq.s32.totalorder %v11415_v28, 7 }
 0x302   :  { %vm5547_vm14 = vcmp.eq.s32.totalorder %v11417_v31, 0  ;;  %vm5613_vm1 = vcmp.eq.s32.totalorder %v11417_v31, 1  ;;  %vm5679_vm2 = vcmp.eq.s32.totalorder %v11417_v31, 2  ;;  %vm5745_vm5 = vcmp.eq.s32.totalorder %v11417_v31, 3 }
 0x303   :  { %v8608_v17 = vpop.f32.mrb[8].mxu0  ;;  %vm5811_vm8 = vcmp.eq.s32.totalorder %v11417_v31, 4  ;;  %vm5877_vm10 = vcmp.eq.s32.totalorder %v11417_v31, 5  ;;  %vm5943_vm12 = vcmp.eq.s32.totalorder %v11417_v31, 6 }
 0x304   :  { %v3702_v18 = vpop.f32.mrb[9].mxu0  ;;  %v4959_v45 = vmax.f32 %v8608_v17, 0.0 }
 0x305   :  { %v8609_v58 = vpop.f32.mrb[10].mxu0  ;;  %v4957_v23 = vmax.f32 %v3702_v18, 0.0 }
 0x306   :  { %v4960_v19 = vmax.f32 %v8609_v58, 0.0  ;;  %v3705_v35 = vpop.f32.mrb[11].mxu0 }
 0x307   :  { %v4958_v42 = vmax.f32 %v3705_v35, 0.0 }
 0x308   :  { %v11409_v10 = vpack.c.bf16 %v4960_v19, %v4959_v45  ;;  %8715 = vmatmul.mubr.msk.bf16.gmra.mrb[116].mxu0 %vm1843_vm0, %v9122_v43 }
 0x309   :  { %v11412_v55 = vpack.c.bf16 %v4958_v42, %v4957_v23  ;;  %8718 = vmatprep.mubr.msk.bf16.mxu0 %vm1843_vm0, %v9123_v37  ;;  %v5581_v23 = vsel %vm5547_vm14, %v9638_v54, 4294967295  ;;  %vm6009_vm14 = vcmp.eq.s32.totalorder %v11417_v31, 7 }
 0x30b   :  { %v8612_v11 = vpop.f32.mrb[12].mxu0 }
 0x30c   :  { %v3718_v53 = vpop.f32.mrb[13].mxu0  ;;  %v4963_v0 = vmax.f32 %v8612_v11, 0.0 }
 0x30d   :  { %v8613_v63 = vpop.f32.mrb[14].mxu0  ;;  %v4961_v18 = vmax.f32 %v3718_v53, 0.0  ;;  %v5644_v53 = vsel %vm5610_vm15, %v9658_v4, %v5578_v13  ;;  %vm6072_vm15 = vcmp.eq.s32.totalorder %v11415_v28, 8 }
 0x30e   :  { %v4964_v49 = vmax.f32 %v8613_v63, 0.0  ;;  %v3721_v41 = vpop.f32.mrb[15].mxu0  ;;  %v8086_v17 = vpop.f32.mrb[148].mxu1  ;;  %v5647_v63 = vsel %vm5613_vm1, %v9658_v4, %v5581_v23  ;;  %vm6075_vm1 = vcmp.eq.s32.totalorder %v11417_v31, 8 }
 0x30f   :  { %v4962_v43 = vmax.f32 %v3721_v41, 0.0  ;;  %v8087_v58 = vpop.f32.mrb[149].mxu1 }
 0x310   :  { %v11424_v37 = vpack.c.bf16 %v4964_v49, %v4963_v0  ;;  %8719 = vmatmul.mubr.msk.bf16.gmra.mrb[120].mxu0 %vm1843_vm0, %v9124_v57  ;;  %v8088_v45 = vadd.f32 %v8087_v58, %v8086_v17  ;;  %v8089_v19 = vpop.f32.mrb[150].mxu1  ;;  %vm5676_vm0 = vcmp.eq.s32.totalorder %v11415_v28, 2  ;;  %v5713_v58 = vsel %vm5679_vm2, %v9668_v8, %v5647_v63 }
 0x311   :  { %v11429_v35 = vpack.c.bf16 %v4962_v43, %v4961_v18  ;;  %v8090_v6 = vpop.f32.mrb[151].mxu1  ;;  %v5710_v18 = vsel %vm5676_vm0, %v9668_v8, %v5644_v53  ;;  %vm6138_vm0 = vcmp.eq.s32.totalorder %v11415_v28, 9  ;;  %vm6141_vm2 = vcmp.eq.s32.totalorder %v11417_v31, 9 }
 0x312   :  { %v11434_v42 = vadd.f32 %v8088_v45, %v11363_v22  ;;  %v5776_v19 = vsel %vm5742_vm4, %v9683_v15, %v5710_v18  ;;  %v5779_v6 = vsel %vm5745_vm5, %v9683_v15, %v5713_v58  ;;  %vm6271_vm4 = vcmp.eq.s32.totalorder %v11415_v28, %v9796_v20 }
 0x313   :  { %v8616_v11 = vpop.f32.mrb[16].mxu0  ;;  %v5842_v53 = vsel %vm5808_vm7, %v9697_v25, %v5776_v19  ;;  %v5845_v63 = vsel %vm5811_vm8, %v9697_v25, %v5779_v6  ;;  %vm11482_vm8 = vmand %vm6253_vm6, %vm6271_vm4 }
 0x314   :  { %v3734_v57 = vpop.f32.mrb[17].mxu0  ;;  %v4967_v49 = vmax.f32 %v8616_v11, 0.0 }
 0x315   :  { %v8617_v0 = vpop.f32.mrb[18].mxu0  ;;  %v4965_v22 = vmax.f32 %v3734_v57, 0.0 }
 0x316   :  { %v4968_v41 = vmax.f32 %v8617_v0, 0.0  ;;  %v3737_v17 = vpop.f32.mrb[19].mxu0 }
 0x317   :  { %v4966_v43 = vmax.f32 %v3737_v17, 0.0 }
 0x318   :  { %v5342_v13 = vpack.c.bf16 %v4968_v41, %v4967_v49 }
 0x319   :  { %v5341_v45 = vpack.c.bf16 %v4966_v43, %v4965_v22  ;;  %v5908_v22 = vsel %vm5874_vm9, %v9708_v29, %v5842_v53  ;;  %v5911_v43 = vsel %vm5877_vm10, %v9708_v29, %v5845_v63  ;;  %vm6274_vm9 = vcmp.eq.s32.totalorder %v11417_v31, %v9796_v20 }
 0x31a   :  { %v5977_v19 = vsel %vm5943_vm12, %v9727_v44, %v5911_v43  ;;  %vm11502_vm12 = vmand %vm6253_vm6, %vm6274_vm9 }
 0x31b   :  { %v8620_v23 = vpop.f32.mrb[20].mxu0  ;;  %8158 = vmatprep.subr.bf16.mxu1 %v5341_v45  ;;  %v6043_v63 = vsel %vm6009_vm14, %v9744_v51, %v5977_v19 }
 0x31c   :  { %v3750_v11 = vpop.f32.mrb[21].mxu0  ;;  %8159 = vmatpush3.bf16.msra.mxu1 %v11384_v36  ;;  %v4971_v0 = vmax.f32 %v8620_v23, 0.0 }
 0x31d   :  { %v8621_v57 = vpop.f32.mrb[22].mxu0  ;;  %8160 = vmatprep.subr.bf16.mxu1 %v5342_v13  ;;  %v4969_v17 = vmax.f32 %v3750_v11, 0.0  ;;  %v5974_v13 = vsel %vm5940_vm11, %v9727_v44, %v5908_v22 }
 0x31e   :  { %v4972_v49 = vmax.f32 %v8621_v57, 0.0  ;;  %v3753_v41 = vpop.f32.mrb[23].mxu0 }
 0x31f   :  { %v4970_v18 = vmax.f32 %v3753_v41, 0.0 }
 0x320   :  { %v5344_v36 = vpack.c.bf16 %v4972_v49, %v4971_v0  ;;  %8161 = vmatpush3.bf16.msra.mxu1 %v11380_v50  ;;  %v6040_v50 = vsel %vm6006_vm13, %v9744_v51, %v5974_v13 }
 0x321   :  { %v5343_v58 = vpack.c.bf16 %v4970_v18, %v4969_v17  ;;  %v6109_v18 = vsel %vm6075_vm1, %v9760_v60, %v6043_v63 }
 0x323   :  { %v8624_v45 = vpop.f32.mrb[24].mxu0  ;;  %8162 = vmatprep.subr.bf16.mxu1 %v5343_v58  ;;  %v6175_v58 = vsel %vm6141_vm2, %v9780_v12, %v6109_v18 }
 0x324   :  { %v3766_v6 = vpop.f32.mrb[25].mxu0  ;;  %8163 = vmatpush3.bf16.msra.mxu1 %v11398_v38  ;;  %v4975_v11 = vmax.f32 %v8624_v45, 0.0  ;;  %v6106_v38 = vsel %vm6072_vm15, %v9760_v60, %v6040_v50  ;;  %vm6208_vm7 = vcmp.eq.s32.totalorder %v6175_v58, %v9768_v7 }
 0x325   :  { %v8625_v23 = vpop.f32.mrb[26].mxu0  ;;  %8164 = vmatprep.subr.bf16.mxu1 %v5344_v36  ;;  %v4973_v0 = vmax.f32 %v3766_v6, 0.0  ;;  %v6172_v36 = vsel %vm6138_vm0, %v9780_v12, %v6106_v38  ;;  %vm11496_vm11 = vmand %vm6188_vm3, %vm6208_vm7 }
 0x326   :  { %v4976_v53 = vmax.f32 %v8625_v23, 0.0  ;;  %v3769_v57 = vpop.f32.mrb[27].mxu0  ;;  %vm6205_vm5 = vcmp.eq.s32.totalorder %v6172_v36, %v9768_v7  ;;  %vm6338_vm14 = vmor %vm11496_vm11, %vm11502_vm12 }
 0x327   :  { %v4974_v49 = vmax.f32 %v3769_v57, 0.0  ;;  %vm11490_vm10 = vmand %vm6188_vm3, %vm6205_vm5  ;;  %v5483_v57 = vadd.s32 2688, %v9578_v40 }
 0x328   :  { %v5346_v41 = vpack.c.bf16 %v4976_v53, %v4975_v11  ;;  %8165 = vmatpush3.bf16.msra.mxu1 %v11395_v1  ;;  %vm6335_vm13 = vmor %vm11490_vm10, %vm11482_vm8 }
 0x329   :  { %v5345_v17 = vpack.c.bf16 %v4974_v49, %v4973_v0  ;;  %vm7692_vm15 = vmpackc.low %vm6335_vm13, %vm6335_vm13 }
 0x32a   :  { %vm7694_vm1 = vmpackc.low %vm6338_vm14, %vm6338_vm14 }
 0x32b   :  { %v8628_v22 = vpop.f32.mrb[28].mxu0  ;;  %8166 = vmatprep.subr.bf16.mxu1 %v5345_v17 }
 0x32c   :  { %v3782_v43 = vpop.f32.mrb[29].mxu0  ;;  %8167 = vmatpush3.bf16.msra.mxu1 %v11412_v55  ;;  %v4979_v1 = vmax.f32 %v8628_v22, 0.0 }
 0x32d   :  { %v8629_v13 = vpop.f32.mrb[30].mxu0  ;;  %8168 = vmatprep.subr.bf16.mxu1 %v5346_v41  ;;  %v4977_v6 = vmax.f32 %v3782_v43, 0.0 }
 0x32e   :  { %v4980_v45 = vmax.f32 %v8629_v13, 0.0  ;;  %v3785_v19 = vpop.f32.mrb[31].mxu0 }
 0x32f   :  { %v4978_v23 = vmax.f32 %v3785_v19, 0.0 }
 0x330   :  { %v5348_v50 = vpack.c.bf16 %v4980_v45, %v4979_v1  ;;  %8169 = vmatpush3.bf16.msra.mxu1 %v11409_v10 }
 0x331   :  { %v5347_v28 = vpack.c.bf16 %v4978_v23, %v4977_v6 }
 0x333   :  { %v8632_v53 = vpop.f32.mrb[32].mxu0  ;;  %8170 = vmatprep.subr.bf16.mxu1 %v5347_v28  ;;  %v5480_v28 = vadd.s32 2304, %v9578_v40 }
 0x334   :  { %v3798_v31 = vpop.f32.mrb[33].mxu0  ;;  %8171 = vmatpush3.bf16.msra.mxu1 %v11429_v35  ;;  %v4983_v0 = vmax.f32 %v8632_v53, 0.0 }
 0x335   :  { %v8633_v63 = vpop.f32.mrb[34].mxu0  ;;  %8172 = vmatprep.subr.bf16.mxu1 %v5348_v50  ;;  %v4981_v38 = vmax.f32 %v3798_v31, 0.0 }
 0x336   :  { %v4984_v49 = vmax.f32 %v8633_v63, 0.0  ;;  %v3801_v41 = vpop.f32.mrb[35].mxu0 }
 0x337   :  { %v4982_v17 = vmax.f32 %v3801_v41, 0.0  ;;  %v11532_v41 = vshra.s32 %v5480_v28, 8 }
 0x338   :  { %v11515_v18 = vpack.c.bf16 %v4984_v49, %v4983_v0  ;;  %8173 = vmatpush3.bf16.msra.mxu1 %v11424_v37 }
 0x339   :  { %v11518_v35 = vpack.c.bf16 %v4982_v17, %v4981_v38  ;;  %v11534_v38 = vshra.s32 %v5483_v57, 8  ;;  %vm5546_vm0 = vcmp.eq.s32.totalorder %v11532_v41, 0  ;;  %vm5612_vm4 = vcmp.eq.s32.totalorder %v11532_v41, 1 }
 0x33a   :  { %v5580_v28 = vsel %vm5546_vm0, %v9638_v54, 4294967295  ;;  %vm5678_vm7 = vcmp.eq.s32.totalorder %v11532_v41, 2  ;;  %vm5744_vm9 = vcmp.eq.s32.totalorder %v11532_v41, 3  ;;  %vm5810_vm11 = vcmp.eq.s32.totalorder %v11532_v41, 4 }
 0x33b   :  { %v8636_v22 = vpop.f32.mrb[36].mxu0  ;;  %7693 = vmatmul.mubr.msk.bf16.vlgmr.msra.gmra.mrb[164].mxu1 %vm7692_vm15, %v12312_v34  ;;  %vm5549_vm2 = vcmp.eq.s32.totalorder %v11534_v38, 0  ;;  %vm5615_vm5 = vcmp.eq.s32.totalorder %v11534_v38, 1  ;;  %vm5681_vm8 = vcmp.eq.s32.totalorder %v11534_v38, 2  ;;  %vm5747_vm10 = vcmp.eq.s32.totalorder %v11534_v38, 3 }
 0x33c   :  { %v3814_v36 = vpop.f32.mrb[37].mxu0  ;;  %7695 = vmatprep.mubr.msk.bf16.mxu1 %vm7694_vm1, %v12312_v34  ;;  %v4987_v58 = vmax.f32 %v8636_v22, 0.0  ;;  %v5583_v57 = vsel %vm5549_vm2, %v9638_v54, 4294967295  ;;  %vm5813_vm12 = vcmp.eq.s32.totalorder %v11534_v38, 4  ;;  %vm5876_vm13 = vcmp.eq.s32.totalorder %v11532_v41, 5 }
 0x33d   :  { %v8637_v43 = vpop.f32.mrb[38].mxu0  ;;  %v4985_v45 = vmax.f32 %v3814_v36, 0.0  ;;  %vm5879_vm14 = vcmp.eq.s32.totalorder %v11534_v38, 5  ;;  %vm5942_vm15 = vcmp.eq.s32.totalorder %v11532_v41, 6  ;;  %vm5945_vm1 = vcmp.eq.s32.totalorder %v11534_v38, 6 }
 0x33e   :  { %v4988_v13 = vmax.f32 %v8637_v43, 0.0  ;;  %v3817_v1 = vpop.f32.mrb[39].mxu0  ;;  %vm6008_vm0 = vcmp.eq.s32.totalorder %v11532_v41, 7  ;;  %vm6011_vm2 = vcmp.eq.s32.totalorder %v11534_v38, 7 }
 0x33f   :  { %v4986_v19 = vmax.f32 %v3817_v1, 0.0 }
 0x340   :  { %v11522_v6 = vpack.c.bf16 %v4988_v13, %v4987_v58 }
 0x341   :  { %v11524_v23 = vpack.c.bf16 %v4986_v19, %v4985_v45 }
 0x343   :  { %v8640_v37 = vpop.f32.mrb[40].mxu0 }
 0x344   :  { %v3830_v50 = vpop.f32.mrb[41].mxu0  ;;  %v4991_v11 = vmax.f32 %v8640_v37, 0.0 }
 0x345   :  { %v8641_v55 = vpop.f32.mrb[42].mxu0  ;;  %v4989_v31 = vmax.f32 %v3830_v50, 0.0 }
 0x346   :  { %v4992_v10 = vmax.f32 %v8641_v55, 0.0  ;;  %v3833_v53 = vpop.f32.mrb[43].mxu0 }
 0x347   :  { %v4990_v63 = vmax.f32 %v3833_v53, 0.0 }
 0x348   :  { %v11528_v0 = vpack.c.bf16 %v4992_v10, %v4991_v11 }
 0x349   :  { %v11530_v49 = vpack.c.bf16 %v4990_v63, %v4989_v31 }
 0x34b   :  { %v8644_v17 = vpop.f32.mrb[44].mxu0 }
 0x34c   :  { %v3846_v22 = vpop.f32.mrb[45].mxu0  ;;  %v4995_v43 = vmax.f32 %v8644_v17, 0.0  ;;  %v5646_v17 = vsel %vm5612_vm4, %v9658_v4, %v5580_v28  ;;  %vm6074_vm4 = vcmp.eq.s32.totalorder %v11532_v41, 8 }
 0x34d   :  { %v8645_v36 = vpop.f32.mrb[46].mxu0  ;;  %v4993_v45 = vmax.f32 %v3846_v22, 0.0 }
 0x34e   :  { %v4996_v58 = vmax.f32 %v8645_v36, 0.0  ;;  %v3849_v13 = vpop.f32.mrb[47].mxu0  ;;  %v8108_v1 = vpop.f32.mrb[152].mxu1  ;;  %v5649_v36 = vsel %vm5615_vm5, %v9658_v4, %v5583_v57  ;;  %vm6077_vm5 = vcmp.eq.s32.totalorder %v11534_v38, 8 }
 0x34f   :  { %v4994_v19 = vmax.f32 %v3849_v13, 0.0  ;;  %v8109_v37 = vpop.f32.mrb[153].mxu1 }
 0x350   :  { %v11538_v50 = vpack.c.bf16 %v4996_v58, %v4995_v43  ;;  %v8110_v55 = vadd.f32 %v8109_v37, %v8108_v1  ;;  %v8111_v11 = vpop.f32.mrb[154].mxu1  ;;  %v5715_v37 = vsel %vm5681_vm8, %v9668_v8, %v5649_v36  ;;  %vm6143_vm8 = vcmp.eq.s32.totalorder %v11534_v38, 9 }
 0x351   :  { %v11542_v10 = vpack.c.bf16 %v4994_v19, %v4993_v45  ;;  %v8112_v53 = vpop.f32.mrb[155].mxu1  ;;  %v5712_v45 = vsel %vm5678_vm7, %v9668_v8, %v5646_v17  ;;  %vm6140_vm7 = vcmp.eq.s32.totalorder %v11532_v41, 9 }
 0x352   :  { %v11547_v31 = vadd.f32 %v8110_v55, %v11434_v42  ;;  %v5778_v11 = vsel %vm5744_vm9, %v9683_v15, %v5712_v45  ;;  %v5781_v53 = vsel %vm5747_vm10, %v9683_v15, %v5715_v37  ;;  %vm6273_vm9 = vcmp.eq.s32.totalorder %v11532_v41, %v9796_v20 }
 0x353   :  { %v8648_v63 = vpop.f32.mrb[48].mxu0  ;;  %v5844_v17 = vsel %vm5810_vm11, %v9697_v25, %v5778_v11  ;;  %v5847_v36 = vsel %vm5813_vm12, %v9697_v25, %v5781_v53  ;;  %vm11595_vm12 = vmand %vm6253_vm6, %vm6273_vm9 }
 0x354   :  { %v3862_v22 = vpop.f32.mrb[49].mxu0  ;;  %v4999_v58 = vmax.f32 %v8648_v63, 0.0 }
 0x355   :  { %v8649_v43 = vpop.f32.mrb[50].mxu0  ;;  %v4997_v42 = vmax.f32 %v3862_v22, 0.0 }
 0x356   :  { %v5000_v13 = vmax.f32 %v8649_v43, 0.0  ;;  %v3865_v1 = vpop.f32.mrb[51].mxu0 }
 0x357   :  { %v4998_v19 = vmax.f32 %v3865_v1, 0.0 }
 0x358   :  { %v5358_v55 = vpack.c.bf16 %v5000_v13, %v4999_v58 }
 0x359   :  { %v5357_v28 = vpack.c.bf16 %v4998_v19, %v4997_v42  ;;  %v5910_v42 = vsel %vm5876_vm13, %v9708_v29, %v5844_v17  ;;  %v5913_v19 = vsel %vm5879_vm14, %v9708_v29, %v5847_v36  ;;  %vm6276_vm13 = vcmp.eq.s32.totalorder %v11534_v38, %v9796_v20 }
 0x35a   :  { %v5979_v11 = vsel %vm5945_vm1, %v9727_v44, %v5913_v19  ;;  %vm11615_vm1 = vmand %vm6253_vm6, %vm6276_vm13 }
 0x35b   :  { %v8652_v57 = vpop.f32.mrb[52].mxu0  ;;  %8180 = vmatprep.subr.bf16.mxu1 %v5357_v28  ;;  %v6045_v36 = vsel %vm6011_vm2, %v9744_v51, %v5979_v11 }
 0x35c   :  { %v3878_v63 = vpop.f32.mrb[53].mxu0  ;;  %8181 = vmatpush3.bf16.msra.mxu1 %v11518_v35  ;;  %v5003_v43 = vmax.f32 %v8652_v57, 0.0 }
 0x35d   :  { %v8653_v22 = vpop.f32.mrb[54].mxu0  ;;  %8182 = vmatprep.subr.bf16.mxu1 %v5358_v55  ;;  %v5001_v1 = vmax.f32 %v3878_v63, 0.0  ;;  %v5976_v55 = vsel %vm5942_vm15, %v9727_v44, %v5910_v42 }
 0x35e   :  { %v5004_v58 = vmax.f32 %v8653_v22, 0.0  ;;  %v3881_v13 = vpop.f32.mrb[55].mxu0 }
 0x35f   :  { %v5002_v45 = vmax.f32 %v3881_v13, 0.0 }
 0x360   :  { %v5360_v35 = vpack.c.bf16 %v5004_v58, %v5003_v43  ;;  %8183 = vmatpush3.bf16.msra.mxu1 %v11515_v18  ;;  %v6042_v18 = vsel %vm6008_vm0, %v9744_v51, %v5976_v55 }
 0x361   :  { %v5359_v37 = vpack.c.bf16 %v5002_v45, %v5001_v1  ;;  %v6111_v45 = vsel %vm6077_vm5, %v9760_v60, %v6045_v36 }
 0x363   :  { %v8656_v28 = vpop.f32.mrb[56].mxu0  ;;  %8184 = vmatprep.subr.bf16.mxu1 %v5359_v37  ;;  %v6177_v37 = vsel %vm6143_vm8, %v9780_v12, %v6111_v45 }
 0x364   :  { %v3894_v53 = vpop.f32.mrb[57].mxu0  ;;  %8185 = vmatpush3.bf16.msra.mxu1 %v11524_v23  ;;  %v5007_v63 = vmax.f32 %v8656_v28, 0.0  ;;  %v6108_v23 = vsel %vm6074_vm4, %v9760_v60, %v6042_v18  ;;  %vm6210_vm11 = vcmp.eq.s32.totalorder %v6177_v37, %v9768_v7 }
 0x365   :  { %v8657_v57 = vpop.f32.mrb[58].mxu0  ;;  %8186 = vmatprep.subr.bf16.mxu1 %v5360_v35  ;;  %v5005_v43 = vmax.f32 %v3894_v53, 0.0  ;;  %v6174_v35 = vsel %vm6140_vm7, %v9780_v12, %v6108_v23  ;;  %vm11609_vm15 = vmand %vm6188_vm3, %vm6210_vm11 }
 0x366   :  { %v5008_v17 = vmax.f32 %v8657_v57, 0.0  ;;  %v3897_v22 = vpop.f32.mrb[59].mxu0  ;;  %vm6207_vm10 = vcmp.eq.s32.totalorder %v6174_v35, %v9768_v7  ;;  %vm6340_vm2 = vmor %vm11609_vm15, %vm11615_vm1 }
 0x367   :  { %v5006_v58 = vmax.f32 %v3897_v22, 0.0  ;;  %vm11603_vm14 = vmand %vm6188_vm3, %vm6207_vm10  ;;  %v5485_v22 = vadd.s32 2944, %v9578_v40 }
 0x368   :  { %v5362_v13 = vpack.c.bf16 %v5008_v17, %v5007_v63  ;;  %8187 = vmatpush3.bf16.msra.mxu1 %v11522_v6  ;;  %vm6337_vm0 = vmor %vm11603_vm14, %vm11595_vm12 }
 0x369   :  { %v5361_v1 = vpack.c.bf16 %v5006_v58, %v5005_v43  ;;  %vm7696_vm4 = vmpackc.low %vm6337_vm0, %vm6337_vm0 }
 0x36a   :  { %vm7698_vm5 = vmpackc.low %vm6340_vm2, %vm6340_vm2 }
 0x36b   :  { %v8660_v42 = vpop.f32.mrb[60].mxu0  ;;  %8188 = vmatprep.subr.bf16.mxu1 %v5361_v1 }
 0x36c   :  { %v3910_v19 = vpop.f32.mrb[61].mxu0  ;;  %8189 = vmatpush3.bf16.msra.mxu1 %v11530_v49  ;;  %v5011_v6 = vmax.f32 %v8660_v42, 0.0 }
 0x36d   :  { %v8661_v55 = vpop.f32.mrb[62].mxu0  ;;  %8190 = vmatprep.subr.bf16.mxu1 %v5362_v13  ;;  %v5009_v53 = vmax.f32 %v3910_v19, 0.0 }
 0x36e   :  { %v5012_v28 = vmax.f32 %v8661_v55, 0.0  ;;  %v3913_v11 = vpop.f32.mrb[63].mxu0 }
 0x36f   :  { %v5010_v57 = vmax.f32 %v3913_v11, 0.0 }
 0x370   :  { %v5364_v18 = vpack.c.bf16 %v5012_v28, %v5011_v6  ;;  %8191 = vmatpush3.bf16.msra.mxu1 %v11528_v0 }
 0x371   :  { %v5363_v41 = vpack.c.bf16 %v5010_v57, %v5009_v53 }
 0x373   :  { %v8664_v17 = vpop.f32.mrb[64].mxu0  ;;  %8192 = vmatprep.subr.bf16.mxu1 %v5363_v41  ;;  %v5482_v41 = vadd.s32 2560, %v9578_v40 }
 0x374   :  { %v3926_v38 = vpop.f32.mrb[65].mxu0  ;;  %8193 = vmatpush3.bf16.msra.mxu1 %v11542_v10  ;;  %v5015_v43 = vmax.f32 %v8664_v17, 0.0 }
 0x375   :  { %v8665_v36 = vpop.f32.mrb[66].mxu0  ;;  %8194 = vmatprep.subr.bf16.mxu1 %v5364_v18  ;;  %v5013_v23 = vmax.f32 %v3926_v38, 0.0 }
 0x376   :  { %v5016_v58 = vmax.f32 %v8665_v36, 0.0  ;;  %v3929_v13 = vpop.f32.mrb[67].mxu0 }
 0x377   :  { %v5014_v1 = vmax.f32 %v3929_v13, 0.0  ;;  %v11645_v13 = vshra.s32 %v5482_v41, 8 }
 0x378   :  { %v11628_v45 = vpack.c.bf16 %v5016_v58, %v5015_v43  ;;  %8195 = vmatpush3.bf16.msra.mxu1 %v11538_v50 }
 0x379   :  { %v11631_v10 = vpack.c.bf16 %v5014_v1, %v5013_v23  ;;  %v11647_v23 = vshra.s32 %v5485_v22, 8  ;;  %vm5548_vm7 = vcmp.eq.s32.totalorder %v11645_v13, 0  ;;  %vm5614_vm9 = vcmp.eq.s32.totalorder %v11645_v13, 1 }
 0x37a   :  { %v5582_v41 = vsel %vm5548_vm7, %v9638_v54, 4294967295  ;;  %vm5680_vm11 = vcmp.eq.s32.totalorder %v11645_v13, 2  ;;  %vm5746_vm13 = vcmp.eq.s32.totalorder %v11645_v13, 3  ;;  %vm5812_vm15 = vcmp.eq.s32.totalorder %v11645_v13, 4 }
 0x37b   :  { %v8668_v42 = vpop.f32.mrb[68].mxu0  ;;  %7697 = vmatmul.mubr.msk.bf16.vlgmr.msra.gmra.mrb[168].mxu1 %vm7696_vm4, %v12312_v34  ;;  %vm5551_vm8 = vcmp.eq.s32.totalorder %v11647_v23, 0  ;;  %vm5617_vm10 = vcmp.eq.s32.totalorder %v11647_v23, 1  ;;  %vm5683_vm12 = vcmp.eq.s32.totalorder %v11647_v23, 2  ;;  %vm5749_vm14 = vcmp.eq.s32.totalorder %v11647_v23, 3 }
 0x37c   :  { %v3942_v35 = vpop.f32.mrb[69].mxu0  ;;  %7699 = vmatprep.mubr.msk.bf16.mxu1 %vm7698_vm5, %v12312_v34  ;;  %v5019_v37 = vmax.f32 %v8668_v42, 0.0  ;;  %v5585_v22 = vsel %vm5551_vm8, %v9638_v54, 4294967295  ;;  %vm5815_vm1 = vcmp.eq.s32.totalorder %v11647_v23, 4  ;;  %vm5878_vm0 = vcmp.eq.s32.totalorder %v11645_v13, 5 }
 0x37d   :  { %v8669_v19 = vpop.f32.mrb[70].mxu0  ;;  %v5017_v28 = vmax.f32 %v3942_v35, 0.0  ;;  %vm5881_vm2 = vcmp.eq.s32.totalorder %v11647_v23, 5  ;;  %vm5944_vm4 = vcmp.eq.s32.totalorder %v11645_v13, 6  ;;  %vm5947_vm5 = vcmp.eq.s32.totalorder %v11647_v23, 6 }
 0x37e   :  { %v5020_v55 = vmax.f32 %v8669_v19, 0.0  ;;  %v3945_v6 = vpop.f32.mrb[71].mxu0  ;;  %vm6010_vm7 = vcmp.eq.s32.totalorder %v11645_v13, 7  ;;  %vm6013_vm8 = vcmp.eq.s32.totalorder %v11647_v23, 7 }
 0x37f   :  { %v5018_v11 = vmax.f32 %v3945_v6, 0.0 }
 0x380   :  { %v11635_v53 = vpack.c.bf16 %v5020_v55, %v5019_v37 }
 0x381   :  { %v11637_v57 = vpack.c.bf16 %v5018_v11, %v5017_v28 }
 0x383   :  { %v8672_v50 = vpop.f32.mrb[72].mxu0 }
 0x384   :  { %v3958_v18 = vpop.f32.mrb[73].mxu0  ;;  %v5023_v63 = vmax.f32 %v8672_v50, 0.0 }
 0x385   :  { %v8673_v49 = vpop.f32.mrb[74].mxu0  ;;  %v5021_v38 = vmax.f32 %v3958_v18, 0.0 }
 0x386   :  { %v5024_v0 = vmax.f32 %v8673_v49, 0.0  ;;  %v3961_v17 = vpop.f32.mrb[75].mxu0 }
 0x387   :  { %v5022_v36 = vmax.f32 %v3961_v17, 0.0 }
 0x388   :  { %v11641_v43 = vpack.c.bf16 %v5024_v0, %v5023_v63 }
 0x389   :  { %v11643_v58 = vpack.c.bf16 %v5022_v36, %v5021_v38 }
 0x38b   :  { %v8676_v1 = vpop.f32.mrb[76].mxu0 }
 0x38c   :  { %v3974_v42 = vpop.f32.mrb[77].mxu0  ;;  %v5027_v19 = vmax.f32 %v8676_v1, 0.0  ;;  %v5648_v1 = vsel %vm5614_vm9, %v9658_v4, %v5582_v41  ;;  %vm6076_vm9 = vcmp.eq.s32.totalorder %v11645_v13, 8 }
 0x38d   :  { %v8677_v35 = vpop.f32.mrb[78].mxu0  ;;  %v5025_v28 = vmax.f32 %v3974_v42, 0.0 }
 0x38e   :  { %v5028_v37 = vmax.f32 %v8677_v35, 0.0  ;;  %v3977_v55 = vpop.f32.mrb[79].mxu0  ;;  %v8130_v6 = vpop.f32.mrb[156].mxu1  ;;  %v5651_v35 = vsel %vm5617_vm10, %v9658_v4, %v5585_v22  ;;  %vm6079_vm10 = vcmp.eq.s32.totalorder %v11647_v23, 8 }
 0x38f   :  { %v5026_v11 = vmax.f32 %v3977_v55, 0.0  ;;  %v8131_v50 = vpop.f32.mrb[157].mxu1 }
 0x390   :  { %v11651_v18 = vpack.c.bf16 %v5028_v37, %v5027_v19  ;;  %v8132_v49 = vadd.f32 %v8131_v50, %v8130_v6  ;;  %v8133_v63 = vpop.f32.mrb[158].mxu1  ;;  %v5717_v50 = vsel %vm5683_vm12, %v9668_v8, %v5651_v35  ;;  %vm6145_vm12 = vcmp.eq.s32.totalorder %v11647_v23, 9 }
 0x391   :  { %v11655_v0 = vpack.c.bf16 %v5026_v11, %v5025_v28  ;;  %v8134_v17 = vpop.f32.mrb[159].mxu1  ;;  %v5714_v28 = vsel %vm5680_vm11, %v9668_v8, %v5648_v1  ;;  %vm6142_vm11 = vcmp.eq.s32.totalorder %v11645_v13, 9 }
 0x392   :  { %v11660_v38 = vadd.f32 %v8132_v49, %v11547_v31  ;;  %v5780_v63 = vsel %vm5746_vm13, %v9683_v15, %v5714_v28  ;;  %v5783_v17 = vsel %vm5749_vm14, %v9683_v15, %v5717_v50  ;;  %vm6275_vm13 = vcmp.eq.s32.totalorder %v11645_v13, %v9796_v20 }
 0x393   :  { %v8680_v36 = vpop.f32.mrb[80].mxu0  ;;  %v5846_v1 = vsel %vm5812_vm15, %v9697_v25, %v5780_v63  ;;  %v5849_v35 = vsel %vm5815_vm1, %v9697_v25, %v5783_v17  ;;  %vm11708_vm1 = vmand %vm6253_vm6, %vm6275_vm13 }
 0x394   :  { %v3990_v42 = vpop.f32.mrb[81].mxu0  ;;  %v5031_v37 = vmax.f32 %v8680_v36, 0.0 }
 0x395   :  { %v8681_v19 = vpop.f32.mrb[82].mxu0  ;;  %v5029_v31 = vmax.f32 %v3990_v42, 0.0 }
 0x396   :  { %v5032_v55 = vmax.f32 %v8681_v19, 0.0  ;;  %v3993_v6 = vpop.f32.mrb[83].mxu0 }
 0x397   :  { %v5030_v11 = vmax.f32 %v3993_v6, 0.0 }
 0x398   :  { %v5374_v49 = vpack.c.bf16 %v5032_v55, %v5031_v37 }
 0x399   :  { %v5373_v41 = vpack.c.bf16 %v5030_v11, %v5029_v31  ;;  %v5912_v31 = vsel %vm5878_vm0, %v9708_v29, %v5846_v1  ;;  %v5915_v11 = vsel %vm5881_vm2, %v9708_v29, %v5849_v35  ;;  %vm6278_vm0 = vcmp.eq.s32.totalorder %v11647_v23, %v9796_v20 }
 0x39a   :  { %v5981_v63 = vsel %vm5947_vm5, %v9727_v44, %v5915_v11  ;;  %vm11728_vm5 = vmand %vm6253_vm6, %vm6278_vm0 }
 0x39b   :  { %v8684_v22 = vpop.f32.mrb[84].mxu0  ;;  %8202 = vmatprep.subr.bf16.mxu1 %v5373_v41  ;;  %v6047_v35 = vsel %vm6013_vm8, %v9744_v51, %v5981_v63 }
 0x39c   :  { %v4006_v36 = vpop.f32.mrb[85].mxu0  ;;  %8203 = vmatpush3.bf16.msra.mxu1 %v11631_v10  ;;  %v5035_v19 = vmax.f32 %v8684_v22, 0.0 }
 0x39d   :  { %v8685_v42 = vpop.f32.mrb[86].mxu0  ;;  %8204 = vmatprep.subr.bf16.mxu1 %v5374_v49  ;;  %v5033_v6 = vmax.f32 %v4006_v36, 0.0  ;;  %v5978_v49 = vsel %vm5944_vm4, %v9727_v44, %v5912_v31 }
 0x39e   :  { %v5036_v37 = vmax.f32 %v8685_v42, 0.0  ;;  %v4009_v55 = vpop.f32.mrb[87].mxu0 }
 0x39f   :  { %v5034_v28 = vmax.f32 %v4009_v55, 0.0 }
 0x3a0   :  { %v5376_v10 = vpack.c.bf16 %v5036_v37, %v5035_v19  ;;  %8205 = vmatpush3.bf16.msra.mxu1 %v11628_v45  ;;  %v6044_v45 = vsel %vm6010_vm7, %v9744_v51, %v5978_v49 }
 0x3a1   :  { %v5375_v50 = vpack.c.bf16 %v5034_v28, %v5033_v6  ;;  %v6113_v28 = vsel %vm6079_vm10, %v9760_v60, %v6047_v35 }
 0x3a3   :  { %v8688_v41 = vpop.f32.mrb[88].mxu0  ;;  %8206 = vmatprep.subr.bf16.mxu1 %v5375_v50  ;;  %v6179_v50 = vsel %vm6145_vm12, %v9780_v12, %v6113_v28 }
 0x3a4   :  { %v4022_v17 = vpop.f32.mrb[89].mxu0  ;;  %8207 = vmatpush3.bf16.msra.mxu1 %v11637_v57  ;;  %v5039_v36 = vmax.f32 %v8688_v41, 0.0  ;;  %v6110_v57 = vsel %vm6076_vm9, %v9760_v60, %v6044_v45  ;;  %vm6212_vm15 = vcmp.eq.s32.totalorder %v6179_v50, %v9768_v7 }
 0x3a5   :  { %v8689_v22 = vpop.f32.mrb[90].mxu0  ;;  %8208 = vmatprep.subr.bf16.mxu1 %v5376_v10  ;;  %v5037_v19 = vmax.f32 %v4022_v17, 0.0  ;;  %v6176_v10 = vsel %vm6142_vm11, %v9780_v12, %v6110_v57  ;;  %vm11722_vm4 = vmand %vm6188_vm3, %vm6212_vm15 }
 0x3a6   :  { %v5040_v1 = vmax.f32 %v8689_v22, 0.0  ;;  %v4025_v42 = vpop.f32.mrb[91].mxu0  ;;  %vm6209_vm14 = vcmp.eq.s32.totalorder %v6176_v10, %v9768_v7  ;;  %vm6342_vm8 = vmor %vm11722_vm4, %vm11728_vm5 }
 0x3a7   :  { %v5038_v37 = vmax.f32 %v4025_v42, 0.0  ;;  %vm11716_vm2 = vmand %vm6188_vm3, %vm6209_vm14 }
 0x3a8   :  { %v5378_v55 = vpack.c.bf16 %v5040_v1, %v5039_v36  ;;  %8209 = vmatpush3.bf16.msra.mxu1 %v11635_v53  ;;  %vm6339_vm7 = vmor %vm11716_vm2, %vm11708_vm1  ;;  %v5487_v36 = vadd.s32 3200, %v9578_v40 }
 0x3a9   :  { %v5377_v6 = vpack.c.bf16 %v5038_v37, %v5037_v19  ;;  %vm7700_vm9 = vmpackc.low %vm6339_vm7, %vm6339_vm7 }
 0x3aa   :  { %vm7702_vm10 = vmpackc.low %vm6342_vm8, %vm6342_vm8 }
 0x3ab   :  { %v8692_v31 = vpop.f32.mrb[92].mxu0  ;;  %8210 = vmatprep.subr.bf16.mxu1 %v5377_v6 }
 0x3ac   :  { %v4038_v11 = vpop.f32.mrb[93].mxu0  ;;  %8211 = vmatpush3.bf16.msra.mxu1 %v11643_v58  ;;  %v5043_v53 = vmax.f32 %v8692_v31, 0.0  ;;  %v5484_v58 = vadd.s32 2816, %v9578_v40 }
 0x3ad   :  { %v8693_v49 = vpop.f32.mrb[94].mxu0  ;;  %8212 = vmatprep.subr.bf16.mxu1 %v5378_v55  ;;  %v5041_v17 = vmax.f32 %v4038_v11, 0.0 }
 0x3ae   :  { %v5044_v41 = vmax.f32 %v8693_v49, 0.0  ;;  %v4041_v63 = vpop.f32.mrb[95].mxu0 }
 0x3af   :  { %v5042_v22 = vmax.f32 %v4041_v63, 0.0 }
 0x3b0   :  { %v5380_v45 = vpack.c.bf16 %v5044_v41, %v5043_v53  ;;  %8213 = vmatpush3.bf16.msra.mxu1 %v11641_v43 }
 0x3b1   :  { %v5379_v13 = vpack.c.bf16 %v5042_v22, %v5041_v17 }
 0x3b3   :  { %v8696_v1 = vpop.f32.mrb[96].mxu0  ;;  %8214 = vmatprep.subr.bf16.mxu1 %v5379_v13 }
 0x3b4   :  { %v4054_v23 = vpop.f32.mrb[97].mxu0  ;;  %8215 = vmatpush3.bf16.msra.mxu1 %v11655_v0  ;;  %v5047_v19 = vmax.f32 %v8696_v1, 0.0 }
 0x3b5   :  { %v8697_v35 = vpop.f32.mrb[98].mxu0  ;;  %8216 = vmatprep.subr.bf16.mxu1 %v5380_v45  ;;  %v5045_v57 = vmax.f32 %v4054_v23, 0.0 }
 0x3b6   :  { %v5048_v37 = vmax.f32 %v8697_v35, 0.0  ;;  %v4057_v55 = vpop.f32.mrb[99].mxu0 }
 0x3b7   :  { %v5046_v6 = vmax.f32 %v4057_v55, 0.0 }
 0x3b8   :  { %v11741_v28 = vpack.c.bf16 %v5048_v37, %v5047_v19  ;;  %8217 = vmatpush3.bf16.msra.mxu1 %v11651_v18  ;;  %v11756_v37 = vshra.s32 %v5484_v58, 8 }
 0x3b9   :  { %v11744_v0 = vpack.c.bf16 %v5046_v6, %v5045_v57  ;;  %v11760_v57 = vshra.s32 %v5487_v36, 8 }
 0x3ba   :  { %vm5550_vm11 = vcmp.eq.s32.totalorder %v11756_v37, 0  ;;  %vm5616_vm13 = vcmp.eq.s32.totalorder %v11756_v37, 1  ;;  %vm5682_vm15 = vcmp.eq.s32.totalorder %v11756_v37, 2  ;;  %vm5748_vm0 = vcmp.eq.s32.totalorder %v11756_v37, 3 }
 0x3bb   :  { %v8700_v31 = vpop.f32.mrb[100].mxu0  ;;  %7701 = vmatmul.mubr.msk.bf16.vlgmr.msra.gmra.mrb[172].mxu1 %vm7700_vm9, %v12312_v34  ;;  %vm5553_vm12 = vcmp.eq.s32.totalorder %v11760_v57, 0  ;;  %vm5619_vm14 = vcmp.eq.s32.totalorder %v11760_v57, 1  ;;  %vm5685_vm1 = vcmp.eq.s32.totalorder %v11760_v57, 2  ;;  %vm5751_vm2 = vcmp.eq.s32.totalorder %v11760_v57, 3 }
 0x3bc   :  { %v4070_v10 = vpop.f32.mrb[101].mxu0  ;;  %7703 = vmatprep.mubr.msk.bf16.mxu1 %vm7702_vm10, %v12312_v34  ;;  %v5051_v50 = vmax.f32 %v8700_v31, 0.0  ;;  %vm5814_vm4 = vcmp.eq.s32.totalorder %v11756_v37, 4  ;;  %vm5817_vm5 = vcmp.eq.s32.totalorder %v11760_v57, 4  ;;  %vm5880_vm7 = vcmp.eq.s32.totalorder %v11756_v37, 5 }
 0x3bd   :  { %v8701_v11 = vpop.f32.mrb[102].mxu0  ;;  %v5049_v41 = vmax.f32 %v4070_v10, 0.0  ;;  %vm5883_vm8 = vcmp.eq.s32.totalorder %v11760_v57, 5  ;;  %vm5946_vm9 = vcmp.eq.s32.totalorder %v11756_v37, 6  ;;  %vm5949_vm10 = vcmp.eq.s32.totalorder %v11760_v57, 6 }
 0x3be   :  { %v5052_v49 = vmax.f32 %v8701_v11, 0.0  ;;  %v4073_v53 = vpop.f32.mrb[103].mxu0 }
 0x3bf   :  { %v5050_v63 = vmax.f32 %v4073_v53, 0.0 }
 0x3c0   :  { %v11748_v17 = vpack.c.bf16 %v5052_v49, %v5051_v50 }
 0x3c1   :  { %v11750_v22 = vpack.c.bf16 %v5050_v63, %v5049_v41 }
 0x3c3   :  { %v8704_v18 = vpop.f32.mrb[104].mxu0 }
 0x3c4   :  { %v4086_v45 = vpop.f32.mrb[105].mxu0  ;;  %v5055_v43 = vmax.f32 %v8704_v18, 0.0 }
 0x3c5   :  { %v8705_v13 = vpop.f32.mrb[106].mxu0  ;;  %v5053_v23 = vmax.f32 %v4086_v45, 0.0  ;;  %v5584_v45 = vsel %vm5550_vm11, %v9638_v54, 4294967295  ;;  %vm6012_vm11 = vcmp.eq.s32.totalorder %v11756_v37, 7 }
 0x3c6   :  { %v5056_v1 = vmax.f32 %v8705_v13, 0.0  ;;  %v4089_v42 = vpop.f32.mrb[107].mxu0 }
 0x3c7   :  { %v5054_v35 = vmax.f32 %v4089_v42, 0.0 }
 0x3c8   :  { %v11754_v19 = vpack.c.bf16 %v5056_v1, %v5055_v43  ;;  %v5587_v43 = vsel %vm5553_vm12, %v9638_v54, 4294967295  ;;  %vm6015_vm12 = vcmp.eq.s32.totalorder %v11760_v57, 7 }
 0x3c9   :  { %v11758_v55 = vpack.c.bf16 %v5054_v35, %v5053_v23  ;;  %v5650_v35 = vsel %vm5616_vm13, %v9658_v4, %v5584_v45  ;;  %vm6078_vm13 = vcmp.eq.s32.totalorder %v11756_v37, 8 }
 0x3cb   :  { %v8708_v6 = vpop.f32.mrb[108].mxu0 }
 0x3cc   :  { %v4102_v31 = vpop.f32.mrb[109].mxu0  ;;  %v5059_v11 = vmax.f32 %v8708_v6, 0.0 }
 0x3cd   :  { %v8709_v10 = vpop.f32.mrb[110].mxu0  ;;  %v5057_v41 = vmax.f32 %v4102_v31, 0.0  ;;  %v5653_v31 = vsel %vm5619_vm14, %v9658_v4, %v5587_v43  ;;  %vm6081_vm14 = vcmp.eq.s32.totalorder %v11760_v57, 8 }
 0x3ce   :  { %v5060_v50 = vmax.f32 %v8709_v10, 0.0  ;;  %v4105_v49 = vpop.f32.mrb[111].mxu0  ;;  %v8152_v53 = vpop.f32.mrb[160].mxu1 }
 0x3cf   :  { %v5058_v63 = vmax.f32 %v4105_v49, 0.0  ;;  %v8153_v18 = vpop.f32.mrb[161].mxu1 }
 0x3d0   :  { %v11766_v58 = vpack.c.bf16 %v5060_v50, %v5059_v11  ;;  %v8154_v13 = vadd.f32 %v8153_v18, %v8152_v53  ;;  %v8155_v36 = vpop.f32.mrb[162].mxu1  ;;  %v5716_v50 = vsel %vm5682_vm15, %v9668_v8, %v5650_v35  ;;  %vm6144_vm15 = vcmp.eq.s32.totalorder %v11756_v37, 9 }
 0x3d1   :  { %v11770_v1 = vpack.c.bf16 %v5058_v63, %v5057_v41  ;;  %v8156_v42 = vpop.f32.mrb[163].mxu1 }
 0x3d2   :  { %v11773_v23 = vadd.f32 %v8154_v13, %v11660_v38  ;;  %v5719_v38 = vsel %vm5685_vm1, %v9668_v8, %v5653_v31  ;;  %v5782_v13 = vsel %vm5748_vm0, %v9683_v15, %v5716_v50  ;;  %vm6147_vm1 = vcmp.eq.s32.totalorder %v11760_v57, 9 }
 0x3d3   :  { %v8712_v6 = vpop.f32.mrb[112].mxu0  ;;  %v5785_v43 = vsel %vm5751_vm2, %v9683_v15, %v5719_v38  ;;  %v5848_v35 = vsel %vm5814_vm4, %v9697_v25, %v5782_v13  ;;  %vm6277_vm0 = vcmp.eq.s32.totalorder %v11756_v37, %v9796_v20 }
 0x3d4   :  { %v4118_v10 = vpop.f32.mrb[113].mxu0  ;;  %v5063_v49 = vmax.f32 %v8712_v6, 0.0  ;;  %v5851_v31 = vsel %vm5817_vm5, %v9697_v25, %v5785_v43 }
 0x3d5   :  { %v8713_v11 = vpop.f32.mrb[114].mxu0  ;;  %v5061_v63 = vmax.f32 %v4118_v10, 0.0 }
 0x3d6   :  { %v5064_v53 = vmax.f32 %v8713_v11, 0.0  ;;  %v4121_v41 = vpop.f32.mrb[115].mxu0 }
 0x3d7   :  { %v5062_v18 = vmax.f32 %v4121_v41, 0.0 }
 0x3d8   :  { %v5390_v45 = vpack.c.bf16 %v5064_v53, %v5063_v49  ;;  %v5914_v53 = vsel %vm5880_vm7, %v9708_v29, %v5848_v35 }
 0x3d9   :  { %v5389_v36 = vpack.c.bf16 %v5062_v18, %v5061_v63  ;;  %v5917_v63 = vsel %vm5883_vm8, %v9708_v29, %v5851_v31  ;;  %v5980_v13 = vsel %vm5946_vm9, %v9727_v44, %v5914_v53  ;;  %vm11829_vm8 = vmand %vm6253_vm6, %vm6277_vm0  ;;  %vm6280_vm9 = vcmp.eq.s32.totalorder %v11760_v57, %v9796_v20 }
 0x3da   :  { %v6046_v35 = vsel %vm6012_vm11, %v9744_v51, %v5980_v13 }
 0x3db   :  { %v8716_v42 = vpop.f32.mrb[116].mxu0  ;;  %8224 = vmatprep.subr.bf16.mxu1 %v5389_v36 }
 0x3dc   :  { %v4134_v6 = vpop.f32.mrb[117].mxu0  ;;  %8225 = vmatpush3.bf16.msra.mxu1 %v11744_v0  ;;  %v5067_v11 = vmax.f32 %v8716_v42, 0.0 }
 0x3dd   :  { %v8717_v10 = vpop.f32.mrb[118].mxu0  ;;  %8226 = vmatprep.subr.bf16.mxu1 %v5390_v45  ;;  %v5065_v41 = vmax.f32 %v4134_v6, 0.0  ;;  %v5983_v45 = vsel %vm5949_vm10, %v9727_v44, %v5917_v63  ;;  %v5486_v6 = vadd.s32 3072, %v9578_v40 }
 0x3de   :  { %v5068_v50 = vmax.f32 %v8717_v10, 0.0  ;;  %v4137_v49 = vpop.f32.mrb[119].mxu0 }
 0x3df   :  { %v5066_v38 = vmax.f32 %v4137_v49, 0.0 }
 0x3e0   :  { %v5392_v0 = vpack.c.bf16 %v5068_v50, %v5067_v11  ;;  %8227 = vmatpush3.bf16.msra.mxu1 %v11741_v28  ;;  %v6049_v28 = vsel %vm6015_vm12, %v9744_v51, %v5983_v45  ;;  %v5489_v50 = vadd.s32 3456, %v9578_v40  ;;  %v12394_v45 = vld [vmem:[#allocation6_spill] sm:$0xff] }
 0x3e1   :  { %v5391_v18 = vpack.c.bf16 %v5066_v38, %v5065_v41  ;;  %v6112_v41 = vsel %vm6078_vm13, %v9760_v60, %v6046_v35  ;;  %v6115_v63 = vsel %vm6081_vm14, %v9760_v60, %v6049_v28  ;;  %vm11854_vm14 = vmand %vm6253_vm6, %vm6280_vm9 }
 0x3e2   :  { %v6178_v13 = vsel %vm6144_vm15, %v9780_v12, %v6112_v41 }
 0x3e3   :  { %v8720_v36 = vpop.f32.mrb[120].mxu0  ;;  %8228 = vmatprep.subr.bf16.mxu1 %v5391_v18  ;;  %v11815_v18 = vshra.s32 %v5489_v50, 8  ;;  %vm6211_vm4 = vcmp.eq.s32.totalorder %v6178_v13, %v9768_v7 }
 0x3e4   :  { %v4150_v43 = vpop.f32.mrb[121].mxu0  ;;  %8229 = vmatpush3.bf16.msra.mxu1 %v11750_v22  ;;  %v5071_v31 = vmax.f32 %v8720_v36, 0.0  ;;  %vm11840_vm11 = vmand %vm6188_vm3, %vm6211_vm4 }
 0x3e5   :  { %v8721_v42 = vpop.f32.mrb[122].mxu0  ;;  %8230 = vmatprep.subr.bf16.mxu1 %v5392_v0  ;;  %v5069_v49 = vmax.f32 %v4150_v43, 0.0  ;;  %v11813_v0 = vshra.s32 %v5486_v6, 8  ;;  %vm5555_vm5 = vcmp.eq.s32.totalorder %v11815_v18, 0  ;;  %vm5621_vm12 = vcmp.eq.s32.totalorder %v11815_v18, 1  ;;  %vm6341_vm0 = vmor %vm11840_vm11, %vm11829_vm8 }
 0x3e6   :  { %v5072_v10 = vmax.f32 %v8721_v42, 0.0  ;;  %v4153_v11 = vpop.f32.mrb[123].mxu0 }
 0x3e7   :  { %v5070_v53 = vmax.f32 %v4153_v11, 0.0  ;;  %vm5552_vm2 = vcmp.eq.s32.totalorder %v11813_v0, 0  ;;  %vm5618_vm10 = vcmp.eq.s32.totalorder %v11813_v0, 1  ;;  %vm5684_vm15 = vcmp.eq.s32.totalorder %v11813_v0, 2 }
 0x3e8   :  { %v5394_v22 = vpack.c.bf16 %v5072_v10, %v5071_v31  ;;  %8231 = vmatpush3.bf16.msra.mxu1 %v11748_v17  ;;  %v6181_v17 = vsel %vm6147_vm1, %v9780_v12, %v6115_v63  ;;  %v5586_v37 = vsel %vm5552_vm2, %v9638_v54, 4294967295  ;;  %vm5687_vm1 = vcmp.eq.s32.totalorder %v11815_v18, 2 }
 0x3e9   :  { %v5393_v38 = vpack.c.bf16 %v5070_v53, %v5069_v49  ;;  %vm6214_vm7 = vcmp.eq.s32.totalorder %v6181_v17, %v9768_v7  ;;  %v5652_v36 = vsel %vm5618_vm10, %v9658_v4, %v5586_v37  ;;  %vm5750_vm4 = vcmp.eq.s32.totalorder %v11813_v0, 3 }
 0x3ea   :  { %vm11848_vm13 = vmand %vm6188_vm3, %vm6214_vm7  ;;  %v5718_v42 = vsel %vm5684_vm15, %v9668_v8, %v5652_v36  ;;  %vm5816_vm8 = vcmp.eq.s32.totalorder %v11813_v0, 4  ;;  %vm5819_vm10 = vcmp.eq.s32.totalorder %v11815_v18, 4  ;;  %vm5882_vm11 = vcmp.eq.s32.totalorder %v11813_v0, 5  ;;  %v12396_v36 = vld [vmem:[#allocation5_spill] sm:$0xff] }
 0x3eb   :  { %8232 = vmatprep.subr.bf16.mxu1 %v5393_v38  ;;  %vm6344_vm2 = vmor %vm11848_vm13, %vm11854_vm14  ;;  %vm5948_vm13 = vcmp.eq.s32.totalorder %v11813_v0, 6  ;;  %vm5951_vm14 = vcmp.eq.s32.totalorder %v11815_v18, 6  ;;  %vm6014_vm15 = vcmp.eq.s32.totalorder %v11813_v0, 7  ;;  %v5488_v31 = vadd.s32 3328, %v9578_v40 }
 0x3ec   :  { %8233 = vmatpush3.bf16.msra.mxu1 %v11758_v55  ;;  %vm7704_vm7 = vmpackc.low %vm6341_vm0, %vm6341_vm0  ;;  %vm6080_vm0 = vcmp.eq.s32.totalorder %v11813_v0, 8  ;;  %v5491_v10 = vadd.s32 3712, %v9578_v40 }
 0x3ed   :  { %8234 = vmatprep.subr.bf16.mxu1 %v5394_v22  ;;  %vm7706_vm9 = vmpackc.low %vm6344_vm2, %vm6344_vm2  ;;  %vm6083_vm2 = vcmp.eq.s32.totalorder %v11815_v18, 8 }
 0x3ee   :  { %v11916_v50 = vshra.s32 %v5491_v10, 8 }
 0x3f0   :  { %8235 = vmatpush3.bf16.msra.mxu1 %v11754_v19  ;;  %v5589_v19 = vsel %vm5555_vm5, %v9638_v54, 4294967295  ;;  %vm5753_vm5 = vcmp.eq.s32.totalorder %v11815_v18, 3 }
 0x3f1   :  { %8236 = vmatprep.subr.bf16.mxu1 %v10417_v62  ;;  %v5655_v43 = vsel %vm5621_vm12, %v9658_v4, %v5589_v19  ;;  %vm5885_vm12 = vcmp.eq.s32.totalorder %v11815_v18, 5  ;;  %v12395_v19 = vld [vmem:[#allocation13_spill] sm:$0xff] }
 0x3f4   :  { %8237 = vmatpush3.bf16.msra.mxu1 %v11770_v1  ;;  %v5721_v1 = vsel %vm5687_vm1, %v9668_v8, %v5655_v43  ;;  %vm6017_vm1 = vcmp.eq.s32.totalorder %v11815_v18, 7 }
 0x3f5   :  { %8238 = vmatprep.subr.bf16.mxu1 %v10415_v48  ;;  %v5784_v48 = vsel %vm5750_vm4, %v9683_v15, %v5718_v42  ;;  %v5787_v35 = vsel %vm5753_vm5, %v9683_v15, %v5721_v1  ;;  %vm6146_vm4 = vcmp.eq.s32.totalorder %v11813_v0, 9  ;;  %vm6149_vm5 = vcmp.eq.s32.totalorder %v11815_v18, 9  ;;  %v12397_v42 = vld [vmem:[#allocation16_spill] sm:$0xff] }
 0x3f8   :  { %8239 = vmatpush3.bf16.msra.mxu1 %v11766_v58  ;;  %v5850_v58 = vsel %vm5816_vm8, %v9697_v25, %v5784_v48 }
 0x3f9   :  { %8246 = vmatprep.subr.bf16.mxu1 %v10565_v46  ;;  %v5853_v46 = vsel %vm5819_vm10, %v9697_v25, %v5787_v35  ;;  %v5916_v28 = vsel %vm5882_vm11, %v9708_v29, %v5850_v58  ;;  %vm5557_vm10 = vcmp.eq.s32.totalorder %v11916_v50, 0  ;;  %v12398_v35 = vld [vmem:[#allocation8_spill] sm:$0xff]  ;;  %v12399_v58 = vld [vmem:[#allocation15_spill] sm:$0xff] }
 0x3fa   :  { %v5982_v6 = vsel %vm5948_vm13, %v9727_v44, %v5916_v28  ;;  %vm6282_vm13 = vcmp.eq.s32.totalorder %v11815_v18, %v9796_v20  ;;  %v5591_v63 = vsel %vm5557_vm10, %v9638_v54, 4294967295  ;;  %vm5755_vm10 = vcmp.eq.s32.totalorder %v11916_v50, 3 }
 0x3fb   :  { %7705 = vmatmul.mubr.msk.bf16.vlgmr.msra.gmra.mrb[176].mxu1 %vm7704_vm7, %v12312_v34  ;;  %vm6279_vm7 = vcmp.eq.s32.totalorder %v11813_v0, %v9796_v20  ;;  %v5490_v28 = vadd.s32 3584, %v9578_v40 }
 0x3fc   :  { %8247 = vmatpush3.bf16.msra.mxu1 %v10464_v14  ;;  %7707 = vmatprep.mubr.msk.bf16.mxu1 %vm7706_vm9, %v12312_v34  ;;  %v5919_v14 = vsel %vm5885_vm12, %v9708_v29, %v5853_v46  ;;  %vm11931_vm12 = vmand %vm6253_vm6, %vm6279_vm7 }
 0x3fd   :  { %8248 = vmatprep.subr.bf16.mxu1 %v10563_v32  ;;  %v5985_v32 = vsel %vm5951_vm14, %v9727_v44, %v5919_v14  ;;  %v12019_v10 = vshra.s32 %v5490_v28, 8 }
 0x400   :  { %8249 = vmatpush3.bf16.msra.mxu1 %v10462_v21  ;;  %v6048_v21 = vsel %vm6014_vm15, %v9744_v51, %v5982_v6  ;;  %v5493_v6 = vadd.s32 3968, %v9578_v40 }
 0x401   :  { %8250 = vmatprep.subr.bf16.mxu1 %v10585_v30  ;;  %v6051_v30 = vsel %vm6017_vm1, %v9744_v51, %v5985_v32  ;;  %v6114_v11 = vsel %vm6080_vm0, %v9760_v60, %v6048_v21  ;;  %vm5623_vm1 = vcmp.eq.s32.totalorder %v11916_v50, 1  ;;  %v12400_v32 = vld [vmem:[#allocation7_spill] sm:$0xff] }
 0x402   :  { %v6180_v49 = vsel %vm6146_vm4, %v9780_v12, %v6114_v11  ;;  %v12021_v11 = vshra.s32 %v5493_v6, 8 }
 0x403   :  { %vm6213_vm8 = vcmp.eq.s32.totalorder %v6180_v49, %v9768_v7  ;;  %v12402_v49 = vld [vmem:[#allocation10_spill] sm:$0xff] }
 0x404   :  { %8251 = vmatpush3.bf16.msra.mxu1 %v10499_v47  ;;  %v6117_v47 = vsel %vm6083_vm2, %v9760_v60, %v6051_v30  ;;  %vm11942_vm15 = vmand %vm6188_vm3, %vm6213_vm8 }
 0x405   :  { %8252 = vmatprep.subr.bf16.mxu1 %v10583_v27  ;;  %v11914_v27 = vshra.s32 %v5488_v31, 8  ;;  %vm11959_vm2 = vmand %vm6253_vm6, %vm6282_vm13  ;;  %v12401_v31 = vld [vmem:[#allocation18_spill] sm:$0xff] }
 0x406   :  { %vm6343_vm7 = vmor %vm11942_vm15, %vm11931_vm12 }
 0x407   :  { %vm5554_vm9 = vcmp.eq.s32.totalorder %v11914_v27, 0  ;;  %vm5620_vm14 = vcmp.eq.s32.totalorder %v11914_v27, 1  ;;  %vm5686_vm4 = vcmp.eq.s32.totalorder %v11914_v27, 2  ;;  %vm5752_vm8 = vcmp.eq.s32.totalorder %v11914_v27, 3 }
 0x408   :  { %8253 = vmatpush3.bf16.msra.mxu1 %v10497_v3  ;;  %v6183_v3 = vsel %vm6149_vm5, %v9780_v12, %v6117_v47  ;;  %vm5689_vm5 = vcmp.eq.s32.totalorder %v11916_v50, 2  ;;  %vm5818_vm12 = vcmp.eq.s32.totalorder %v11914_v27, 4  ;;  %vm5884_vm15 = vcmp.eq.s32.totalorder %v11914_v27, 5 }
 0x409   :  { %8254 = vmatprep.subr.bf16.mxu1 %v10613_v9  ;;  %vm6216_vm11 = vcmp.eq.s32.totalorder %v6183_v3, %v9768_v7 }
 0x40a   :  { %vm11953_vm0 = vmand %vm6188_vm3, %vm6216_vm11 }
 0x40b   :  { %vm7708_vm11 = vmpackc.low %vm6343_vm7, %vm6343_vm7  ;;  %vm6082_vm7 = vcmp.eq.s32.totalorder %v11914_v27, 8 }
 0x40c   :  { %8255 = vmatpush3.bf16.msra.mxu1 %v10518_v2  ;;  %v12407_v2 = vld [vmem:[#allocation20_spill] sm:$0xff] }
 0x40d   :  { %8256 = vmatprep.subr.bf16.mxu1 %v10607_v26  ;;  %v5588_v26 = vsel %vm5554_vm9, %v9638_v54, 4294967295  ;;  %vm6346_vm9 = vmor %vm11953_vm0, %vm11959_vm2  ;;  %vm5950_vm0 = vcmp.eq.s32.totalorder %v11914_v27, 6  ;;  %vm5953_vm2 = vcmp.eq.s32.totalorder %v11916_v50, 6 }
 0x40e   :  { %v8174_v9 = vpop.f32.mrb[164].mxu1  ;;  %v5654_v13 = vsel %vm5620_vm14, %v9658_v4, %v5588_v26  ;;  %vm7710_vm13 = vmpackc.low %vm6346_vm9, %vm6346_vm9  ;;  %vm5821_vm14 = vcmp.eq.s32.totalorder %v11916_v50, 4  ;;  %vm6085_vm9 = vcmp.eq.s32.totalorder %v11916_v50, 8  ;;  %v12431_v26 = vld [vmem:[#allocation36_spill] sm:$0xff] }
 0x40f   :  { %v8175_v53 = vpop.f32.mrb[165].mxu1  ;;  %v5720_v17 = vsel %vm5686_vm4, %v9668_v8, %v5654_v13  ;;  %vm6016_vm4 = vcmp.eq.s32.totalorder %v11914_v27, 7 }
 0x410   :  { %v8176_v22 = vadd.f32 %v8175_v53, %v8174_v9  ;;  %8257 = vmatpush3.bf16.msra.mxu1 %v10516_v61  ;;  %v8177_v41 = vpop.f32.mrb[166].mxu1  ;;  %v5786_v55 = vsel %vm5752_vm8, %v9683_v15, %v5720_v17  ;;  %vm6148_vm8 = vcmp.eq.s32.totalorder %v11914_v27, 9  ;;  %v12403_v9 = vld [vmem:[#allocation17_spill] sm:$0xff]  ;;  %v12416_v17 = vld [vmem:[#allocation11_spill] sm:$0xff] }
 0x411   :  { %8258 = vmatprep.subr.bf16.mxu1 %v10639_v16  ;;  %v8178_v38 = vpop.f32.mrb[167].mxu1  ;;  %v12404_v53 = vld [vmem:[#allocation9_spill] sm:$0xff]  ;;  %v12415_v16 = vld [vmem:[#allocation19_spill] sm:$0xff] }
 0x412   :  { %v11949_v0 = vadd.f32 %v8176_v22, %v11773_v23  ;;  %v5657_v23 = vsel %vm5623_vm1, %v9658_v4, %v5591_v63  ;;  %vm5887_vm1 = vcmp.eq.s32.totalorder %v11916_v50, 5  ;;  %v12414_v63 = vld [vmem:[#allocation12_spill] sm:$0xff]  ;;  %v12428_v22 = vld [vmem:[#allocation25_spill] sm:$0xff] }
 0x414   :  { %8259 = vmatpush3.bf16.msra.mxu1 %v10538_v56  ;;  %v5723_v56 = vsel %vm5689_vm5, %v9668_v8, %v5657_v23  ;;  %vm6019_vm5 = vcmp.eq.s32.totalorder %v11916_v50, 7 }
 0x415   :  { %8260 = vmatprep.subr.bf16.mxu1 %v10637_v5  ;;  %v12393_v5 = vld [vmem:[#allocation14_spill] sm:$0xff]  ;;  %v5789_v37 = vsel %vm5755_vm10, %v9683_v15, %v5723_v56  ;;  %vm6151_vm10 = vcmp.eq.s32.totalorder %v11916_v50, 9 }
 0x416   :  { %v5855_v57 = vsel %vm5821_vm14, %v9697_v25, %v5789_v37  ;;  %vm5559_vm14 = vcmp.eq.s32.totalorder %v12021_v11, 0  ;;  %v12417_v56 = vld [vmem:[#allocation30_spill] sm:$0xff] }
 0x417   :  { %v5921_v43 = vsel %vm5887_vm1, %v9708_v29, %v5855_v57  ;;  %v5593_v41 = vsel %vm5559_vm14, %v9638_v54, 4294967295  ;;  %vm5757_vm14 = vcmp.eq.s32.totalorder %v12021_v11, 3  ;;  %v12418_v37 = vld [vmem:[#allocation22_spill] sm:$0xff] }
 0x418   :  { %8261 = vmatpush3.bf16.msra.mxu1 %v10536_v39  ;;  %v5852_v39 = vsel %vm5818_vm12, %v9697_v25, %v5786_v55  ;;  %v5987_v48 = vsel %vm5953_vm2, %v9727_v44, %v5921_v43  ;;  %vm5622_vm2 = vcmp.eq.s32.totalorder %v12019_v10, 1  ;;  %v12421_v43 = vld [vmem:[#allocation32_spill] sm:$0xff] }
 0x419   :  { %8268 = vmatprep.subr.bf16.mxu1 %v12393_v5  ;;  %v5918_v62 = vsel %vm5884_vm15, %v9708_v29, %v5852_v39  ;;  %v6053_v14 = vsel %vm6019_vm5, %v9744_v51, %v5987_v48  ;;  %vm5625_vm5 = vcmp.eq.s32.totalorder %v12021_v11, 1  ;;  %v12419_v39 = vld [vmem:[#allocation29_spill] sm:$0xff]  ;;  %v12422_v48 = vld [vmem:[#allocation24_spill] sm:$0xff] }
 0x41a   :  { %v5984_v1 = vsel %vm5950_vm0, %v9727_v44, %v5918_v62  ;;  %v6119_v30 = vsel %vm6085_vm9, %v9760_v60, %v6053_v14  ;;  %vm6284_vm0 = vcmp.eq.s32.totalorder %v11916_v50, %v9796_v20  ;;  %v5659_v18 = vsel %vm5625_vm5, %v9658_v4, %v5593_v41  ;;  %v12420_v62 = vld [vmem:[#allocation21_spill] sm:$0xff]  ;;  %v12424_v14 = vld [vmem:[#allocation23_spill] sm:$0xff] }
 0x41b   :  { %7709 = vmatmul.mubr.msk.bf16.vlgmr.msra.gmra.mrb[180].mxu1 %vm7708_vm11, %v12312_v34  ;;  %v6050_v46 = vsel %vm6016_vm4, %v9744_v51, %v5984_v1  ;;  %v6185_v3 = vsel %vm6151_vm10, %v9780_v12, %v6119_v30  ;;  %vm6281_vm11 = vcmp.eq.s32.totalorder %v11914_v27, %v9796_v20  ;;  %vm12061_vm9 = vmand %vm6253_vm6, %vm6284_vm0  ;;  %vm5691_vm10 = vcmp.eq.s32.totalorder %v12021_v11, 2  ;;  %v12426_v30 = vld [vmem:[#allocation26_spill] sm:$0xff] }
 0x41c   :  { %8269 = vmatpush3.bf16.msra.mxu1 %v12394_v45  ;;  %7711 = vmatprep.mubr.msk.bf16.mxu1 %vm7710_vm13, %v12312_v34  ;;  %v6116_v21 = vsel %vm6082_vm7, %v9760_v60, %v6050_v46  ;;  %vm5556_vm13 = vcmp.eq.s32.totalorder %v12019_v10, 0  ;;  %vm6218_vm15 = vcmp.eq.s32.totalorder %v6185_v3, %v9768_v7  ;;  %vm12036_vm1 = vmand %vm6253_vm6, %vm6281_vm11  ;;  %v5725_v23 = vsel %vm5691_vm10, %v9668_v8, %v5659_v18  ;;  %v12436_v18 = vld [vmem:[#allocation27_spill] sm:$0xff] }
 0x41d   :  { %8270 = vmatprep.subr.bf16.mxu1 %v12395_v19  ;;  %v6182_v47 = vsel %vm6148_vm8, %v9780_v12, %v6116_v21  ;;  %v5590_v27 = vsel %vm5556_vm13, %v9638_v54, 4294967295  ;;  %vm12055_vm7 = vmand %vm6188_vm3, %vm6218_vm15  ;;  %vm5688_vm8 = vcmp.eq.s32.totalorder %v12019_v10, 2  ;;  %v5791_v55 = vsel %vm5757_vm14, %v9683_v15, %v5725_v23  ;;  %v12438_v23 = vld [vmem:[#allocation38_spill] sm:$0xff] }
 0x41e   :  { %vm6215_vm12 = vcmp.eq.s32.totalorder %v6182_v47, %v9768_v7  ;;  %v5656_v38 = vsel %vm5622_vm2, %v9658_v4, %v5590_v27  ;;  %vm6348_vm13 = vmor %vm12055_vm7, %vm12061_vm9  ;;  %vm5823_vm2 = vcmp.eq.s32.totalorder %v12021_v11, 4  ;;  %vm5889_vm5 = vcmp.eq.s32.totalorder %v12021_v11, 5 }
 0x41f   :  { %vm12047_vm4 = vmand %vm6188_vm3, %vm6215_vm12  ;;  %v5722_v13 = vsel %vm5688_vm8, %v9668_v8, %v5656_v38  ;;  %vm5754_vm12 = vcmp.eq.s32.totalorder %v12019_v10, 3  ;;  %v5857_v19 = vsel %vm5823_vm2, %v9697_v25, %v5791_v55  ;;  %vm5952_vm7 = vcmp.eq.s32.totalorder %v12019_v10, 6  ;;  %v12434_v38 = vld [vmem:[#allocation28_spill] sm:$0xff]  ;;  %v12440_v55 = vld [vmem:[#allocation37_spill] sm:$0xff] }
 0x420   :  { %8271 = vmatpush3.bf16.msra.mxu1 %v12396_v36  ;;  %vm6345_vm11 = vmor %vm12047_vm4, %vm12036_vm1  ;;  %v5788_v5 = vsel %vm5754_vm12, %v9683_v15, %v5722_v13  ;;  %vm5820_vm1 = vcmp.eq.s32.totalorder %v12019_v10, 4  ;;  %vm5886_vm4 = vcmp.eq.s32.totalorder %v12019_v10, 5  ;;  %v5923_v36 = vsel %vm5889_vm5, %v9708_v29, %v5857_v19  ;;  %v12443_v19 = vld [vmem:[#allocation47_spill] sm:$0xff] }
 0x421   :  { %8272 = vmatprep.subr.bf16.mxu1 %v12397_v42  ;;  %vm7712_vm15 = vmpackc.low %vm6345_vm11, %vm6345_vm11  ;;  %v5854_v45 = vsel %vm5820_vm1, %v9697_v25, %v5788_v5  ;;  %vm5955_vm9 = vcmp.eq.s32.totalorder %v12021_v11, 6  ;;  %vm6018_vm8 = vcmp.eq.s32.totalorder %v12019_v10, 7  ;;  %vm6021_vm10 = vcmp.eq.s32.totalorder %v12021_v11, 7 }
 0x422   :  { %vm7714_vm0 = vmpackc.low %vm6348_vm13, %vm6348_vm13  ;;  %v5920_v57 = vsel %vm5886_vm4, %v9708_v29, %v5854_v45  ;;  %v5989_v1 = vsel %vm5955_vm9, %v9727_v44, %v5923_v36  ;;  %vm6084_vm11 = vcmp.eq.s32.totalorder %v12019_v10, 8  ;;  %v5492_v46 = vadd.s32 3840, %v9578_v40 }
 0x423   :  { %v5986_v42 = vsel %vm5952_vm7, %v9727_v44, %v5920_v57  ;;  %v6055_v28 = vsel %vm6021_vm10, %v9744_v51, %v5989_v1  ;;  %vm6087_vm13 = vcmp.eq.s32.totalorder %v12021_v11, 8  ;;  %vm6150_vm12 = vcmp.eq.s32.totalorder %v12019_v10, 9  ;;  %v12446_v1 = vld [vmem:[#allocation41_spill] sm:$0xff] }
 0x424   :  { %8273 = vmatpush3.bf16.msra.mxu1 %v12398_v35  ;;  %v12423_v35 = vld [vmem:[#allocation31_spill] sm:$0xff]  ;;  %v6121_v21 = vsel %vm6087_vm13, %v9760_v60, %v6055_v28  ;;  %vm6153_vm14 = vcmp.eq.s32.totalorder %v12021_v11, 9  ;;  %vm6286_vm5 = vcmp.eq.s32.totalorder %v12021_v11, %v9796_v20 }
 0x425   :  { %8274 = vmatprep.subr.bf16.mxu1 %v12399_v58  ;;  %v6052_v58 = vsel %vm6018_vm8, %v9744_v51, %v5986_v42  ;;  %v6187_v47 = vsel %vm6153_vm14, %v9780_v12, %v6121_v21  ;;  %vm6318_vm10 = vmand %vm6253_vm6, %vm6286_vm5  ;;  %v12445_v42 = vld [vmem:[#allocation42_spill] sm:$0xff] }
 0x426   :  { %v6118_v6 = vsel %vm6084_vm11, %v9760_v60, %v6052_v58  ;;  %vm6220_vm2 = vcmp.eq.s32.totalorder %v6187_v47, %v9768_v7 }
 0x427   :  { %v6184_v40 = vsel %vm6150_vm12, %v9780_v12, %v6118_v6  ;;  %vm6252_vm8 = vmand %vm6188_vm3, %vm6220_vm2 }
 0x428   :  { %8275 = vmatpush3.bf16.msra.mxu1 %v12400_v32  ;;  %v12425_v32 = vld [vmem:[#allocation34_spill] sm:$0xff]  ;;  %vm6217_vm1 = vcmp.eq.s32.totalorder %v6184_v40, %v9768_v7  ;;  %vm6350_vm12 = vmor %vm6252_vm8, %vm6318_vm10 }
 0x429   :  { %8276 = vmatprep.subr.bf16.mxu1 %v12401_v31  ;;  %v12120_v31 = vshra.s32 %v5492_v46, 8  ;;  %vm12145_vm9 = vmand %vm6188_vm3, %vm6217_vm1 }
 0x42b   :  { %vm5624_vm7 = vcmp.eq.s32.totalorder %v12120_v31, 1  ;;  %vm5690_vm11 = vcmp.eq.s32.totalorder %v12120_v31, 2  ;;  %vm5756_vm14 = vcmp.eq.s32.totalorder %v12120_v31, 3  ;;  %vm5822_vm1 = vcmp.eq.s32.totalorder %v12120_v31, 4 }
 0x42c   :  { %8277 = vmatpush3.bf16.msra.mxu1 %v12402_v49  ;;  %v12427_v49 = vld [vmem:[#allocation33_spill] sm:$0xff]  ;;  %vm5888_vm2 = vcmp.eq.s32.totalorder %v12120_v31, 5  ;;  %vm6020_vm5 = vcmp.eq.s32.totalorder %v12120_v31, 7  ;;  %vm6285_vm10 = vcmp.eq.s32.totalorder %v12120_v31, %v9796_v20 }
 0x42d   :  { %8278 = vmatprep.subr.bf16.mxu1 %v12403_v9 }
 0x430   :  { %8279 = vmatpush3.bf16.msra.mxu1 %v12404_v53 }
 0x431   :  { %8280 = vmatprep.subr.bf16.mxu1 %v12407_v2 }
 0x434   :  { %8281 = vmatpush3.bf16.msra.mxu1 %v12414_v63  ;;  %v12435_v63 = vld [vmem:[#allocation35_spill] sm:$0xff] }
 0x435   :  { %8282 = vmatprep.subr.bf16.mxu1 %v12415_v16  ;;  %v12437_v16 = vld [vmem:[#allocation46_spill] sm:$0xff] }
 0x438   :  { %8283 = vmatpush3.bf16.msra.mxu1 %v12416_v17 }
 0x439   :  { %8290 = vmatprep.subr.bf16.mxu1 %v12417_v56  ;;  %v12439_v56 = vld [vmem:[#allocation45_spill] sm:$0xff] }
 0x43b   :  { %7713 = vmatmul.mubr.msk.bf16.vlgmr.msra.gmra.mrb[184].mxu1 %vm7712_vm15, %v12312_v34  ;;  %vm6283_vm15 = vcmp.eq.s32.totalorder %v12019_v10, %v9796_v20 }
 0x43c   :  { %8291 = vmatpush3.bf16.msra.mxu1 %v12418_v37  ;;  %7715 = vmatprep.mubr.msk.bf16.mxu1 %vm7714_vm0, %v12312_v34  ;;  %vm5558_vm0 = vcmp.eq.s32.totalorder %v12120_v31, 0  ;;  %vm12134_vm4 = vmand %vm6253_vm6, %vm6283_vm15  ;;  %v12441_v37 = vld [vmem:[#allocation48_spill] sm:$0xff] }
 0x43d   :  { %8292 = vmatprep.subr.bf16.mxu1 %v12419_v39  ;;  %v5592_v10 = vsel %vm5558_vm0, %v9638_v54, 4294967295  ;;  %vm6347_vm13 = vmor %vm12145_vm9, %vm12134_vm4  ;;  %vm5954_vm4 = vcmp.eq.s32.totalorder %v12120_v31, 6  ;;  %v12442_v39 = vld [vmem:[#allocation40_spill] sm:$0xff]  ;;  %vm6152_vm9 = vcmp.eq.s32.totalorder %v12120_v31, 9 }
 0x43e   :  { %v5658_v11 = vsel %vm5624_vm7, %v9658_v4, %v5592_v10  ;;  %vm7716_vm15 = vmpackc.low %vm6347_vm13, %vm6347_vm13  ;;  %vm6086_vm7 = vcmp.eq.s32.totalorder %v12120_v31, 8 }
 0x43f   :  { %vm7718_vm0 = vmpackc.low %vm6350_vm12, %vm6350_vm12 }
 0x440   :  { %8293 = vmatpush3.bf16.msra.mxu1 %v12420_v62  ;;  %v12444_v62 = vld [vmem:[#allocation39_spill] sm:$0xff]  ;;  %vm6317_vm13 = vmand %vm6253_vm6, %vm6285_vm10  ;;  %vm7055_vm6 = vcmp.eq.s32.totalorder %v9768_v7, %v9638_v54  ;;  %vm7096_vm10 = vcmask 1047554  }
 0x441   :  { %8294 = vmatprep.subr.bf16.mxu1 %v12421_v43 }
 0x444   :  { %8295 = vmatpush3.bf16.msra.mxu1 %v12422_v48 }
 0x445   :  { %8296 = vmatprep.subr.bf16.mxu1 %v12423_v35 }
 0x448   :  { %8297 = vmatpush3.bf16.msra.mxu1 %v12424_v14 }
 0x449   :  { %8298 = vmatprep.subr.bf16.mxu1 %v12425_v32 }
 0x44c   :  { %8299 = vmatpush3.bf16.msra.mxu1 %v12426_v30 }
 0x44d   :  { %8300 = vmatprep.subr.bf16.mxu1 %v12427_v49 }
 0x44e   :  { %v8196_v3 = vpop.f32.mrb[168].mxu1 }
 0x44f   :  { %v8197_v9 = vpop.f32.mrb[169].mxu1 }
 0x450   :  { %v8198_v53 = vadd.f32 %v8197_v9, %v8196_v3  ;;  %8301 = vmatpush3.bf16.msra.mxu1 %v12428_v22  ;;  %v8199_v2 = vpop.f32.mrb[170].mxu1 }
 0x451   :  { %8302 = vmatprep.subr.bf16.mxu1 %v12431_v26  ;;  %v8200_v50 = vpop.f32.mrb[171].mxu1  ;;  %v9147_v2 = vmov 0.0  }
 0x452   :  { %v6810_v61 = vadd.f32 %v8198_v53, %v11949_v0  ;;  %v5724_v0 = vsel %vm5690_vm11, %v9668_v8, %v5658_v11  ;;  %v7056_v26 = vsel %vm7055_vm6, 1.0, %v9147_v2  ;;  %vm7127_vm6 = vcmask 15370  }
 0x453   :  { %v5790_v13 = vsel %vm5756_vm14, %v9683_v15, %v5724_v0 }
 0x454   :  { %8303 = vmatpush3.bf16.msra.mxu1 %v12434_v38  ;;  %v5856_v17 = vsel %vm5822_vm1, %v9697_v25, %v5790_v13  ;;  %vm7064_vm1 = vcmp.eq.s32.totalorder %v9768_v7, %v9683_v15 }
 0x455   :  { %8304 = vmatprep.subr.bf16.mxu1 %v12435_v63  ;;  %v5922_v5 = vsel %vm5888_vm2, %v9708_v29, %v5856_v17  ;;  %v7065_v38 = vsel %vm7064_vm1, 1.0, %v9147_v2  ;;  %vm7067_vm2 = vcmp.eq.s32.totalorder %v9768_v7, %v9697_v25 }
 0x456   :  { %v5988_v45 = vsel %vm5954_vm4, %v9727_v44, %v5922_v5  ;;  %v7068_v63 = vsel %vm7067_vm2, 1.0, %v9147_v2  ;;  %vm7070_vm4 = vcmp.eq.s32.totalorder %v9768_v7, %v9708_v29 }
 0x457   :  { %v6054_v57 = vsel %vm6020_vm5, %v9744_v51, %v5988_v45  ;;  %v7071_v0 = vsel %vm7070_vm4, 1.0, %v9147_v2  ;;  %vm7073_vm5 = vcmp.eq.s32.totalorder %v9768_v7, %v9727_v44 }
 0x458   :  { %8305 = vmatpush3.bf16.msra.mxu1 %v12436_v18  ;;  %v6120_v36 = vsel %vm6086_vm7, %v9760_v60, %v6054_v57  ;;  %v7074_v18 = vsel %vm7073_vm5, 1.0, %v9147_v2  ;;  %vm7076_vm7 = vcmp.eq.s32.totalorder %v9768_v7, %v9744_v51 }
 0x459   :  { %8312 = vmatprep.subr.bf16.mxu1 %v12437_v16  ;;  %v6186_v43 = vsel %vm6152_vm9, %v9780_v12, %v6120_v36  ;;  %vm7079_vm9 = vcmp.eq.s32.totalorder %v9768_v7, %v9760_v60 }
 0x45a   :  { %vm6219_vm8 = vcmp.eq.s32.totalorder %v6186_v43, %v9768_v7 }
 0x45b   :  { %7717 = vmatmul.mubr.msk.bf16.vlgmr.msra.gmra.mrb[188].mxu1 %vm7716_vm15, %v12312_v34  ;;  %vm6251_vm11 = vmand %vm6188_vm3, %vm6219_vm8  ;;  %vm7058_vm15 = vcmp.eq.s32.totalorder %v9768_v7, %v9658_v4  ;;  %vm7082_vm8 = vcmp.eq.s32.totalorder %v9768_v7, %v9780_v12 }
 0x45c   :  { %8313 = vmatpush3.bf16.msra.mxu1 %v12438_v23  ;;  %7719 = vmatprep.mubr.msk.bf16.mxu1 %vm7718_vm0, %v12312_v34  ;;  %vm6349_vm12 = vmor %vm6251_vm11, %vm6317_vm13  ;;  %v7059_v41 = vsel %vm7058_vm15, 1.0, %v9147_v2  ;;  %vm7061_vm0 = vcmp.eq.s32.totalorder %v9768_v7, %v9668_v8  ;;  %vm7108_vm13 = vcmask 7170  }
 0x45d   :  { %8314 = vmatprep.subr.bf16.mxu1 %v12439_v56  ;;  %vm7720_vm14 = vmpackc.low %vm6349_vm12, %vm6349_vm12  ;;  %v7060_v50 = vadd.f32 %v7059_v41, %v7056_v26  ;;  %v7077_v56 = vsel %vm7076_vm7, 1.0, %v9147_v2 }
 0x460   :  { %8315 = vmatpush3.bf16.msra.mxu1 %v12440_v55  ;;  %v7080_v55 = vsel %vm7079_vm9, 1.0, %v9147_v2 }
 0x461   :  { %8316 = vmatprep.subr.bf16.mxu1 %v12441_v37  ;;  %v7083_v37 = vsel %vm7082_vm8, 1.0, %v9147_v2 }
 0x464   :  { %8317 = vmatpush3.bf16.msra.mxu1 %v12442_v39 }
 0x465   :  { %8318 = vmatprep.subr.bf16.mxu1 %v12443_v19 }
 0x468   :  { %8319 = vmatpush3.bf16.msra.mxu1 %v12444_v62 }
 0x469   :  { %8320 = vmatprep.subr.bf16.mxu1 %v11282_v24  ;;  %v12447_v24 = vld [vmem:[#allocation44_spill] sm:$0xff] }
 0x46c   :  { %8321 = vmatpush3.bf16.msra.mxu1 %v12445_v42 }
 0x46d   :  { %8322 = vmatprep.subr.bf16.mxu1 %v11269_v33  ;;  %v12448_v33 = vld [vmem:[#allocation43_spill] sm:$0xff] }
 0x470   :  { %8323 = vmatpush3.bf16.msra.mxu1 %v12446_v1  ;;  %v7092_v1 = vsub.s32 0, %v9768_v7 }
 0x471   :  { %8324 = vmatprep.subr.bf16.mxu1 %v11294_v59 }
 0x474   :  { %8325 = vmatpush3.bf16.msra.mxu1 %v12447_v24  ;;  %v7112_v24 = vsub.s32 1, %v9768_v7 }
 0x475   :  { %8326 = vmatprep.subr.bf16.mxu1 %v11284_v52 }
 0x478   :  { %8327 = vmatpush3.bf16.msra.mxu1 %v12448_v33 }
 0x47b   :  { %7721 = vmatmul.mubr.msk.bf16.vlgmr.msra.gmra.mrb[192].mxu1 %vm7720_vm14, %v12312_v34 }
 0x48e   :  { %v8218_v20 = vpop.f32.mrb[172].mxu1 }
 0x48f   :  { %v8219_v48 = vpop.f32.mrb[173].mxu1 }
 0x490   :  { %v8220_v35 = vadd.f32 %v8219_v48, %v8218_v20  ;;  %v8221_v59 = vpop.f32.mrb[174].mxu1 }
 0x491   :  { %v8222_v58 = vpop.f32.mrb[175].mxu1 }
 0x492   :  { %v6850_v46 = vadd.f32 %v8220_v35, %v6810_v61  ;;  %v7062_v61 = vsel %vm7061_vm0, 1.0, %v9147_v2 }
 0x493   :  { %v7063_v11 = vadd.f32 %v7062_v61, %v7060_v50 }
 0x495   :  { %v7066_v54 = vadd.f32 %v7065_v38, %v7063_v11 }
 0x497   :  { %v7069_v4 = vadd.f32 %v7068_v63, %v7066_v54 }
 0x499   :  { %v7072_v8 = vadd.f32 %v7071_v0, %v7069_v4 }
 0x49b   :  { %v7075_v25 = vadd.f32 %v7074_v18, %v7072_v8 }
 0x49d   :  { %v7078_v29 = vadd.f32 %v7077_v56, %v7075_v25 }
 0x49f   :  { %v7081_v44 = vadd.f32 %v7080_v55, %v7078_v29 }
 0x4a1   :  { %v7084_v45 = vadd.f32 %v7083_v37, %v7081_v44 }
 0x4a3   :  { %v7085_v39 = vmax.f32 %v7084_v45, 1.0 }
 0x4a5   :  { %v7086_v51 = vsel %vm6188_vm3, %v7085_v39, 1.0 }
 0x4a6   :  { %9125 = vrcp.f32 %v7086_v51 }
 0x4b0   :  { %v9126_v43 = vpop.eup %9125 }
 0x4ce   :  { %v8240_v28 = vpop.f32.mrb[176].mxu1 }
 0x4cf   :  { %v8241_v14 = vpop.f32.mrb[177].mxu1 }
 0x4d0   :  { %v8242_v6 = vadd.f32 %v8241_v14, %v8240_v28  ;;  %v8243_v32 = vpop.f32.mrb[178].mxu1 }
 0x4d1   :  { %v8244_v21 = vpop.f32.mrb[179].mxu1 }
 0x4d2   :  { %v6890_v31 = vadd.f32 %v8242_v6, %v6850_v46 }
 0x4ee   :  { %v8262_v40 = vpop.f32.mrb[180].mxu1 }
 0x4ef   :  { %v8263_v52 = vpop.f32.mrb[181].mxu1 }
 0x4f0   :  { %v8264_v30 = vadd.f32 %v8263_v52, %v8262_v40  ;;  %v8265_v47 = vpop.f32.mrb[182].mxu1 }
 0x4f1   :  { %v8266_v49 = vpop.f32.mrb[183].mxu1 }
 0x4f2   :  { %v6930_v3 = vadd.f32 %v8264_v30, %v6890_v31 }
 0x50e   :  { %v8284_v9 = vpop.f32.mrb[184].mxu1 }
 0x50f   :  { %v8285_v34 = vpop.f32.mrb[185].mxu1 }
 0x510   :  { %v8286_v53 = vadd.f32 %v8285_v34, %v8284_v9  ;;  %v8287_v22 = vpop.f32.mrb[186].mxu1 }
 0x511   :  { %v8288_v27 = vpop.f32.mrb[187].mxu1 }
 0x512   :  { %v6970_v10 = vadd.f32 %v8286_v53, %v6930_v3 }
 0x52e   :  { %v8306_v16 = vpop.f32.mrb[188].mxu1 }
 0x52f   :  { %v8307_v15 = vpop.f32.mrb[189].mxu1 }
 0x530   :  { %v8308_v13 = vadd.f32 %v8307_v15, %v8306_v16  ;;  %v8309_v23 = vpop.f32.mrb[190].mxu1 }
 0x531   :  { %v8310_v17 = vpop.f32.mrb[191].mxu1 }
 0x532   :  { %v7010_v5 = vadd.f32 %v8308_v13, %v6970_v10 }
 0x54e   :  { %v8328_v19 = vpop.f32.mrb[192].mxu1 }
 0x54f   :  { %v8329_v57 = vpop.f32.mrb[193].mxu1 }
 0x550   :  { %v8330_v62 = vadd.f32 %v8329_v57, %v8328_v19  ;;  %v8331_v36 = vpop.f32.mrb[194].mxu1 }
 0x551   :  { %v8332_v42 = vpop.f32.mrb[195].mxu1 }
 0x552   :  { %v7050_v60 = vadd.f32 %v8330_v62, %v7010_v5 }
 0x554   :  { %v7089_v12 = vmul.f32 %v9126_v43, %v7050_v60 }
 0x556   :  { %v7093_v33 = vrot.slane %v7089_v12, %v7092_v1  ;;  %v7113_v20 = vrot.slane %v7089_v12, %v7112_v24 }
 0x558   :  { %v7094_v48 = vsub.f32 %v7089_v12, %v7093_v33  ;;  %v7114_v35 = vsub.f32 %v7089_v12, %v7113_v20 }
 0x55a   :  { %v7095_v59 = vmul.f32 %v7094_v48, %v7094_v48  ;;  %v7115_v46 = vmul.f32 %v7114_v35, %v7114_v35 }
 0x55c   :  { %v7097_v58 = vsel %vm7096_vm10, %v7095_v59, 0.0  ;;  %v7116_v28 = vsel %vm7096_vm10, %v7115_v46, 0.0 }
 0x55d   :  { %7098 = vadd.xlane.f32.xlu0 %v7097_v58 }
 0x561   :  { %7117 = vadd.xlane.f32.xlu0 %v7116_v28 }
 0x5ea   :  { %v7099_v14 = vpop.xlane.xlu0 %7098 }
 0x5eb   :  { %9127 = vrsqrt.f32 %v7099_v14  ;;  %vm7102_vm3 = vcmp.eq.f32.partialorder %v7099_v14, inf  ;;  %v7105_v7 = vand.u32 2147483648, %v7099_v14  ;;  %vm7104_vm11 = vcmp.eq.f32.partialorder %v7099_v14, 0.0 }
 0x5ee   :  { %v7118_v6 = vpop.xlane.xlu0 %7117 }
 0x5ef   :  { %9129 = vrsqrt.f32 %v7118_v6  ;;  %vm7121_vm12 = vcmp.eq.f32.partialorder %v7118_v6, inf  ;;  %v7124_v49 = vand.u32 2147483648, %v7118_v6  ;;  %vm7123_vm14 = vcmp.eq.f32.partialorder %v7118_v6, 0.0 }
 0x5f5   :  { %v9128_v32 = vpop.eup %9127 }
 0x5f6   :  { %v7101_v21 = vmul.f32 %v9128_v32, %v7099_v14 }
 0x5f8   :  { %v7103_v31 = vsel %vm7102_vm3, %v7099_v14, %v7101_v21 }
 0x5f9   :  { %v9130_v40 = vpop.eup %9129  ;;  %v7106_v52 = vsel %vm7104_vm11, %v7105_v7, %v7103_v31 }
 0x5fa   :  { %v7107_v30 = vsub.f32 0.0, %v7106_v52  ;;  %v7120_v47 = vmul.f32 %v9130_v40, %v7118_v6 }
 0x5fc   :  { %7109 = vst.msk [vmem:[%s12237_s3 - $0x2] sm:$0xfc] %vm7108_vm13, %v7107_v30  ;;  %v7122_v3 = vsel %vm7121_vm12, %v7118_v6, %v7120_v47 }
 0x5fd   :  { %v7125_v9 = vsel %vm7123_vm14, %v7124_v49, %v7122_v3 }
 0x5fe   :  { %v7126_v34 = vsub.f32 0.0, %v7125_v9 }
 0x600   :  { %7128 = vst.msk [vmem:[%s12237_s3 - $0x2] sm:$0xfc] %vm7127_vm6, %v7126_v34 }

</bundles_post_ra>
